<compile_context>
chip_gen: v7x
topology: tpu7x:2x2x1
jax: 0.10.0
libtpu: 0.0.40
codegen_flags: <defaults>
</compile_context>

<pallas_src>
import jax
import jax.numpy as jnp
from jax.experimental import pallas as pl
from jax.experimental.pallas import tpu as pltpu

# ---- config consistent with the module ---------------------------------------
BATCH = 2
SEQ = 8
INPUT_DIM = 16
HIDDEN = 32                      # hidden_dim
NUM_LAYERS = 2
NUM_HEADS = 8
EMBED = 2 * HIDDEN               # bidirectional GRU output = 64
HEAD_DIM = EMBED // NUM_HEADS    # 8
EPS = 1e-5


def _full_spec(shape):
    n = len(shape)
    return pl.BlockSpec(shape, lambda *_: (0,) * n)


# -------------------------------------------------------------------------------
# One bidirectional GRU layer, traced fully inside the fused kernel.
#   x_flat : (S*B, Din)  time-major rows (row = t*B + b)
#   wih    : (Din, 6H)   columns = [r_f z_f n_f | r_b z_b n_b]
#   whh    : (2H, 6H)    block-diagonal over direction (fwd top-left, bwd bottom-right)
#   bih/bhh: (1, 6H)
# returns  : (S*B, 2H)   time-major, features = [forward | backward] (torch layout)
# -------------------------------------------------------------------------------
def _bigru_layer(x_flat, wih, whh, bih, bhh):
    S, B, H = SEQ, BATCH, HIDDEN
    # Hoisted input projection for both directions & all timesteps: one GEMM.
    gi = jnp.dot(x_flat, wih, preferred_element_type=jnp.float32) + bih   # (S*B, 6H)
    h = jnp.zeros((B, 2 * H), jnp.float32)                                # [h_fwd | h_bwd]
    hf = [None] * S
    hb = [None] * S
    for t in range(S):                       # static unroll, S = 8
        tb = S - 1 - t                       # backward chain walks reversed time
        # single MXU dot per step for BOTH directions (block-diag whh)
        gh = jnp.dot(h, whh, preferred_element_type=jnp.float32) + bhh    # (B, 6H)
        gif = gi[t * B:(t + 1) * B, :3 * H]
        gib = gi[tb * B:(tb + 1) * B, 3 * H:]
        ghf = gh[:, :3 * H]
        ghb = gh[:, 3 * H:]
        # forward chain (PyTorch GRU convention: bhh_n inside the r multiply)
        rf = jax.nn.sigmoid(gif[:, :H] + ghf[:, :H])
        zf = jax.nn.sigmoid(gif[:, H:2 * H] + ghf[:, H:2 * H])
        nf = jnp.tanh(gif[:, 2 * H:] + rf * ghf[:, 2 * H:])
        h_f = (1.0 - zf) * nf + zf * h[:, :H]
        # backward chain (independent -> interleaves with the forward chain)
        rb = jax.nn.sigmoid(gib[:, :H] + ghb[:, :H])
        zb = jax.nn.sigmoid(gib[:, H:2 * H] + ghb[:, H:2 * H])
        nb = jnp.tanh(gib[:, 2 * H:] + rb * ghb[:, 2 * H:])
        h_b = (1.0 - zb) * nb + zb * h[:, H:]
        h = jnp.concatenate([h_f, h_b], axis=-1)
        hf[t] = h_f
        hb[tb] = h_b
    rows = [jnp.concatenate([hf[t], hb[t]], axis=-1) for t in range(S)]   # (B, 2H) each
    return jnp.concatenate(rows, axis=0)                                  # (S*B, 2H)


# -------------------------------------------------------------------------------
# Fully fused forward kernel (grid=(1,)): GRU stack + MHA + pool + classifier.
# -------------------------------------------------------------------------------
def fused_forward_kernel(x_ref,
                         wih0_ref, whh0_ref, bih0_ref, bhh0_ref,
                         wih1_ref, whh1_ref, bih1_ref, bhh1_ref,
                         wqkv_ref, bqkv_ref, wo_ref, bo_ref,
                         w1_ref, b1_ref, w2_ref, b2_ref, w3t_ref, b3_ref,
                         o_ref):
    S, B, D, H, E = SEQ, BATCH, INPUT_DIM, HIDDEN, EMBED
    SB = S * B

    # ---- assemble time-major (S*B, D) input from the (B, S*D) view (pure lane slices)
    xv = x_ref[...]                                                       # (B, S*D)
    x_flat = jnp.concatenate(
        [xv[:, t * D:(t + 1) * D] for t in range(S)], axis=0)             # (S*B, D)

    # ---- 2 fused bidirectional GRU layers (bn_in folded into wih0) ------------
    y = _bigru_layer(x_flat, wih0_ref[...], whh0_ref[...], bih0_ref[...], bhh0_ref[...])
    y = _bigru_layer(y, wih1_ref[...], whh1_ref[...], bih1_ref[...], bhh1_ref[...])
    # TODO(synk): inter-layer dropout & training-mode BN stats are inference-mode
    # by construction (identity / running-stat affine folded into weights).

    # ---- multi-head self-attention (bn_gru + 1/sqrt(head_dim) folded in wqkv) -
    qkv = jnp.dot(y, wqkv_ref[...], preferred_element_type=jnp.float32) + bqkv_ref[...]
    q, k, v = qkv[:, :E], qkv[:, E:2 * E], qkv[:, 2 * E:]

    # rows stay time-major (row = t*B + b); restrict attention to same batch
    row_id = jax.lax.broadcasted_iota(jnp.int32, (SB, SB), 0)
    col_id = jax.lax.broadcasted_iota(jnp.int32, (SB, SB), 1)
    neg = jnp.where((row_id % B) == (col_id % B), 0.0, -1e30).astype(jnp.float32)

    ctx_parts = []
    for hh in range(NUM_HEADS):                       # static, 8 heads; lane slices only
        c0 = hh * HEAD_DIM
        qh = q[:, c0:c0 + HEAD_DIM]
        kh = k[:, c0:c0 + HEAD_DIM]
        vh = v[:, c0:c0 + HEAD_DIM]
        sc = jax.lax.dot_general(qh, kh, (((1,), (1,)), ((), ())),
                                 preferred_element_type=jnp.float32) + neg     # (SB, SB)
        sc = sc - jnp.max(sc, axis=-1, keepdims=True)
        p = jnp.exp(sc)
        p = p * pl.reciprocal(jnp.sum(p, axis=-1, keepdims=True), approx=True)
        ctx_parts.append(jnp.dot(p, vh, preferred_element_type=jnp.float32))   # (SB, hd)
    ctx = jnp.concatenate(ctx_parts, axis=-1)                                  # (SB, E)

    # ---- per-batch mean pool over the sequence (hoisted before out-proj; exact)
    prow = jax.lax.broadcasted_iota(jnp.int32, (B, SB), 0)
    pcol = jax.lax.broadcasted_iota(jnp.int32, (B, SB), 1)
    pool = jnp.where(prow == (pcol % B), 1.0 / S, 0.0).astype(jnp.float32)     # (B, SB)
    pooled_ctx = jnp.dot(pool, ctx, preferred_element_type=jnp.float32)        # (B, E)
    pooled = jnp.dot(pooled_ctx, wo_ref[...],
                     preferred_element_type=jnp.float32) + bo_ref[...]         # (B, E)

    # ---- classifier head (bn_attn, bn_c1, bn_c2 folded) -----------------------
    h1 = jnp.maximum(
        jnp.dot(pooled, w1_ref[...], preferred_element_type=jnp.float32) + b1_ref[...], 0.0)
    h2 = jnp.maximum(
        jnp.dot(h1, w2_ref[...], preferred_element_type=jnp.float32) + b2_ref[...], 0.0)
    # final (32 -> 1) as multiply + lane reduce (avoids an N=1 matmul)
    o_ref[...] = jnp.sum(h2 * w3t_ref[...], axis=-1, keepdims=True) + b3_ref[...]


# -------------------------------------------------------------------------------
# Full forward pass: one pallas_call, everything VMEM-resident.
# -------------------------------------------------------------------------------
def model_forward(x, kp):
    b, s, d = x.shape
    x2 = x.reshape(b, s * d)                    # free view; kernel re-slices per timestep
    g0, g1 = kp["gru"]
    m = kp["attn_head"]
    args = (x2,
            g0["wih"], g0["whh"], g0["bih"], g0["bhh"],
            g1["wih"], g1["whh"], g1["bih"], g1["bhh"],
            m["wqkv"], m["bqkv"], m["wo"], m["bo"],
            m["w1"], m["b1"], m["w2"], m["b2"], m["w3t"], m["b3"])
    return pl.pallas_call(
        fused_forward_kernel,
        out_shape=jax.ShapeDtypeStruct((b, 1), jnp.float32),
        grid=(1,),
        in_specs=[_full_spec(a.shape) for a in args],
        out_specs=_full_spec((b, 1)),
        compiler_params=pltpu.CompilerParams(dimension_semantics=("arbitrary",)),
    )(*args)


# -------------------------------------------------------------------------------
# Parameter init (raw module-style params) and eval-mode BN folding / packing.
# -------------------------------------------------------------------------------
def init_params(key):
    keys = iter(jax.random.split(key, 64))

    def nrm(shape, sc=0.1):
        return sc * jax.random.normal(next(keys), shape, jnp.float32)

    def uni(shape, lo=0.5, hi=1.5):
        return jax.random.uniform(next(keys), shape, jnp.float32, lo, hi)

    def bn(c):
        return dict(gamma=uni((c,)), beta=nrm((c,)), mean=nrm((c,)), var=uni((c,)))

    p = {"bn_in": bn(INPUT_DIM)}

    gru = []
    for layer in range(NUM_LAYERS):
        in_size = INPUT_DIM if layer == 0 else EMBED
        layer_p = {}
        for dname in ("fwd", "bwd"):
            layer_p[dname] = dict(
                wih=nrm((in_size, 3 * HIDDEN)),   # packed gates (r, z, n) along lanes
                whh=nrm((HIDDEN, 3 * HIDDEN)),
                bih=nrm((1, 3 * HIDDEN)),
                bhh=nrm((1, 3 * HIDDEN)),
            )
        gru.append(layer_p)
    p["gru"] = gru
    p["bn_gru"] = bn(EMBED)

    p["mha"] = dict(
        wq=nrm((EMBED, EMBED)), wk=nrm((EMBED, EMBED)), wv=nrm((EMBED, EMBED)),
        bq=nrm((1, EMBED)), bk=nrm((1, EMBED)), bv=nrm((1, EMBED)),
        wo=nrm((EMBED, EMBED)), bo=nrm((1, EMBED)),
    )
    p["bn_attn"] = bn(EMBED)

    p["head"] = dict(
        w1=nrm((EMBED, HIDDEN)), b1=nrm((1, HIDDEN)),
        w2=nrm((HIDDEN, 32)), b2=nrm((1, 32)),
        w3=nrm((32, 1)), b3=nrm((1, 1)),
    )
    p["bn_c1"] = bn(HIDDEN)
    p["bn_c2"] = bn(32)
    return p


def _bn_vec(bn):
    inv = jax.lax.rsqrt(bn["var"] + EPS)
    scale = bn["gamma"] * inv
    shift = bn["beta"] - bn["mean"] * scale
    return scale, shift


def prepare_params(p):
    """Fold eval-mode BatchNorms into adjacent weights; pack/merge GRU directions."""
    s_in, t_in = _bn_vec(p["bn_in"])
    s_gru, t_gru = _bn_vec(p["bn_gru"])
    s_attn, t_attn = _bn_vec(p["bn_attn"])
    s_c1, t_c1 = _bn_vec(p["bn_c1"])
    s_c2, t_c2 = _bn_vec(p["bn_c2"])

    gru_layers = []
    for li, lp in enumerate(p["gru"]):
        folded = {}
        for dname in ("fwd", "bwd"):
            wih = lp[dname]["wih"]
            bih = lp[dname]["bih"]
            if li == 0:                               # fold input BatchNorm (exact)
                bih = bih + t_in[None, :] @ wih
                wih = s_in[:, None] * wih
            folded[dname] = (wih, bih, lp[dname]["whh"], lp[dname]["bhh"])
        # concat directions along lanes; block-diag hidden weights -> one dot/step
        wih_c = jnp.concatenate([folded["fwd"][0], folded["bwd"][0]], axis=1)   # (Din, 6H)
        bih_c = jnp.concatenate([folded["fwd"][1], folded["bwd"][1]], axis=1)   # (1, 6H)
        bhh_c = jnp.concatenate([folded["fwd"][3], folded["bwd"][3]], axis=1)   # (1, 6H)
        whh_c = jnp.zeros((2 * HIDDEN, 6 * HIDDEN), jnp.float32)
        whh_c = whh_c.at[:HIDDEN, :3 * HIDDEN].set(folded["fwd"][2])
        whh_c = whh_c.at[HIDDEN:, 3 * HIDDEN:].set(folded["bwd"][2])
        gru_layers.append(dict(wih=wih_c, whh=whh_c, bih=bih_c, bhh=bhh_c))

    # MHA: pack Q|K|V, fold lstm_norm (input side) and softmax scale into Q columns
    m = p["mha"]
    wqkv = jnp.concatenate([m["wq"], m["wk"], m["wv"]], axis=1)        # (E, 3E)
    bqkv = jnp.concatenate([m["bq"], m["bk"], m["bv"]], axis=1)        # (1, 3E)
    bqkv = bqkv + t_gru[None, :] @ wqkv
    wqkv = s_gru[:, None] * wqkv
    scale = 1.0 / (HEAD_DIM ** 0.5)
    col_scale = jnp.concatenate([jnp.full((EMBED,), scale, jnp.float32),
                                 jnp.ones((2 * EMBED,), jnp.float32)])
    wqkv = wqkv * col_scale[None, :]
    bqkv = bqkv * col_scale[None, :]

    # classifier: fold attention_norm (input side of w1) + bn_c1/bn_c2 (output side)
    head = p["head"]
    w1, b1 = head["w1"], head["b1"]
    b1 = b1 + t_attn[None, :] @ w1
    w1 = s_attn[:, None] * w1
    w1 = w1 * s_c1[None, :]
    b1 = b1 * s_c1[None, :] + t_c1[None, :]
    w2 = head["w2"] * s_c2[None, :]
    b2 = head["b2"] * s_c2[None, :] + t_c2[None, :]

    return dict(
        gru=gru_layers,
        attn_head=dict(wqkv=wqkv, bqkv=bqkv, wo=m["wo"], bo=m["bo"],
                       w1=w1, b1=b1, w2=w2, b2=b2,
                       w3t=head["w3"].T, b3=head["b3"]),
    )


if __name__ == "__main__":
    key = jax.random.PRNGKey(0)
    pkey, xkey = jax.random.split(key)
    raw_params = init_params(pkey)
    kernel_params = prepare_params(raw_params)
    x = jax.random.normal(xkey, (BATCH, SEQ, INPUT_DIM), jnp.float32)

    out = jax.jit(model_forward)(x, kernel_params)
    out = jax.block_until_ready(out)
    assert out.shape == (BATCH, 1) and out.dtype == jnp.float32
    assert bool(jnp.all(jnp.isfinite(out)))
    print("KERNEL_OK")
</pallas_src>

<mosaic_0001>
module attributes {stable_mosaic.version = 11 : i64} {
  func.func @fused_forward_kernel(%arg0: i32, %arg1: memref<2x128xf32, #tpu.memory_space<vmem>>, %arg2: memref<16x192xf32, #tpu.memory_space<vmem>>, %arg3: memref<64x192xf32, #tpu.memory_space<vmem>>, %arg4: memref<1x192xf32, #tpu.memory_space<vmem>>, %arg5: memref<1x192xf32, #tpu.memory_space<vmem>>, %arg6: memref<64x192xf32, #tpu.memory_space<vmem>>, %arg7: memref<64x192xf32, #tpu.memory_space<vmem>>, %arg8: memref<1x192xf32, #tpu.memory_space<vmem>>, %arg9: memref<1x192xf32, #tpu.memory_space<vmem>>, %arg10: memref<64x192xf32, #tpu.memory_space<vmem>>, %arg11: memref<1x192xf32, #tpu.memory_space<vmem>>, %arg12: memref<64x64xf32, #tpu.memory_space<vmem>>, %arg13: memref<1x64xf32, #tpu.memory_space<vmem>>, %arg14: memref<64x32xf32, #tpu.memory_space<vmem>>, %arg15: memref<1x32xf32, #tpu.memory_space<vmem>>, %arg16: memref<32x32xf32, #tpu.memory_space<vmem>>, %arg17: memref<1x32xf32, #tpu.memory_space<vmem>>, %arg18: memref<1x32xf32, #tpu.memory_space<vmem>>, %arg19: memref<1x1xf32, #tpu.memory_space<vmem>>, %arg20: memref<2x1xf32, #tpu.memory_space<vmem>>) attributes {dimension_semantics = [#tpu.dimension_semantics<arbitrary>], iteration_bounds = array<i64: 1>, scalar_prefetch = 0 : i64, scratch_operands = 0 : i64, tpu.core_type = #tpu.core_type<tc>, window_params = [{pipeline_mode = #tpu.pipeline_mode<synchronous>, transform_indices = @transform_0, window_bounds = array<i64: 2, 128>}, {pipeline_mode = #tpu.pipeline_mode<synchronous>, transform_indices = @transform_1, window_bounds = array<i64: 16, 192>}, {pipeline_mode = #tpu.pipeline_mode<synchronous>, transform_indices = @transform_2, window_bounds = array<i64: 64, 192>}, {pipeline_mode = #tpu.pipeline_mode<synchronous>, transform_indices = @transform_3, window_bounds = array<i64: 1, 192>}, {pipeline_mode = #tpu.pipeline_mode<synchronous>, transform_indices = @transform_4, window_bounds = array<i64: 1, 192>}, {pipeline_mode = #tpu.pipeline_mode<synchronous>, transform_indices = @transform_5, window_bounds = array<i64: 64, 192>}, {pipeline_mode = #tpu.pipeline_mode<synchronous>, transform_indices = @transform_6, window_bounds = array<i64: 64, 192>}, {pipeline_mode = #tpu.pipeline_mode<synchronous>, transform_indices = @transform_7, window_bounds = array<i64: 1, 192>}, {pipeline_mode = #tpu.pipeline_mode<synchronous>, transform_indices = @transform_8, window_bounds = array<i64: 1, 192>}, {pipeline_mode = #tpu.pipeline_mode<synchronous>, transform_indices = @transform_9, window_bounds = array<i64: 64, 192>}, {pipeline_mode = #tpu.pipeline_mode<synchronous>, transform_indices = @transform_10, window_bounds = array<i64: 1, 192>}, {pipeline_mode = #tpu.pipeline_mode<synchronous>, transform_indices = @transform_11, window_bounds = array<i64: 64, 64>}, {pipeline_mode = #tpu.pipeline_mode<synchronous>, transform_indices = @transform_12, window_bounds = array<i64: 1, 64>}, {pipeline_mode = #tpu.pipeline_mode<synchronous>, transform_indices = @transform_13, window_bounds = array<i64: 64, 32>}, {pipeline_mode = #tpu.pipeline_mode<synchronous>, transform_indices = @transform_14, window_bounds = array<i64: 1, 32>}, {pipeline_mode = #tpu.pipeline_mode<synchronous>, transform_indices = @transform_15, window_bounds = array<i64: 32, 32>}, {pipeline_mode = #tpu.pipeline_mode<synchronous>, transform_indices = @transform_16, window_bounds = array<i64: 1, 32>}, {pipeline_mode = #tpu.pipeline_mode<synchronous>, transform_indices = @transform_17, window_bounds = array<i64: 1, 32>}, {pipeline_mode = #tpu.pipeline_mode<synchronous>, transform_indices = @transform_18, window_bounds = array<i64: 1, 1>}, {pipeline_mode = #tpu.pipeline_mode<synchronous>, transform_indices = @transform_19, window_bounds = array<i64: 2, 1>}]} {
    %c0 = arith.constant 0 : index
    %c0_0 = arith.constant 0 : index
    %0 = vector.load %arg1[%c0, %c0_0] : memref<2x128xf32, #tpu.memory_space<vmem>>, vector<2x128xf32>
    %1 = vector.extract_strided_slice %0 {offsets = [0, 0], sizes = [2, 16], strides = [1, 1]} : vector<2x128xf32> to vector<2x16xf32>
    %2 = vector.extract_strided_slice %0 {offsets = [0, 16], sizes = [2, 16], strides = [1, 1]} : vector<2x128xf32> to vector<2x16xf32>
    %3 = vector.extract_strided_slice %0 {offsets = [0, 32], sizes = [2, 16], strides = [1, 1]} : vector<2x128xf32> to vector<2x16xf32>
    %4 = vector.extract_strided_slice %0 {offsets = [0, 48], sizes = [2, 16], strides = [1, 1]} : vector<2x128xf32> to vector<2x16xf32>
    %5 = vector.extract_strided_slice %0 {offsets = [0, 64], sizes = [2, 16], strides = [1, 1]} : vector<2x128xf32> to vector<2x16xf32>
    %6 = vector.extract_strided_slice %0 {offsets = [0, 80], sizes = [2, 16], strides = [1, 1]} : vector<2x128xf32> to vector<2x16xf32>
    %7 = vector.extract_strided_slice %0 {offsets = [0, 96], sizes = [2, 16], strides = [1, 1]} : vector<2x128xf32> to vector<2x16xf32>
    %8 = vector.extract_strided_slice %0 {offsets = [0, 112], sizes = [2, 16], strides = [1, 1]} : vector<2x128xf32> to vector<2x16xf32>
    %9 = tpu.concatenate %1, %2, %3, %4, %5, %6, %7, %8 in 0 : vector<2x16xf32>, vector<2x16xf32>, vector<2x16xf32>, vector<2x16xf32>, vector<2x16xf32>, vector<2x16xf32>, vector<2x16xf32>, vector<2x16xf32> -> vector<16x16xf32>
    %c0_1 = arith.constant 0 : index
    %c0_2 = arith.constant 0 : index
    %10 = vector.load %arg2[%c0_1, %c0_2] : memref<16x192xf32, #tpu.memory_space<vmem>>, vector<16x192xf32>
    %c0_3 = arith.constant 0 : index
    %c0_4 = arith.constant 0 : index
    %11 = vector.load %arg3[%c0_3, %c0_4] : memref<64x192xf32, #tpu.memory_space<vmem>>, vector<64x192xf32>
    %c0_5 = arith.constant 0 : index
    %c0_6 = arith.constant 0 : index
    %12 = vector.load %arg4[%c0_5, %c0_6] : memref<1x192xf32, #tpu.memory_space<vmem>>, vector<1x192xf32>
    %c0_7 = arith.constant 0 : index
    %c0_8 = arith.constant 0 : index
    %13 = vector.load %arg5[%c0_7, %c0_8] : memref<1x192xf32, #tpu.memory_space<vmem>>, vector<1x192xf32>
    %cst = arith.constant dense<0.000000e+00> : vector<16x192xf32>
    %14 = tpu.matmul %9, %10, %cst {dimension_numbers = #tpu.dot_dimension_numbers<[1], [0], [0], [1], [0, 0, 1, 1], [], []>} : vector<16x16xf32>, vector<16x192xf32>, vector<16x192xf32> -> vector<16x192xf32>
    %15 = vector.broadcast %12 : vector<1x192xf32> to vector<16x192xf32>
    %16 = arith.addf %14, %15 : vector<16x192xf32>
    %cst_9 = arith.constant 0.000000e+00 : f32
    %17 = vector.broadcast %cst_9 : f32 to vector<2x64xf32>
    %cst_10 = arith.constant dense<0.000000e+00> : vector<2x192xf32>
    %18 = tpu.matmul %17, %11, %cst_10 {dimension_numbers = #tpu.dot_dimension_numbers<[1], [0], [0], [1], [0, 0, 1, 1], [], []>} : vector<2x64xf32>, vector<64x192xf32>, vector<2x192xf32> -> vector<2x192xf32>
    %19 = vector.broadcast %13 : vector<1x192xf32> to vector<2x192xf32>
    %20 = arith.addf %18, %19 : vector<2x192xf32>
    %21 = vector.extract_strided_slice %16 {offsets = [0, 0], sizes = [2, 96], strides = [1, 1]} : vector<16x192xf32> to vector<2x96xf32>
    %22 = vector.extract_strided_slice %16 {offsets = [14, 96], sizes = [2, 96], strides = [1, 1]} : vector<16x192xf32> to vector<2x96xf32>
    %23 = vector.extract_strided_slice %20 {offsets = [0, 0], sizes = [2, 96], strides = [1, 1]} : vector<2x192xf32> to vector<2x96xf32>
    %24 = vector.extract_strided_slice %20 {offsets = [0, 96], sizes = [2, 96], strides = [1, 1]} : vector<2x192xf32> to vector<2x96xf32>
    %25 = vector.extract_strided_slice %21 {offsets = [0, 0], sizes = [2, 32], strides = [1, 1]} : vector<2x96xf32> to vector<2x32xf32>
    %26 = vector.extract_strided_slice %23 {offsets = [0, 0], sizes = [2, 32], strides = [1, 1]} : vector<2x96xf32> to vector<2x32xf32>
    %27 = arith.addf %25, %26 : vector<2x32xf32>
    %28 = arith.negf %27 : vector<2x32xf32>
    %29 = math.exp %28 : vector<2x32xf32>
    %cst_11 = arith.constant 1.000000e+00 : f32
    %30 = vector.broadcast %cst_11 : f32 to vector<2x32xf32>
    %31 = arith.addf %30, %29 : vector<2x32xf32>
    %32 = arith.divf %30, %31 : vector<2x32xf32>
    %33 = vector.extract_strided_slice %21 {offsets = [0, 32], sizes = [2, 32], strides = [1, 1]} : vector<2x96xf32> to vector<2x32xf32>
    %34 = vector.extract_strided_slice %23 {offsets = [0, 32], sizes = [2, 32], strides = [1, 1]} : vector<2x96xf32> to vector<2x32xf32>
    %35 = arith.addf %33, %34 : vector<2x32xf32>
    %36 = arith.negf %35 : vector<2x32xf32>
    %37 = math.exp %36 : vector<2x32xf32>
    %cst_12 = arith.constant 1.000000e+00 : f32
    %38 = vector.broadcast %cst_12 : f32 to vector<2x32xf32>
    %39 = arith.addf %38, %37 : vector<2x32xf32>
    %40 = arith.divf %38, %39 : vector<2x32xf32>
    %41 = vector.extract_strided_slice %21 {offsets = [0, 64], sizes = [2, 32], strides = [1, 1]} : vector<2x96xf32> to vector<2x32xf32>
    %42 = vector.extract_strided_slice %23 {offsets = [0, 64], sizes = [2, 32], strides = [1, 1]} : vector<2x96xf32> to vector<2x32xf32>
    %43 = arith.mulf %32, %42 : vector<2x32xf32>
    %44 = arith.addf %41, %43 : vector<2x32xf32>
    %45 = math.tanh %44 : vector<2x32xf32>
    %cst_13 = arith.constant 1.000000e+00 : f32
    %46 = vector.broadcast %cst_13 : f32 to vector<2x32xf32>
    %47 = arith.subf %46, %40 : vector<2x32xf32>
    %48 = arith.mulf %47, %45 : vector<2x32xf32>
    %49 = vector.extract_strided_slice %17 {offsets = [0, 0], sizes = [2, 32], strides = [1, 1]} : vector<2x64xf32> to vector<2x32xf32>
    %50 = arith.mulf %40, %49 : vector<2x32xf32>
    %51 = arith.addf %48, %50 : vector<2x32xf32>
    %52 = vector.extract_strided_slice %22 {offsets = [0, 0], sizes = [2, 32], strides = [1, 1]} : vector<2x96xf32> to vector<2x32xf32>
    %53 = vector.extract_strided_slice %24 {offsets = [0, 0], sizes = [2, 32], strides = [1, 1]} : vector<2x96xf32> to vector<2x32xf32>
    %54 = arith.addf %52, %53 : vector<2x32xf32>
    %55 = arith.negf %54 : vector<2x32xf32>
    %56 = math.exp %55 : vector<2x32xf32>
    %cst_14 = arith.constant 1.000000e+00 : f32
    %57 = vector.broadcast %cst_14 : f32 to vector<2x32xf32>
    %58 = arith.addf %57, %56 : vector<2x32xf32>
    %59 = arith.divf %57, %58 : vector<2x32xf32>
    %60 = vector.extract_strided_slice %22 {offsets = [0, 32], sizes = [2, 32], strides = [1, 1]} : vector<2x96xf32> to vector<2x32xf32>
    %61 = vector.extract_strided_slice %24 {offsets = [0, 32], sizes = [2, 32], strides = [1, 1]} : vector<2x96xf32> to vector<2x32xf32>
    %62 = arith.addf %60, %61 : vector<2x32xf32>
    %63 = arith.negf %62 : vector<2x32xf32>
    %64 = math.exp %63 : vector<2x32xf32>
    %cst_15 = arith.constant 1.000000e+00 : f32
    %65 = vector.broadcast %cst_15 : f32 to vector<2x32xf32>
    %66 = arith.addf %65, %64 : vector<2x32xf32>
    %67 = arith.divf %65, %66 : vector<2x32xf32>
    %68 = vector.extract_strided_slice %22 {offsets = [0, 64], sizes = [2, 32], strides = [1, 1]} : vector<2x96xf32> to vector<2x32xf32>
    %69 = vector.extract_strided_slice %24 {offsets = [0, 64], sizes = [2, 32], strides = [1, 1]} : vector<2x96xf32> to vector<2x32xf32>
    %70 = arith.mulf %59, %69 : vector<2x32xf32>
    %71 = arith.addf %68, %70 : vector<2x32xf32>
    %72 = math.tanh %71 : vector<2x32xf32>
    %cst_16 = arith.constant 1.000000e+00 : f32
    %73 = vector.broadcast %cst_16 : f32 to vector<2x32xf32>
    %74 = arith.subf %73, %67 : vector<2x32xf32>
    %75 = arith.mulf %74, %72 : vector<2x32xf32>
    %76 = vector.extract_strided_slice %17 {offsets = [0, 32], sizes = [2, 32], strides = [1, 1]} : vector<2x64xf32> to vector<2x32xf32>
    %77 = arith.mulf %67, %76 : vector<2x32xf32>
    %78 = arith.addf %75, %77 : vector<2x32xf32>
    %79 = tpu.concatenate %51, %78 in 1 : vector<2x32xf32>, vector<2x32xf32> -> vector<2x64xf32>
    %cst_17 = arith.constant dense<0.000000e+00> : vector<2x192xf32>
    %80 = tpu.matmul %79, %11, %cst_17 {dimension_numbers = #tpu.dot_dimension_numbers<[1], [0], [0], [1], [0, 0, 1, 1], [], []>} : vector<2x64xf32>, vector<64x192xf32>, vector<2x192xf32> -> vector<2x192xf32>
    %81 = vector.broadcast %13 : vector<1x192xf32> to vector<2x192xf32>
    %82 = arith.addf %80, %81 : vector<2x192xf32>
    %83 = vector.extract_strided_slice %16 {offsets = [2, 0], sizes = [2, 96], strides = [1, 1]} : vector<16x192xf32> to vector<2x96xf32>
    %84 = vector.extract_strided_slice %16 {offsets = [12, 96], sizes = [2, 96], strides = [1, 1]} : vector<16x192xf32> to vector<2x96xf32>
    %85 = vector.extract_strided_slice %82 {offsets = [0, 0], sizes = [2, 96], strides = [1, 1]} : vector<2x192xf32> to vector<2x96xf32>
    %86 = vector.extract_strided_slice %82 {offsets = [0, 96], sizes = [2, 96], strides = [1, 1]} : vector<2x192xf32> to vector<2x96xf32>
    %87 = vector.extract_strided_slice %83 {offsets = [0, 0], sizes = [2, 32], strides = [1, 1]} : vector<2x96xf32> to vector<2x32xf32>
    %88 = vector.extract_strided_slice %85 {offsets = [0, 0], sizes = [2, 32], strides = [1, 1]} : vector<2x96xf32> to vector<2x32xf32>
    %89 = arith.addf %87, %88 : vector<2x32xf32>
    %90 = arith.negf %89 : vector<2x32xf32>
    %91 = math.exp %90 : vector<2x32xf32>
    %cst_18 = arith.constant 1.000000e+00 : f32
    %92 = vector.broadcast %cst_18 : f32 to vector<2x32xf32>
    %93 = arith.addf %92, %91 : vector<2x32xf32>
    %94 = arith.divf %92, %93 : vector<2x32xf32>
    %95 = vector.extract_strided_slice %83 {offsets = [0, 32], sizes = [2, 32], strides = [1, 1]} : vector<2x96xf32> to vector<2x32xf32>
    %96 = vector.extract_strided_slice %85 {offsets = [0, 32], sizes = [2, 32], strides = [1, 1]} : vector<2x96xf32> to vector<2x32xf32>
    %97 = arith.addf %95, %96 : vector<2x32xf32>
    %98 = arith.negf %97 : vector<2x32xf32>
    %99 = math.exp %98 : vector<2x32xf32>
    %cst_19 = arith.constant 1.000000e+00 : f32
    %100 = vector.broadcast %cst_19 : f32 to vector<2x32xf32>
    %101 = arith.addf %100, %99 : vector<2x32xf32>
    %102 = arith.divf %100, %101 : vector<2x32xf32>
    %103 = vector.extract_strided_slice %83 {offsets = [0, 64], sizes = [2, 32], strides = [1, 1]} : vector<2x96xf32> to vector<2x32xf32>
    %104 = vector.extract_strided_slice %85 {offsets = [0, 64], sizes = [2, 32], strides = [1, 1]} : vector<2x96xf32> to vector<2x32xf32>
    %105 = arith.mulf %94, %104 : vector<2x32xf32>
    %106 = arith.addf %103, %105 : vector<2x32xf32>
    %107 = math.tanh %106 : vector<2x32xf32>
    %cst_20 = arith.constant 1.000000e+00 : f32
    %108 = vector.broadcast %cst_20 : f32 to vector<2x32xf32>
    %109 = arith.subf %108, %102 : vector<2x32xf32>
    %110 = arith.mulf %109, %107 : vector<2x32xf32>
    %111 = vector.extract_strided_slice %79 {offsets = [0, 0], sizes = [2, 32], strides = [1, 1]} : vector<2x64xf32> to vector<2x32xf32>
    %112 = arith.mulf %102, %111 : vector<2x32xf32>
    %113 = arith.addf %110, %112 : vector<2x32xf32>
    %114 = vector.extract_strided_slice %84 {offsets = [0, 0], sizes = [2, 32], strides = [1, 1]} : vector<2x96xf32> to vector<2x32xf32>
    %115 = vector.extract_strided_slice %86 {offsets = [0, 0], sizes = [2, 32], strides = [1, 1]} : vector<2x96xf32> to vector<2x32xf32>
    %116 = arith.addf %114, %115 : vector<2x32xf32>
    %117 = arith.negf %116 : vector<2x32xf32>
    %118 = math.exp %117 : vector<2x32xf32>
    %cst_21 = arith.constant 1.000000e+00 : f32
    %119 = vector.broadcast %cst_21 : f32 to vector<2x32xf32>
    %120 = arith.addf %119, %118 : vector<2x32xf32>
    %121 = arith.divf %119, %120 : vector<2x32xf32>
    %122 = vector.extract_strided_slice %84 {offsets = [0, 32], sizes = [2, 32], strides = [1, 1]} : vector<2x96xf32> to vector<2x32xf32>
    %123 = vector.extract_strided_slice %86 {offsets = [0, 32], sizes = [2, 32], strides = [1, 1]} : vector<2x96xf32> to vector<2x32xf32>
    %124 = arith.addf %122, %123 : vector<2x32xf32>
    %125 = arith.negf %124 : vector<2x32xf32>
    %126 = math.exp %125 : vector<2x32xf32>
    %cst_22 = arith.constant 1.000000e+00 : f32
    %127 = vector.broadcast %cst_22 : f32 to vector<2x32xf32>
    %128 = arith.addf %127, %126 : vector<2x32xf32>
    %129 = arith.divf %127, %128 : vector<2x32xf32>
    %130 = vector.extract_strided_slice %84 {offsets = [0, 64], sizes = [2, 32], strides = [1, 1]} : vector<2x96xf32> to vector<2x32xf32>
    %131 = vector.extract_strided_slice %86 {offsets = [0, 64], sizes = [2, 32], strides = [1, 1]} : vector<2x96xf32> to vector<2x32xf32>
    %132 = arith.mulf %121, %131 : vector<2x32xf32>
    %133 = arith.addf %130, %132 : vector<2x32xf32>
    %134 = math.tanh %133 : vector<2x32xf32>
    %cst_23 = arith.constant 1.000000e+00 : f32
    %135 = vector.broadcast %cst_23 : f32 to vector<2x32xf32>
    %136 = arith.subf %135, %129 : vector<2x32xf32>
    %137 = arith.mulf %136, %134 : vector<2x32xf32>
    %138 = vector.extract_strided_slice %79 {offsets = [0, 32], sizes = [2, 32], strides = [1, 1]} : vector<2x64xf32> to vector<2x32xf32>
    %139 = arith.mulf %129, %138 : vector<2x32xf32>
    %140 = arith.addf %137, %139 : vector<2x32xf32>
    %141 = tpu.concatenate %113, %140 in 1 : vector<2x32xf32>, vector<2x32xf32> -> vector<2x64xf32>
    %cst_24 = arith.constant dense<0.000000e+00> : vector<2x192xf32>
    %142 = tpu.matmul %141, %11, %cst_24 {dimension_numbers = #tpu.dot_dimension_numbers<[1], [0], [0], [1], [0, 0, 1, 1], [], []>} : vector<2x64xf32>, vector<64x192xf32>, vector<2x192xf32> -> vector<2x192xf32>
    %143 = vector.broadcast %13 : vector<1x192xf32> to vector<2x192xf32>
    %144 = arith.addf %142, %143 : vector<2x192xf32>
    %145 = vector.extract_strided_slice %16 {offsets = [4, 0], sizes = [2, 96], strides = [1, 1]} : vector<16x192xf32> to vector<2x96xf32>
    %146 = vector.extract_strided_slice %16 {offsets = [10, 96], sizes = [2, 96], strides = [1, 1]} : vector<16x192xf32> to vector<2x96xf32>
    %147 = vector.extract_strided_slice %144 {offsets = [0, 0], sizes = [2, 96], strides = [1, 1]} : vector<2x192xf32> to vector<2x96xf32>
    %148 = vector.extract_strided_slice %144 {offsets = [0, 96], sizes = [2, 96], strides = [1, 1]} : vector<2x192xf32> to vector<2x96xf32>
    %149 = vector.extract_strided_slice %145 {offsets = [0, 0], sizes = [2, 32], strides = [1, 1]} : vector<2x96xf32> to vector<2x32xf32>
    %150 = vector.extract_strided_slice %147 {offsets = [0, 0], sizes = [2, 32], strides = [1, 1]} : vector<2x96xf32> to vector<2x32xf32>
    %151 = arith.addf %149, %150 : vector<2x32xf32>
    %152 = arith.negf %151 : vector<2x32xf32>
    %153 = math.exp %152 : vector<2x32xf32>
    %cst_25 = arith.constant 1.000000e+00 : f32
    %154 = vector.broadcast %cst_25 : f32 to vector<2x32xf32>
    %155 = arith.addf %154, %153 : vector<2x32xf32>
    %156 = arith.divf %154, %155 : vector<2x32xf32>
    %157 = vector.extract_strided_slice %145 {offsets = [0, 32], sizes = [2, 32], strides = [1, 1]} : vector<2x96xf32> to vector<2x32xf32>
    %158 = vector.extract_strided_slice %147 {offsets = [0, 32], sizes = [2, 32], strides = [1, 1]} : vector<2x96xf32> to vector<2x32xf32>
    %159 = arith.addf %157, %158 : vector<2x32xf32>
    %160 = arith.negf %159 : vector<2x32xf32>
    %161 = math.exp %160 : vector<2x32xf32>
    %cst_26 = arith.constant 1.000000e+00 : f32
    %162 = vector.broadcast %cst_26 : f32 to vector<2x32xf32>
    %163 = arith.addf %162, %161 : vector<2x32xf32>
    %164 = arith.divf %162, %163 : vector<2x32xf32>
    %165 = vector.extract_strided_slice %145 {offsets = [0, 64], sizes = [2, 32], strides = [1, 1]} : vector<2x96xf32> to vector<2x32xf32>
    %166 = vector.extract_strided_slice %147 {offsets = [0, 64], sizes = [2, 32], strides = [1, 1]} : vector<2x96xf32> to vector<2x32xf32>
    %167 = arith.mulf %156, %166 : vector<2x32xf32>
    %168 = arith.addf %165, %167 : vector<2x32xf32>
    %169 = math.tanh %168 : vector<2x32xf32>
    %cst_27 = arith.constant 1.000000e+00 : f32
    %170 = vector.broadcast %cst_27 : f32 to vector<2x32xf32>
    %171 = arith.subf %170, %164 : vector<2x32xf32>
    %172 = arith.mulf %171, %169 : vector<2x32xf32>
    %173 = vector.extract_strided_slice %141 {offsets = [0, 0], sizes = [2, 32], strides = [1, 1]} : vector<2x64xf32> to vector<2x32xf32>
    %174 = arith.mulf %164, %173 : vector<2x32xf32>
    %175 = arith.addf %172, %174 : vector<2x32xf32>
    %176 = vector.extract_strided_slice %146 {offsets = [0, 0], sizes = [2, 32], strides = [1, 1]} : vector<2x96xf32> to vector<2x32xf32>
    %177 = vector.extract_strided_slice %148 {offsets = [0, 0], sizes = [2, 32], strides = [1, 1]} : vector<2x96xf32> to vector<2x32xf32>
    %178 = arith.addf %176, %177 : vector<2x32xf32>
    %179 = arith.negf %178 : vector<2x32xf32>
    %180 = math.exp %179 : vector<2x32xf32>
    %cst_28 = arith.constant 1.000000e+00 : f32
    %181 = vector.broadcast %cst_28 : f32 to vector<2x32xf32>
    %182 = arith.addf %181, %180 : vector<2x32xf32>
    %183 = arith.divf %181, %182 : vector<2x32xf32>
    %184 = vector.extract_strided_slice %146 {offsets = [0, 32], sizes = [2, 32], strides = [1, 1]} : vector<2x96xf32> to vector<2x32xf32>
    %185 = vector.extract_strided_slice %148 {offsets = [0, 32], sizes = [2, 32], strides = [1, 1]} : vector<2x96xf32> to vector<2x32xf32>
    %186 = arith.addf %184, %185 : vector<2x32xf32>
    %187 = arith.negf %186 : vector<2x32xf32>
    %188 = math.exp %187 : vector<2x32xf32>
    %cst_29 = arith.constant 1.000000e+00 : f32
    %189 = vector.broadcast %cst_29 : f32 to vector<2x32xf32>
    %190 = arith.addf %189, %188 : vector<2x32xf32>
    %191 = arith.divf %189, %190 : vector<2x32xf32>
    %192 = vector.extract_strided_slice %146 {offsets = [0, 64], sizes = [2, 32], strides = [1, 1]} : vector<2x96xf32> to vector<2x32xf32>
    %193 = vector.extract_strided_slice %148 {offsets = [0, 64], sizes = [2, 32], strides = [1, 1]} : vector<2x96xf32> to vector<2x32xf32>
    %194 = arith.mulf %183, %193 : vector<2x32xf32>
    %195 = arith.addf %192, %194 : vector<2x32xf32>
    %196 = math.tanh %195 : vector<2x32xf32>
    %cst_30 = arith.constant 1.000000e+00 : f32
    %197 = vector.broadcast %cst_30 : f32 to vector<2x32xf32>
    %198 = arith.subf %197, %191 : vector<2x32xf32>
    %199 = arith.mulf %198, %196 : vector<2x32xf32>
    %200 = vector.extract_strided_slice %141 {offsets = [0, 32], sizes = [2, 32], strides = [1, 1]} : vector<2x64xf32> to vector<2x32xf32>
    %201 = arith.mulf %191, %200 : vector<2x32xf32>
    %202 = arith.addf %199, %201 : vector<2x32xf32>
    %203 = tpu.concatenate %175, %202 in 1 : vector<2x32xf32>, vector<2x32xf32> -> vector<2x64xf32>
    %cst_31 = arith.constant dense<0.000000e+00> : vector<2x192xf32>
    %204 = tpu.matmul %203, %11, %cst_31 {dimension_numbers = #tpu.dot_dimension_numbers<[1], [0], [0], [1], [0, 0, 1, 1], [], []>} : vector<2x64xf32>, vector<64x192xf32>, vector<2x192xf32> -> vector<2x192xf32>
    %205 = vector.broadcast %13 : vector<1x192xf32> to vector<2x192xf32>
    %206 = arith.addf %204, %205 : vector<2x192xf32>
    %207 = vector.extract_strided_slice %16 {offsets = [6, 0], sizes = [2, 96], strides = [1, 1]} : vector<16x192xf32> to vector<2x96xf32>
    %208 = vector.extract_strided_slice %16 {offsets = [8, 96], sizes = [2, 96], strides = [1, 1]} : vector<16x192xf32> to vector<2x96xf32>
    %209 = vector.extract_strided_slice %206 {offsets = [0, 0], sizes = [2, 96], strides = [1, 1]} : vector<2x192xf32> to vector<2x96xf32>
    %210 = vector.extract_strided_slice %206 {offsets = [0, 96], sizes = [2, 96], strides = [1, 1]} : vector<2x192xf32> to vector<2x96xf32>
    %211 = vector.extract_strided_slice %207 {offsets = [0, 0], sizes = [2, 32], strides = [1, 1]} : vector<2x96xf32> to vector<2x32xf32>
    %212 = vector.extract_strided_slice %209 {offsets = [0, 0], sizes = [2, 32], strides = [1, 1]} : vector<2x96xf32> to vector<2x32xf32>
    %213 = arith.addf %211, %212 : vector<2x32xf32>
    %214 = arith.negf %213 : vector<2x32xf32>
    %215 = math.exp %214 : vector<2x32xf32>
    %cst_32 = arith.constant 1.000000e+00 : f32
    %216 = vector.broadcast %cst_32 : f32 to vector<2x32xf32>
    %217 = arith.addf %216, %215 : vector<2x32xf32>
    %218 = arith.divf %216, %217 : vector<2x32xf32>
    %219 = vector.extract_strided_slice %207 {offsets = [0, 32], sizes = [2, 32], strides = [1, 1]} : vector<2x96xf32> to vector<2x32xf32>
    %220 = vector.extract_strided_slice %209 {offsets = [0, 32], sizes = [2, 32], strides = [1, 1]} : vector<2x96xf32> to vector<2x32xf32>
    %221 = arith.addf %219, %220 : vector<2x32xf32>
    %222 = arith.negf %221 : vector<2x32xf32>
    %223 = math.exp %222 : vector<2x32xf32>
    %cst_33 = arith.constant 1.000000e+00 : f32
    %224 = vector.broadcast %cst_33 : f32 to vector<2x32xf32>
    %225 = arith.addf %224, %223 : vector<2x32xf32>
    %226 = arith.divf %224, %225 : vector<2x32xf32>
    %227 = vector.extract_strided_slice %207 {offsets = [0, 64], sizes = [2, 32], strides = [1, 1]} : vector<2x96xf32> to vector<2x32xf32>
    %228 = vector.extract_strided_slice %209 {offsets = [0, 64], sizes = [2, 32], strides = [1, 1]} : vector<2x96xf32> to vector<2x32xf32>
    %229 = arith.mulf %218, %228 : vector<2x32xf32>
    %230 = arith.addf %227, %229 : vector<2x32xf32>
    %231 = math.tanh %230 : vector<2x32xf32>
    %cst_34 = arith.constant 1.000000e+00 : f32
    %232 = vector.broadcast %cst_34 : f32 to vector<2x32xf32>
    %233 = arith.subf %232, %226 : vector<2x32xf32>
    %234 = arith.mulf %233, %231 : vector<2x32xf32>
    %235 = vector.extract_strided_slice %203 {offsets = [0, 0], sizes = [2, 32], strides = [1, 1]} : vector<2x64xf32> to vector<2x32xf32>
    %236 = arith.mulf %226, %235 : vector<2x32xf32>
    %237 = arith.addf %234, %236 : vector<2x32xf32>
    %238 = vector.extract_strided_slice %208 {offsets = [0, 0], sizes = [2, 32], strides = [1, 1]} : vector<2x96xf32> to vector<2x32xf32>
    %239 = vector.extract_strided_slice %210 {offsets = [0, 0], sizes = [2, 32], strides = [1, 1]} : vector<2x96xf32> to vector<2x32xf32>
    %240 = arith.addf %238, %239 : vector<2x32xf32>
    %241 = arith.negf %240 : vector<2x32xf32>
    %242 = math.exp %241 : vector<2x32xf32>
    %cst_35 = arith.constant 1.000000e+00 : f32
    %243 = vector.broadcast %cst_35 : f32 to vector<2x32xf32>
    %244 = arith.addf %243, %242 : vector<2x32xf32>
    %245 = arith.divf %243, %244 : vector<2x32xf32>
    %246 = vector.extract_strided_slice %208 {offsets = [0, 32], sizes = [2, 32], strides = [1, 1]} : vector<2x96xf32> to vector<2x32xf32>
    %247 = vector.extract_strided_slice %210 {offsets = [0, 32], sizes = [2, 32], strides = [1, 1]} : vector<2x96xf32> to vector<2x32xf32>
    %248 = arith.addf %246, %247 : vector<2x32xf32>
    %249 = arith.negf %248 : vector<2x32xf32>
    %250 = math.exp %249 : vector<2x32xf32>
    %cst_36 = arith.constant 1.000000e+00 : f32
    %251 = vector.broadcast %cst_36 : f32 to vector<2x32xf32>
    %252 = arith.addf %251, %250 : vector<2x32xf32>
    %253 = arith.divf %251, %252 : vector<2x32xf32>
    %254 = vector.extract_strided_slice %208 {offsets = [0, 64], sizes = [2, 32], strides = [1, 1]} : vector<2x96xf32> to vector<2x32xf32>
    %255 = vector.extract_strided_slice %210 {offsets = [0, 64], sizes = [2, 32], strides = [1, 1]} : vector<2x96xf32> to vector<2x32xf32>
    %256 = arith.mulf %245, %255 : vector<2x32xf32>
    %257 = arith.addf %254, %256 : vector<2x32xf32>
    %258 = math.tanh %257 : vector<2x32xf32>
    %cst_37 = arith.constant 1.000000e+00 : f32
    %259 = vector.broadcast %cst_37 : f32 to vector<2x32xf32>
    %260 = arith.subf %259, %253 : vector<2x32xf32>
    %261 = arith.mulf %260, %258 : vector<2x32xf32>
    %262 = vector.extract_strided_slice %203 {offsets = [0, 32], sizes = [2, 32], strides = [1, 1]} : vector<2x64xf32> to vector<2x32xf32>
    %263 = arith.mulf %253, %262 : vector<2x32xf32>
    %264 = arith.addf %261, %263 : vector<2x32xf32>
    %265 = tpu.concatenate %237, %264 in 1 : vector<2x32xf32>, vector<2x32xf32> -> vector<2x64xf32>
    %cst_38 = arith.constant dense<0.000000e+00> : vector<2x192xf32>
    %266 = tpu.matmul %265, %11, %cst_38 {dimension_numbers = #tpu.dot_dimension_numbers<[1], [0], [0], [1], [0, 0, 1, 1], [], []>} : vector<2x64xf32>, vector<64x192xf32>, vector<2x192xf32> -> vector<2x192xf32>
    %267 = vector.broadcast %13 : vector<1x192xf32> to vector<2x192xf32>
    %268 = arith.addf %266, %267 : vector<2x192xf32>
    %269 = vector.extract_strided_slice %16 {offsets = [8, 0], sizes = [2, 96], strides = [1, 1]} : vector<16x192xf32> to vector<2x96xf32>
    %270 = vector.extract_strided_slice %16 {offsets = [6, 96], sizes = [2, 96], strides = [1, 1]} : vector<16x192xf32> to vector<2x96xf32>
    %271 = vector.extract_strided_slice %268 {offsets = [0, 0], sizes = [2, 96], strides = [1, 1]} : vector<2x192xf32> to vector<2x96xf32>
    %272 = vector.extract_strided_slice %268 {offsets = [0, 96], sizes = [2, 96], strides = [1, 1]} : vector<2x192xf32> to vector<2x96xf32>
    %273 = vector.extract_strided_slice %269 {offsets = [0, 0], sizes = [2, 32], strides = [1, 1]} : vector<2x96xf32> to vector<2x32xf32>
    %274 = vector.extract_strided_slice %271 {offsets = [0, 0], sizes = [2, 32], strides = [1, 1]} : vector<2x96xf32> to vector<2x32xf32>
    %275 = arith.addf %273, %274 : vector<2x32xf32>
    %276 = arith.negf %275 : vector<2x32xf32>
    %277 = math.exp %276 : vector<2x32xf32>
    %cst_39 = arith.constant 1.000000e+00 : f32
    %278 = vector.broadcast %cst_39 : f32 to vector<2x32xf32>
    %279 = arith.addf %278, %277 : vector<2x32xf32>
    %280 = arith.divf %278, %279 : vector<2x32xf32>
    %281 = vector.extract_strided_slice %269 {offsets = [0, 32], sizes = [2, 32], strides = [1, 1]} : vector<2x96xf32> to vector<2x32xf32>
    %282 = vector.extract_strided_slice %271 {offsets = [0, 32], sizes = [2, 32], strides = [1, 1]} : vector<2x96xf32> to vector<2x32xf32>
    %283 = arith.addf %281, %282 : vector<2x32xf32>
    %284 = arith.negf %283 : vector<2x32xf32>
    %285 = math.exp %284 : vector<2x32xf32>
    %cst_40 = arith.constant 1.000000e+00 : f32
    %286 = vector.broadcast %cst_40 : f32 to vector<2x32xf32>
    %287 = arith.addf %286, %285 : vector<2x32xf32>
    %288 = arith.divf %286, %287 : vector<2x32xf32>
    %289 = vector.extract_strided_slice %269 {offsets = [0, 64], sizes = [2, 32], strides = [1, 1]} : vector<2x96xf32> to vector<2x32xf32>
    %290 = vector.extract_strided_slice %271 {offsets = [0, 64], sizes = [2, 32], strides = [1, 1]} : vector<2x96xf32> to vector<2x32xf32>
    %291 = arith.mulf %280, %290 : vector<2x32xf32>
    %292 = arith.addf %289, %291 : vector<2x32xf32>
    %293 = math.tanh %292 : vector<2x32xf32>
    %cst_41 = arith.constant 1.000000e+00 : f32
    %294 = vector.broadcast %cst_41 : f32 to vector<2x32xf32>
    %295 = arith.subf %294, %288 : vector<2x32xf32>
    %296 = arith.mulf %295, %293 : vector<2x32xf32>
    %297 = vector.extract_strided_slice %265 {offsets = [0, 0], sizes = [2, 32], strides = [1, 1]} : vector<2x64xf32> to vector<2x32xf32>
    %298 = arith.mulf %288, %297 : vector<2x32xf32>
    %299 = arith.addf %296, %298 : vector<2x32xf32>
    %300 = vector.extract_strided_slice %270 {offsets = [0, 0], sizes = [2, 32], strides = [1, 1]} : vector<2x96xf32> to vector<2x32xf32>
    %301 = vector.extract_strided_slice %272 {offsets = [0, 0], sizes = [2, 32], strides = [1, 1]} : vector<2x96xf32> to vector<2x32xf32>
    %302 = arith.addf %300, %301 : vector<2x32xf32>
    %303 = arith.negf %302 : vector<2x32xf32>
    %304 = math.exp %303 : vector<2x32xf32>
    %cst_42 = arith.constant 1.000000e+00 : f32
    %305 = vector.broadcast %cst_42 : f32 to vector<2x32xf32>
    %306 = arith.addf %305, %304 : vector<2x32xf32>
    %307 = arith.divf %305, %306 : vector<2x32xf32>
    %308 = vector.extract_strided_slice %270 {offsets = [0, 32], sizes = [2, 32], strides = [1, 1]} : vector<2x96xf32> to vector<2x32xf32>
    %309 = vector.extract_strided_slice %272 {offsets = [0, 32], sizes = [2, 32], strides = [1, 1]} : vector<2x96xf32> to vector<2x32xf32>
    %310 = arith.addf %308, %309 : vector<2x32xf32>
    %311 = arith.negf %310 : vector<2x32xf32>
    %312 = math.exp %311 : vector<2x32xf32>
    %cst_43 = arith.constant 1.000000e+00 : f32
    %313 = vector.broadcast %cst_43 : f32 to vector<2x32xf32>
    %314 = arith.addf %313, %312 : vector<2x32xf32>
    %315 = arith.divf %313, %314 : vector<2x32xf32>
    %316 = vector.extract_strided_slice %270 {offsets = [0, 64], sizes = [2, 32], strides = [1, 1]} : vector<2x96xf32> to vector<2x32xf32>
    %317 = vector.extract_strided_slice %272 {offsets = [0, 64], sizes = [2, 32], strides = [1, 1]} : vector<2x96xf32> to vector<2x32xf32>
    %318 = arith.mulf %307, %317 : vector<2x32xf32>
    %319 = arith.addf %316, %318 : vector<2x32xf32>
    %320 = math.tanh %319 : vector<2x32xf32>
    %cst_44 = arith.constant 1.000000e+00 : f32
    %321 = vector.broadcast %cst_44 : f32 to vector<2x32xf32>
    %322 = arith.subf %321, %315 : vector<2x32xf32>
    %323 = arith.mulf %322, %320 : vector<2x32xf32>
    %324 = vector.extract_strided_slice %265 {offsets = [0, 32], sizes = [2, 32], strides = [1, 1]} : vector<2x64xf32> to vector<2x32xf32>
    %325 = arith.mulf %315, %324 : vector<2x32xf32>
    %326 = arith.addf %323, %325 : vector<2x32xf32>
    %327 = tpu.concatenate %299, %326 in 1 : vector<2x32xf32>, vector<2x32xf32> -> vector<2x64xf32>
    %cst_45 = arith.constant dense<0.000000e+00> : vector<2x192xf32>
    %328 = tpu.matmul %327, %11, %cst_45 {dimension_numbers = #tpu.dot_dimension_numbers<[1], [0], [0], [1], [0, 0, 1, 1], [], []>} : vector<2x64xf32>, vector<64x192xf32>, vector<2x192xf32> -> vector<2x192xf32>
    %329 = vector.broadcast %13 : vector<1x192xf32> to vector<2x192xf32>
    %330 = arith.addf %328, %329 : vector<2x192xf32>
    %331 = vector.extract_strided_slice %16 {offsets = [10, 0], sizes = [2, 96], strides = [1, 1]} : vector<16x192xf32> to vector<2x96xf32>
    %332 = vector.extract_strided_slice %16 {offsets = [4, 96], sizes = [2, 96], strides = [1, 1]} : vector<16x192xf32> to vector<2x96xf32>
    %333 = vector.extract_strided_slice %330 {offsets = [0, 0], sizes = [2, 96], strides = [1, 1]} : vector<2x192xf32> to vector<2x96xf32>
    %334 = vector.extract_strided_slice %330 {offsets = [0, 96], sizes = [2, 96], strides = [1, 1]} : vector<2x192xf32> to vector<2x96xf32>
    %335 = vector.extract_strided_slice %331 {offsets = [0, 0], sizes = [2, 32], strides = [1, 1]} : vector<2x96xf32> to vector<2x32xf32>
    %336 = vector.extract_strided_slice %333 {offsets = [0, 0], sizes = [2, 32], strides = [1, 1]} : vector<2x96xf32> to vector<2x32xf32>
    %337 = arith.addf %335, %336 : vector<2x32xf32>
    %338 = arith.negf %337 : vector<2x32xf32>
    %339 = math.exp %338 : vector<2x32xf32>
    %cst_46 = arith.constant 1.000000e+00 : f32
    %340 = vector.broadcast %cst_46 : f32 to vector<2x32xf32>
    %341 = arith.addf %340, %339 : vector<2x32xf32>
    %342 = arith.divf %340, %341 : vector<2x32xf32>
    %343 = vector.extract_strided_slice %331 {offsets = [0, 32], sizes = [2, 32], strides = [1, 1]} : vector<2x96xf32> to vector<2x32xf32>
    %344 = vector.extract_strided_slice %333 {offsets = [0, 32], sizes = [2, 32], strides = [1, 1]} : vector<2x96xf32> to vector<2x32xf32>
    %345 = arith.addf %343, %344 : vector<2x32xf32>
    %346 = arith.negf %345 : vector<2x32xf32>
    %347 = math.exp %346 : vector<2x32xf32>
    %cst_47 = arith.constant 1.000000e+00 : f32
    %348 = vector.broadcast %cst_47 : f32 to vector<2x32xf32>
    %349 = arith.addf %348, %347 : vector<2x32xf32>
    %350 = arith.divf %348, %349 : vector<2x32xf32>
    %351 = vector.extract_strided_slice %331 {offsets = [0, 64], sizes = [2, 32], strides = [1, 1]} : vector<2x96xf32> to vector<2x32xf32>
    %352 = vector.extract_strided_slice %333 {offsets = [0, 64], sizes = [2, 32], strides = [1, 1]} : vector<2x96xf32> to vector<2x32xf32>
    %353 = arith.mulf %342, %352 : vector<2x32xf32>
    %354 = arith.addf %351, %353 : vector<2x32xf32>
    %355 = math.tanh %354 : vector<2x32xf32>
    %cst_48 = arith.constant 1.000000e+00 : f32
    %356 = vector.broadcast %cst_48 : f32 to vector<2x32xf32>
    %357 = arith.subf %356, %350 : vector<2x32xf32>
    %358 = arith.mulf %357, %355 : vector<2x32xf32>
    %359 = vector.extract_strided_slice %327 {offsets = [0, 0], sizes = [2, 32], strides = [1, 1]} : vector<2x64xf32> to vector<2x32xf32>
    %360 = arith.mulf %350, %359 : vector<2x32xf32>
    %361 = arith.addf %358, %360 : vector<2x32xf32>
    %362 = vector.extract_strided_slice %332 {offsets = [0, 0], sizes = [2, 32], strides = [1, 1]} : vector<2x96xf32> to vector<2x32xf32>
    %363 = vector.extract_strided_slice %334 {offsets = [0, 0], sizes = [2, 32], strides = [1, 1]} : vector<2x96xf32> to vector<2x32xf32>
    %364 = arith.addf %362, %363 : vector<2x32xf32>
    %365 = arith.negf %364 : vector<2x32xf32>
    %366 = math.exp %365 : vector<2x32xf32>
    %cst_49 = arith.constant 1.000000e+00 : f32
    %367 = vector.broadcast %cst_49 : f32 to vector<2x32xf32>
    %368 = arith.addf %367, %366 : vector<2x32xf32>
    %369 = arith.divf %367, %368 : vector<2x32xf32>
    %370 = vector.extract_strided_slice %332 {offsets = [0, 32], sizes = [2, 32], strides = [1, 1]} : vector<2x96xf32> to vector<2x32xf32>
    %371 = vector.extract_strided_slice %334 {offsets = [0, 32], sizes = [2, 32], strides = [1, 1]} : vector<2x96xf32> to vector<2x32xf32>
    %372 = arith.addf %370, %371 : vector<2x32xf32>
    %373 = arith.negf %372 : vector<2x32xf32>
    %374 = math.exp %373 : vector<2x32xf32>
    %cst_50 = arith.constant 1.000000e+00 : f32
    %375 = vector.broadcast %cst_50 : f32 to vector<2x32xf32>
    %376 = arith.addf %375, %374 : vector<2x32xf32>
    %377 = arith.divf %375, %376 : vector<2x32xf32>
    %378 = vector.extract_strided_slice %332 {offsets = [0, 64], sizes = [2, 32], strides = [1, 1]} : vector<2x96xf32> to vector<2x32xf32>
    %379 = vector.extract_strided_slice %334 {offsets = [0, 64], sizes = [2, 32], strides = [1, 1]} : vector<2x96xf32> to vector<2x32xf32>
    %380 = arith.mulf %369, %379 : vector<2x32xf32>
    %381 = arith.addf %378, %380 : vector<2x32xf32>
    %382 = math.tanh %381 : vector<2x32xf32>
    %cst_51 = arith.constant 1.000000e+00 : f32
    %383 = vector.broadcast %cst_51 : f32 to vector<2x32xf32>
    %384 = arith.subf %383, %377 : vector<2x32xf32>
    %385 = arith.mulf %384, %382 : vector<2x32xf32>
    %386 = vector.extract_strided_slice %327 {offsets = [0, 32], sizes = [2, 32], strides = [1, 1]} : vector<2x64xf32> to vector<2x32xf32>
    %387 = arith.mulf %377, %386 : vector<2x32xf32>
    %388 = arith.addf %385, %387 : vector<2x32xf32>
    %389 = tpu.concatenate %361, %388 in 1 : vector<2x32xf32>, vector<2x32xf32> -> vector<2x64xf32>
    %cst_52 = arith.constant dense<0.000000e+00> : vector<2x192xf32>
    %390 = tpu.matmul %389, %11, %cst_52 {dimension_numbers = #tpu.dot_dimension_numbers<[1], [0], [0], [1], [0, 0, 1, 1], [], []>} : vector<2x64xf32>, vector<64x192xf32>, vector<2x192xf32> -> vector<2x192xf32>
    %391 = vector.broadcast %13 : vector<1x192xf32> to vector<2x192xf32>
    %392 = arith.addf %390, %391 : vector<2x192xf32>
    %393 = vector.extract_strided_slice %16 {offsets = [12, 0], sizes = [2, 96], strides = [1, 1]} : vector<16x192xf32> to vector<2x96xf32>
    %394 = vector.extract_strided_slice %16 {offsets = [2, 96], sizes = [2, 96], strides = [1, 1]} : vector<16x192xf32> to vector<2x96xf32>
    %395 = vector.extract_strided_slice %392 {offsets = [0, 0], sizes = [2, 96], strides = [1, 1]} : vector<2x192xf32> to vector<2x96xf32>
    %396 = vector.extract_strided_slice %392 {offsets = [0, 96], sizes = [2, 96], strides = [1, 1]} : vector<2x192xf32> to vector<2x96xf32>
    %397 = vector.extract_strided_slice %393 {offsets = [0, 0], sizes = [2, 32], strides = [1, 1]} : vector<2x96xf32> to vector<2x32xf32>
    %398 = vector.extract_strided_slice %395 {offsets = [0, 0], sizes = [2, 32], strides = [1, 1]} : vector<2x96xf32> to vector<2x32xf32>
    %399 = arith.addf %397, %398 : vector<2x32xf32>
    %400 = arith.negf %399 : vector<2x32xf32>
    %401 = math.exp %400 : vector<2x32xf32>
    %cst_53 = arith.constant 1.000000e+00 : f32
    %402 = vector.broadcast %cst_53 : f32 to vector<2x32xf32>
    %403 = arith.addf %402, %401 : vector<2x32xf32>
    %404 = arith.divf %402, %403 : vector<2x32xf32>
    %405 = vector.extract_strided_slice %393 {offsets = [0, 32], sizes = [2, 32], strides = [1, 1]} : vector<2x96xf32> to vector<2x32xf32>
    %406 = vector.extract_strided_slice %395 {offsets = [0, 32], sizes = [2, 32], strides = [1, 1]} : vector<2x96xf32> to vector<2x32xf32>
    %407 = arith.addf %405, %406 : vector<2x32xf32>
    %408 = arith.negf %407 : vector<2x32xf32>
    %409 = math.exp %408 : vector<2x32xf32>
    %cst_54 = arith.constant 1.000000e+00 : f32
    %410 = vector.broadcast %cst_54 : f32 to vector<2x32xf32>
    %411 = arith.addf %410, %409 : vector<2x32xf32>
    %412 = arith.divf %410, %411 : vector<2x32xf32>
    %413 = vector.extract_strided_slice %393 {offsets = [0, 64], sizes = [2, 32], strides = [1, 1]} : vector<2x96xf32> to vector<2x32xf32>
    %414 = vector.extract_strided_slice %395 {offsets = [0, 64], sizes = [2, 32], strides = [1, 1]} : vector<2x96xf32> to vector<2x32xf32>
    %415 = arith.mulf %404, %414 : vector<2x32xf32>
    %416 = arith.addf %413, %415 : vector<2x32xf32>
    %417 = math.tanh %416 : vector<2x32xf32>
    %cst_55 = arith.constant 1.000000e+00 : f32
    %418 = vector.broadcast %cst_55 : f32 to vector<2x32xf32>
    %419 = arith.subf %418, %412 : vector<2x32xf32>
    %420 = arith.mulf %419, %417 : vector<2x32xf32>
    %421 = vector.extract_strided_slice %389 {offsets = [0, 0], sizes = [2, 32], strides = [1, 1]} : vector<2x64xf32> to vector<2x32xf32>
    %422 = arith.mulf %412, %421 : vector<2x32xf32>
    %423 = arith.addf %420, %422 : vector<2x32xf32>
    %424 = vector.extract_strided_slice %394 {offsets = [0, 0], sizes = [2, 32], strides = [1, 1]} : vector<2x96xf32> to vector<2x32xf32>
    %425 = vector.extract_strided_slice %396 {offsets = [0, 0], sizes = [2, 32], strides = [1, 1]} : vector<2x96xf32> to vector<2x32xf32>
    %426 = arith.addf %424, %425 : vector<2x32xf32>
    %427 = arith.negf %426 : vector<2x32xf32>
    %428 = math.exp %427 : vector<2x32xf32>
    %cst_56 = arith.constant 1.000000e+00 : f32
    %429 = vector.broadcast %cst_56 : f32 to vector<2x32xf32>
    %430 = arith.addf %429, %428 : vector<2x32xf32>
    %431 = arith.divf %429, %430 : vector<2x32xf32>
    %432 = vector.extract_strided_slice %394 {offsets = [0, 32], sizes = [2, 32], strides = [1, 1]} : vector<2x96xf32> to vector<2x32xf32>
    %433 = vector.extract_strided_slice %396 {offsets = [0, 32], sizes = [2, 32], strides = [1, 1]} : vector<2x96xf32> to vector<2x32xf32>
    %434 = arith.addf %432, %433 : vector<2x32xf32>
    %435 = arith.negf %434 : vector<2x32xf32>
    %436 = math.exp %435 : vector<2x32xf32>
    %cst_57 = arith.constant 1.000000e+00 : f32
    %437 = vector.broadcast %cst_57 : f32 to vector<2x32xf32>
    %438 = arith.addf %437, %436 : vector<2x32xf32>
    %439 = arith.divf %437, %438 : vector<2x32xf32>
    %440 = vector.extract_strided_slice %394 {offsets = [0, 64], sizes = [2, 32], strides = [1, 1]} : vector<2x96xf32> to vector<2x32xf32>
    %441 = vector.extract_strided_slice %396 {offsets = [0, 64], sizes = [2, 32], strides = [1, 1]} : vector<2x96xf32> to vector<2x32xf32>
    %442 = arith.mulf %431, %441 : vector<2x32xf32>
    %443 = arith.addf %440, %442 : vector<2x32xf32>
    %444 = math.tanh %443 : vector<2x32xf32>
    %cst_58 = arith.constant 1.000000e+00 : f32
    %445 = vector.broadcast %cst_58 : f32 to vector<2x32xf32>
    %446 = arith.subf %445, %439 : vector<2x32xf32>
    %447 = arith.mulf %446, %444 : vector<2x32xf32>
    %448 = vector.extract_strided_slice %389 {offsets = [0, 32], sizes = [2, 32], strides = [1, 1]} : vector<2x64xf32> to vector<2x32xf32>
    %449 = arith.mulf %439, %448 : vector<2x32xf32>
    %450 = arith.addf %447, %449 : vector<2x32xf32>
    %451 = tpu.concatenate %423, %450 in 1 : vector<2x32xf32>, vector<2x32xf32> -> vector<2x64xf32>
    %cst_59 = arith.constant dense<0.000000e+00> : vector<2x192xf32>
    %452 = tpu.matmul %451, %11, %cst_59 {dimension_numbers = #tpu.dot_dimension_numbers<[1], [0], [0], [1], [0, 0, 1, 1], [], []>} : vector<2x64xf32>, vector<64x192xf32>, vector<2x192xf32> -> vector<2x192xf32>
    %453 = vector.broadcast %13 : vector<1x192xf32> to vector<2x192xf32>
    %454 = arith.addf %452, %453 : vector<2x192xf32>
    %455 = vector.extract_strided_slice %16 {offsets = [14, 0], sizes = [2, 96], strides = [1, 1]} : vector<16x192xf32> to vector<2x96xf32>
    %456 = vector.extract_strided_slice %16 {offsets = [0, 96], sizes = [2, 96], strides = [1, 1]} : vector<16x192xf32> to vector<2x96xf32>
    %457 = vector.extract_strided_slice %454 {offsets = [0, 0], sizes = [2, 96], strides = [1, 1]} : vector<2x192xf32> to vector<2x96xf32>
    %458 = vector.extract_strided_slice %454 {offsets = [0, 96], sizes = [2, 96], strides = [1, 1]} : vector<2x192xf32> to vector<2x96xf32>
    %459 = vector.extract_strided_slice %455 {offsets = [0, 0], sizes = [2, 32], strides = [1, 1]} : vector<2x96xf32> to vector<2x32xf32>
    %460 = vector.extract_strided_slice %457 {offsets = [0, 0], sizes = [2, 32], strides = [1, 1]} : vector<2x96xf32> to vector<2x32xf32>
    %461 = arith.addf %459, %460 : vector<2x32xf32>
    %462 = arith.negf %461 : vector<2x32xf32>
    %463 = math.exp %462 : vector<2x32xf32>
    %cst_60 = arith.constant 1.000000e+00 : f32
    %464 = vector.broadcast %cst_60 : f32 to vector<2x32xf32>
    %465 = arith.addf %464, %463 : vector<2x32xf32>
    %466 = arith.divf %464, %465 : vector<2x32xf32>
    %467 = vector.extract_strided_slice %455 {offsets = [0, 32], sizes = [2, 32], strides = [1, 1]} : vector<2x96xf32> to vector<2x32xf32>
    %468 = vector.extract_strided_slice %457 {offsets = [0, 32], sizes = [2, 32], strides = [1, 1]} : vector<2x96xf32> to vector<2x32xf32>
    %469 = arith.addf %467, %468 : vector<2x32xf32>
    %470 = arith.negf %469 : vector<2x32xf32>
    %471 = math.exp %470 : vector<2x32xf32>
    %cst_61 = arith.constant 1.000000e+00 : f32
    %472 = vector.broadcast %cst_61 : f32 to vector<2x32xf32>
    %473 = arith.addf %472, %471 : vector<2x32xf32>
    %474 = arith.divf %472, %473 : vector<2x32xf32>
    %475 = vector.extract_strided_slice %455 {offsets = [0, 64], sizes = [2, 32], strides = [1, 1]} : vector<2x96xf32> to vector<2x32xf32>
    %476 = vector.extract_strided_slice %457 {offsets = [0, 64], sizes = [2, 32], strides = [1, 1]} : vector<2x96xf32> to vector<2x32xf32>
    %477 = arith.mulf %466, %476 : vector<2x32xf32>
    %478 = arith.addf %475, %477 : vector<2x32xf32>
    %479 = math.tanh %478 : vector<2x32xf32>
    %cst_62 = arith.constant 1.000000e+00 : f32
    %480 = vector.broadcast %cst_62 : f32 to vector<2x32xf32>
    %481 = arith.subf %480, %474 : vector<2x32xf32>
    %482 = arith.mulf %481, %479 : vector<2x32xf32>
    %483 = vector.extract_strided_slice %451 {offsets = [0, 0], sizes = [2, 32], strides = [1, 1]} : vector<2x64xf32> to vector<2x32xf32>
    %484 = arith.mulf %474, %483 : vector<2x32xf32>
    %485 = arith.addf %482, %484 : vector<2x32xf32>
    %486 = vector.extract_strided_slice %456 {offsets = [0, 0], sizes = [2, 32], strides = [1, 1]} : vector<2x96xf32> to vector<2x32xf32>
    %487 = vector.extract_strided_slice %458 {offsets = [0, 0], sizes = [2, 32], strides = [1, 1]} : vector<2x96xf32> to vector<2x32xf32>
    %488 = arith.addf %486, %487 : vector<2x32xf32>
    %489 = arith.negf %488 : vector<2x32xf32>
    %490 = math.exp %489 : vector<2x32xf32>
    %cst_63 = arith.constant 1.000000e+00 : f32
    %491 = vector.broadcast %cst_63 : f32 to vector<2x32xf32>
    %492 = arith.addf %491, %490 : vector<2x32xf32>
    %493 = arith.divf %491, %492 : vector<2x32xf32>
    %494 = vector.extract_strided_slice %456 {offsets = [0, 32], sizes = [2, 32], strides = [1, 1]} : vector<2x96xf32> to vector<2x32xf32>
    %495 = vector.extract_strided_slice %458 {offsets = [0, 32], sizes = [2, 32], strides = [1, 1]} : vector<2x96xf32> to vector<2x32xf32>
    %496 = arith.addf %494, %495 : vector<2x32xf32>
    %497 = arith.negf %496 : vector<2x32xf32>
    %498 = math.exp %497 : vector<2x32xf32>
    %cst_64 = arith.constant 1.000000e+00 : f32
    %499 = vector.broadcast %cst_64 : f32 to vector<2x32xf32>
    %500 = arith.addf %499, %498 : vector<2x32xf32>
    %501 = arith.divf %499, %500 : vector<2x32xf32>
    %502 = vector.extract_strided_slice %456 {offsets = [0, 64], sizes = [2, 32], strides = [1, 1]} : vector<2x96xf32> to vector<2x32xf32>
    %503 = vector.extract_strided_slice %458 {offsets = [0, 64], sizes = [2, 32], strides = [1, 1]} : vector<2x96xf32> to vector<2x32xf32>
    %504 = arith.mulf %493, %503 : vector<2x32xf32>
    %505 = arith.addf %502, %504 : vector<2x32xf32>
    %506 = math.tanh %505 : vector<2x32xf32>
    %cst_65 = arith.constant 1.000000e+00 : f32
    %507 = vector.broadcast %cst_65 : f32 to vector<2x32xf32>
    %508 = arith.subf %507, %501 : vector<2x32xf32>
    %509 = arith.mulf %508, %506 : vector<2x32xf32>
    %510 = vector.extract_strided_slice %451 {offsets = [0, 32], sizes = [2, 32], strides = [1, 1]} : vector<2x64xf32> to vector<2x32xf32>
    %511 = arith.mulf %501, %510 : vector<2x32xf32>
    %512 = arith.addf %509, %511 : vector<2x32xf32>
    %513 = tpu.concatenate %51, %512 in 1 : vector<2x32xf32>, vector<2x32xf32> -> vector<2x64xf32>
    %514 = tpu.concatenate %113, %450 in 1 : vector<2x32xf32>, vector<2x32xf32> -> vector<2x64xf32>
    %515 = tpu.concatenate %175, %388 in 1 : vector<2x32xf32>, vector<2x32xf32> -> vector<2x64xf32>
    %516 = tpu.concatenate %237, %326 in 1 : vector<2x32xf32>, vector<2x32xf32> -> vector<2x64xf32>
    %517 = tpu.concatenate %299, %264 in 1 : vector<2x32xf32>, vector<2x32xf32> -> vector<2x64xf32>
    %518 = tpu.concatenate %361, %202 in 1 : vector<2x32xf32>, vector<2x32xf32> -> vector<2x64xf32>
    %519 = tpu.concatenate %423, %140 in 1 : vector<2x32xf32>, vector<2x32xf32> -> vector<2x64xf32>
    %520 = tpu.concatenate %485, %78 in 1 : vector<2x32xf32>, vector<2x32xf32> -> vector<2x64xf32>
    %521 = tpu.concatenate %513, %514, %515, %516, %517, %518, %519, %520 in 0 : vector<2x64xf32>, vector<2x64xf32>, vector<2x64xf32>, vector<2x64xf32>, vector<2x64xf32>, vector<2x64xf32>, vector<2x64xf32>, vector<2x64xf32> -> vector<16x64xf32>
    %c0_66 = arith.constant 0 : index
    %c0_67 = arith.constant 0 : index
    %522 = vector.load %arg6[%c0_66, %c0_67] : memref<64x192xf32, #tpu.memory_space<vmem>>, vector<64x192xf32>
    %c0_68 = arith.constant 0 : index
    %c0_69 = arith.constant 0 : index
    %523 = vector.load %arg7[%c0_68, %c0_69] : memref<64x192xf32, #tpu.memory_space<vmem>>, vector<64x192xf32>
    %c0_70 = arith.constant 0 : index
    %c0_71 = arith.constant 0 : index
    %524 = vector.load %arg8[%c0_70, %c0_71] : memref<1x192xf32, #tpu.memory_space<vmem>>, vector<1x192xf32>
    %c0_72 = arith.constant 0 : index
    %c0_73 = arith.constant 0 : index
    %525 = vector.load %arg9[%c0_72, %c0_73] : memref<1x192xf32, #tpu.memory_space<vmem>>, vector<1x192xf32>
    %cst_74 = arith.constant dense<0.000000e+00> : vector<16x192xf32>
    %526 = tpu.matmul %521, %522, %cst_74 {dimension_numbers = #tpu.dot_dimension_numbers<[1], [0], [0], [1], [0, 0, 1, 1], [], []>} : vector<16x64xf32>, vector<64x192xf32>, vector<16x192xf32> -> vector<16x192xf32>
    %527 = vector.broadcast %524 : vector<1x192xf32> to vector<16x192xf32>
    %528 = arith.addf %526, %527 : vector<16x192xf32>
    %cst_75 = arith.constant 0.000000e+00 : f32
    %529 = vector.broadcast %cst_75 : f32 to vector<2x64xf32>
    %cst_76 = arith.constant dense<0.000000e+00> : vector<2x192xf32>
    %530 = tpu.matmul %529, %523, %cst_76 {dimension_numbers = #tpu.dot_dimension_numbers<[1], [0], [0], [1], [0, 0, 1, 1], [], []>} : vector<2x64xf32>, vector<64x192xf32>, vector<2x192xf32> -> vector<2x192xf32>
    %531 = vector.broadcast %525 : vector<1x192xf32> to vector<2x192xf32>
    %532 = arith.addf %530, %531 : vector<2x192xf32>
    %533 = vector.extract_strided_slice %528 {offsets = [0, 0], sizes = [2, 96], strides = [1, 1]} : vector<16x192xf32> to vector<2x96xf32>
    %534 = vector.extract_strided_slice %528 {offsets = [14, 96], sizes = [2, 96], strides = [1, 1]} : vector<16x192xf32> to vector<2x96xf32>
    %535 = vector.extract_strided_slice %532 {offsets = [0, 0], sizes = [2, 96], strides = [1, 1]} : vector<2x192xf32> to vector<2x96xf32>
    %536 = vector.extract_strided_slice %532 {offsets = [0, 96], sizes = [2, 96], strides = [1, 1]} : vector<2x192xf32> to vector<2x96xf32>
    %537 = vector.extract_strided_slice %533 {offsets = [0, 0], sizes = [2, 32], strides = [1, 1]} : vector<2x96xf32> to vector<2x32xf32>
    %538 = vector.extract_strided_slice %535 {offsets = [0, 0], sizes = [2, 32], strides = [1, 1]} : vector<2x96xf32> to vector<2x32xf32>
    %539 = arith.addf %537, %538 : vector<2x32xf32>
    %540 = arith.negf %539 : vector<2x32xf32>
    %541 = math.exp %540 : vector<2x32xf32>
    %cst_77 = arith.constant 1.000000e+00 : f32
    %542 = vector.broadcast %cst_77 : f32 to vector<2x32xf32>
    %543 = arith.addf %542, %541 : vector<2x32xf32>
    %544 = arith.divf %542, %543 : vector<2x32xf32>
    %545 = vector.extract_strided_slice %533 {offsets = [0, 32], sizes = [2, 32], strides = [1, 1]} : vector<2x96xf32> to vector<2x32xf32>
    %546 = vector.extract_strided_slice %535 {offsets = [0, 32], sizes = [2, 32], strides = [1, 1]} : vector<2x96xf32> to vector<2x32xf32>
    %547 = arith.addf %545, %546 : vector<2x32xf32>
    %548 = arith.negf %547 : vector<2x32xf32>
    %549 = math.exp %548 : vector<2x32xf32>
    %cst_78 = arith.constant 1.000000e+00 : f32
    %550 = vector.broadcast %cst_78 : f32 to vector<2x32xf32>
    %551 = arith.addf %550, %549 : vector<2x32xf32>
    %552 = arith.divf %550, %551 : vector<2x32xf32>
    %553 = vector.extract_strided_slice %533 {offsets = [0, 64], sizes = [2, 32], strides = [1, 1]} : vector<2x96xf32> to vector<2x32xf32>
    %554 = vector.extract_strided_slice %535 {offsets = [0, 64], sizes = [2, 32], strides = [1, 1]} : vector<2x96xf32> to vector<2x32xf32>
    %555 = arith.mulf %544, %554 : vector<2x32xf32>
    %556 = arith.addf %553, %555 : vector<2x32xf32>
    %557 = math.tanh %556 : vector<2x32xf32>
    %cst_79 = arith.constant 1.000000e+00 : f32
    %558 = vector.broadcast %cst_79 : f32 to vector<2x32xf32>
    %559 = arith.subf %558, %552 : vector<2x32xf32>
    %560 = arith.mulf %559, %557 : vector<2x32xf32>
    %561 = vector.extract_strided_slice %529 {offsets = [0, 0], sizes = [2, 32], strides = [1, 1]} : vector<2x64xf32> to vector<2x32xf32>
    %562 = arith.mulf %552, %561 : vector<2x32xf32>
    %563 = arith.addf %560, %562 : vector<2x32xf32>
    %564 = vector.extract_strided_slice %534 {offsets = [0, 0], sizes = [2, 32], strides = [1, 1]} : vector<2x96xf32> to vector<2x32xf32>
    %565 = vector.extract_strided_slice %536 {offsets = [0, 0], sizes = [2, 32], strides = [1, 1]} : vector<2x96xf32> to vector<2x32xf32>
    %566 = arith.addf %564, %565 : vector<2x32xf32>
    %567 = arith.negf %566 : vector<2x32xf32>
    %568 = math.exp %567 : vector<2x32xf32>
    %cst_80 = arith.constant 1.000000e+00 : f32
    %569 = vector.broadcast %cst_80 : f32 to vector<2x32xf32>
    %570 = arith.addf %569, %568 : vector<2x32xf32>
    %571 = arith.divf %569, %570 : vector<2x32xf32>
    %572 = vector.extract_strided_slice %534 {offsets = [0, 32], sizes = [2, 32], strides = [1, 1]} : vector<2x96xf32> to vector<2x32xf32>
    %573 = vector.extract_strided_slice %536 {offsets = [0, 32], sizes = [2, 32], strides = [1, 1]} : vector<2x96xf32> to vector<2x32xf32>
    %574 = arith.addf %572, %573 : vector<2x32xf32>
    %575 = arith.negf %574 : vector<2x32xf32>
    %576 = math.exp %575 : vector<2x32xf32>
    %cst_81 = arith.constant 1.000000e+00 : f32
    %577 = vector.broadcast %cst_81 : f32 to vector<2x32xf32>
    %578 = arith.addf %577, %576 : vector<2x32xf32>
    %579 = arith.divf %577, %578 : vector<2x32xf32>
    %580 = vector.extract_strided_slice %534 {offsets = [0, 64], sizes = [2, 32], strides = [1, 1]} : vector<2x96xf32> to vector<2x32xf32>
    %581 = vector.extract_strided_slice %536 {offsets = [0, 64], sizes = [2, 32], strides = [1, 1]} : vector<2x96xf32> to vector<2x32xf32>
    %582 = arith.mulf %571, %581 : vector<2x32xf32>
    %583 = arith.addf %580, %582 : vector<2x32xf32>
    %584 = math.tanh %583 : vector<2x32xf32>
    %cst_82 = arith.constant 1.000000e+00 : f32
    %585 = vector.broadcast %cst_82 : f32 to vector<2x32xf32>
    %586 = arith.subf %585, %579 : vector<2x32xf32>
    %587 = arith.mulf %586, %584 : vector<2x32xf32>
    %588 = vector.extract_strided_slice %529 {offsets = [0, 32], sizes = [2, 32], strides = [1, 1]} : vector<2x64xf32> to vector<2x32xf32>
    %589 = arith.mulf %579, %588 : vector<2x32xf32>
    %590 = arith.addf %587, %589 : vector<2x32xf32>
    %591 = tpu.concatenate %563, %590 in 1 : vector<2x32xf32>, vector<2x32xf32> -> vector<2x64xf32>
    %cst_83 = arith.constant dense<0.000000e+00> : vector<2x192xf32>
    %592 = tpu.matmul %591, %523, %cst_83 {dimension_numbers = #tpu.dot_dimension_numbers<[1], [0], [0], [1], [0, 0, 1, 1], [], []>} : vector<2x64xf32>, vector<64x192xf32>, vector<2x192xf32> -> vector<2x192xf32>
    %593 = vector.broadcast %525 : vector<1x192xf32> to vector<2x192xf32>
    %594 = arith.addf %592, %593 : vector<2x192xf32>
    %595 = vector.extract_strided_slice %528 {offsets = [2, 0], sizes = [2, 96], strides = [1, 1]} : vector<16x192xf32> to vector<2x96xf32>
    %596 = vector.extract_strided_slice %528 {offsets = [12, 96], sizes = [2, 96], strides = [1, 1]} : vector<16x192xf32> to vector<2x96xf32>
    %597 = vector.extract_strided_slice %594 {offsets = [0, 0], sizes = [2, 96], strides = [1, 1]} : vector<2x192xf32> to vector<2x96xf32>
    %598 = vector.extract_strided_slice %594 {offsets = [0, 96], sizes = [2, 96], strides = [1, 1]} : vector<2x192xf32> to vector<2x96xf32>
    %599 = vector.extract_strided_slice %595 {offsets = [0, 0], sizes = [2, 32], strides = [1, 1]} : vector<2x96xf32> to vector<2x32xf32>
    %600 = vector.extract_strided_slice %597 {offsets = [0, 0], sizes = [2, 32], strides = [1, 1]} : vector<2x96xf32> to vector<2x32xf32>
    %601 = arith.addf %599, %600 : vector<2x32xf32>
    %602 = arith.negf %601 : vector<2x32xf32>
    %603 = math.exp %602 : vector<2x32xf32>
    %cst_84 = arith.constant 1.000000e+00 : f32
    %604 = vector.broadcast %cst_84 : f32 to vector<2x32xf32>
    %605 = arith.addf %604, %603 : vector<2x32xf32>
    %606 = arith.divf %604, %605 : vector<2x32xf32>
    %607 = vector.extract_strided_slice %595 {offsets = [0, 32], sizes = [2, 32], strides = [1, 1]} : vector<2x96xf32> to vector<2x32xf32>
    %608 = vector.extract_strided_slice %597 {offsets = [0, 32], sizes = [2, 32], strides = [1, 1]} : vector<2x96xf32> to vector<2x32xf32>
    %609 = arith.addf %607, %608 : vector<2x32xf32>
    %610 = arith.negf %609 : vector<2x32xf32>
    %611 = math.exp %610 : vector<2x32xf32>
    %cst_85 = arith.constant 1.000000e+00 : f32
    %612 = vector.broadcast %cst_85 : f32 to vector<2x32xf32>
    %613 = arith.addf %612, %611 : vector<2x32xf32>
    %614 = arith.divf %612, %613 : vector<2x32xf32>
    %615 = vector.extract_strided_slice %595 {offsets = [0, 64], sizes = [2, 32], strides = [1, 1]} : vector<2x96xf32> to vector<2x32xf32>
    %616 = vector.extract_strided_slice %597 {offsets = [0, 64], sizes = [2, 32], strides = [1, 1]} : vector<2x96xf32> to vector<2x32xf32>
    %617 = arith.mulf %606, %616 : vector<2x32xf32>
    %618 = arith.addf %615, %617 : vector<2x32xf32>
    %619 = math.tanh %618 : vector<2x32xf32>
    %cst_86 = arith.constant 1.000000e+00 : f32
    %620 = vector.broadcast %cst_86 : f32 to vector<2x32xf32>
    %621 = arith.subf %620, %614 : vector<2x32xf32>
    %622 = arith.mulf %621, %619 : vector<2x32xf32>
    %623 = vector.extract_strided_slice %591 {offsets = [0, 0], sizes = [2, 32], strides = [1, 1]} : vector<2x64xf32> to vector<2x32xf32>
    %624 = arith.mulf %614, %623 : vector<2x32xf32>
    %625 = arith.addf %622, %624 : vector<2x32xf32>
    %626 = vector.extract_strided_slice %596 {offsets = [0, 0], sizes = [2, 32], strides = [1, 1]} : vector<2x96xf32> to vector<2x32xf32>
    %627 = vector.extract_strided_slice %598 {offsets = [0, 0], sizes = [2, 32], strides = [1, 1]} : vector<2x96xf32> to vector<2x32xf32>
    %628 = arith.addf %626, %627 : vector<2x32xf32>
    %629 = arith.negf %628 : vector<2x32xf32>
    %630 = math.exp %629 : vector<2x32xf32>
    %cst_87 = arith.constant 1.000000e+00 : f32
    %631 = vector.broadcast %cst_87 : f32 to vector<2x32xf32>
    %632 = arith.addf %631, %630 : vector<2x32xf32>
    %633 = arith.divf %631, %632 : vector<2x32xf32>
    %634 = vector.extract_strided_slice %596 {offsets = [0, 32], sizes = [2, 32], strides = [1, 1]} : vector<2x96xf32> to vector<2x32xf32>
    %635 = vector.extract_strided_slice %598 {offsets = [0, 32], sizes = [2, 32], strides = [1, 1]} : vector<2x96xf32> to vector<2x32xf32>
    %636 = arith.addf %634, %635 : vector<2x32xf32>
    %637 = arith.negf %636 : vector<2x32xf32>
    %638 = math.exp %637 : vector<2x32xf32>
    %cst_88 = arith.constant 1.000000e+00 : f32
    %639 = vector.broadcast %cst_88 : f32 to vector<2x32xf32>
    %640 = arith.addf %639, %638 : vector<2x32xf32>
    %641 = arith.divf %639, %640 : vector<2x32xf32>
    %642 = vector.extract_strided_slice %596 {offsets = [0, 64], sizes = [2, 32], strides = [1, 1]} : vector<2x96xf32> to vector<2x32xf32>
    %643 = vector.extract_strided_slice %598 {offsets = [0, 64], sizes = [2, 32], strides = [1, 1]} : vector<2x96xf32> to vector<2x32xf32>
    %644 = arith.mulf %633, %643 : vector<2x32xf32>
    %645 = arith.addf %642, %644 : vector<2x32xf32>
    %646 = math.tanh %645 : vector<2x32xf32>
    %cst_89 = arith.constant 1.000000e+00 : f32
    %647 = vector.broadcast %cst_89 : f32 to vector<2x32xf32>
    %648 = arith.subf %647, %641 : vector<2x32xf32>
    %649 = arith.mulf %648, %646 : vector<2x32xf32>
    %650 = vector.extract_strided_slice %591 {offsets = [0, 32], sizes = [2, 32], strides = [1, 1]} : vector<2x64xf32> to vector<2x32xf32>
    %651 = arith.mulf %641, %650 : vector<2x32xf32>
    %652 = arith.addf %649, %651 : vector<2x32xf32>
    %653 = tpu.concatenate %625, %652 in 1 : vector<2x32xf32>, vector<2x32xf32> -> vector<2x64xf32>
    %cst_90 = arith.constant dense<0.000000e+00> : vector<2x192xf32>
    %654 = tpu.matmul %653, %523, %cst_90 {dimension_numbers = #tpu.dot_dimension_numbers<[1], [0], [0], [1], [0, 0, 1, 1], [], []>} : vector<2x64xf32>, vector<64x192xf32>, vector<2x192xf32> -> vector<2x192xf32>
    %655 = vector.broadcast %525 : vector<1x192xf32> to vector<2x192xf32>
    %656 = arith.addf %654, %655 : vector<2x192xf32>
    %657 = vector.extract_strided_slice %528 {offsets = [4, 0], sizes = [2, 96], strides = [1, 1]} : vector<16x192xf32> to vector<2x96xf32>
    %658 = vector.extract_strided_slice %528 {offsets = [10, 96], sizes = [2, 96], strides = [1, 1]} : vector<16x192xf32> to vector<2x96xf32>
    %659 = vector.extract_strided_slice %656 {offsets = [0, 0], sizes = [2, 96], strides = [1, 1]} : vector<2x192xf32> to vector<2x96xf32>
    %660 = vector.extract_strided_slice %656 {offsets = [0, 96], sizes = [2, 96], strides = [1, 1]} : vector<2x192xf32> to vector<2x96xf32>
    %661 = vector.extract_strided_slice %657 {offsets = [0, 0], sizes = [2, 32], strides = [1, 1]} : vector<2x96xf32> to vector<2x32xf32>
    %662 = vector.extract_strided_slice %659 {offsets = [0, 0], sizes = [2, 32], strides = [1, 1]} : vector<2x96xf32> to vector<2x32xf32>
    %663 = arith.addf %661, %662 : vector<2x32xf32>
    %664 = arith.negf %663 : vector<2x32xf32>
    %665 = math.exp %664 : vector<2x32xf32>
    %cst_91 = arith.constant 1.000000e+00 : f32
    %666 = vector.broadcast %cst_91 : f32 to vector<2x32xf32>
    %667 = arith.addf %666, %665 : vector<2x32xf32>
    %668 = arith.divf %666, %667 : vector<2x32xf32>
    %669 = vector.extract_strided_slice %657 {offsets = [0, 32], sizes = [2, 32], strides = [1, 1]} : vector<2x96xf32> to vector<2x32xf32>
    %670 = vector.extract_strided_slice %659 {offsets = [0, 32], sizes = [2, 32], strides = [1, 1]} : vector<2x96xf32> to vector<2x32xf32>
    %671 = arith.addf %669, %670 : vector<2x32xf32>
    %672 = arith.negf %671 : vector<2x32xf32>
    %673 = math.exp %672 : vector<2x32xf32>
    %cst_92 = arith.constant 1.000000e+00 : f32
    %674 = vector.broadcast %cst_92 : f32 to vector<2x32xf32>
    %675 = arith.addf %674, %673 : vector<2x32xf32>
    %676 = arith.divf %674, %675 : vector<2x32xf32>
    %677 = vector.extract_strided_slice %657 {offsets = [0, 64], sizes = [2, 32], strides = [1, 1]} : vector<2x96xf32> to vector<2x32xf32>
    %678 = vector.extract_strided_slice %659 {offsets = [0, 64], sizes = [2, 32], strides = [1, 1]} : vector<2x96xf32> to vector<2x32xf32>
    %679 = arith.mulf %668, %678 : vector<2x32xf32>
    %680 = arith.addf %677, %679 : vector<2x32xf32>
    %681 = math.tanh %680 : vector<2x32xf32>
    %cst_93 = arith.constant 1.000000e+00 : f32
    %682 = vector.broadcast %cst_93 : f32 to vector<2x32xf32>
    %683 = arith.subf %682, %676 : vector<2x32xf32>
    %684 = arith.mulf %683, %681 : vector<2x32xf32>
    %685 = vector.extract_strided_slice %653 {offsets = [0, 0], sizes = [2, 32], strides = [1, 1]} : vector<2x64xf32> to vector<2x32xf32>
    %686 = arith.mulf %676, %685 : vector<2x32xf32>
    %687 = arith.addf %684, %686 : vector<2x32xf32>
    %688 = vector.extract_strided_slice %658 {offsets = [0, 0], sizes = [2, 32], strides = [1, 1]} : vector<2x96xf32> to vector<2x32xf32>
    %689 = vector.extract_strided_slice %660 {offsets = [0, 0], sizes = [2, 32], strides = [1, 1]} : vector<2x96xf32> to vector<2x32xf32>
    %690 = arith.addf %688, %689 : vector<2x32xf32>
    %691 = arith.negf %690 : vector<2x32xf32>
    %692 = math.exp %691 : vector<2x32xf32>
    %cst_94 = arith.constant 1.000000e+00 : f32
    %693 = vector.broadcast %cst_94 : f32 to vector<2x32xf32>
    %694 = arith.addf %693, %692 : vector<2x32xf32>
    %695 = arith.divf %693, %694 : vector<2x32xf32>
    %696 = vector.extract_strided_slice %658 {offsets = [0, 32], sizes = [2, 32], strides = [1, 1]} : vector<2x96xf32> to vector<2x32xf32>
    %697 = vector.extract_strided_slice %660 {offsets = [0, 32], sizes = [2, 32], strides = [1, 1]} : vector<2x96xf32> to vector<2x32xf32>
    %698 = arith.addf %696, %697 : vector<2x32xf32>
    %699 = arith.negf %698 : vector<2x32xf32>
    %700 = math.exp %699 : vector<2x32xf32>
    %cst_95 = arith.constant 1.000000e+00 : f32
    %701 = vector.broadcast %cst_95 : f32 to vector<2x32xf32>
    %702 = arith.addf %701, %700 : vector<2x32xf32>
    %703 = arith.divf %701, %702 : vector<2x32xf32>
    %704 = vector.extract_strided_slice %658 {offsets = [0, 64], sizes = [2, 32], strides = [1, 1]} : vector<2x96xf32> to vector<2x32xf32>
    %705 = vector.extract_strided_slice %660 {offsets = [0, 64], sizes = [2, 32], strides = [1, 1]} : vector<2x96xf32> to vector<2x32xf32>
    %706 = arith.mulf %695, %705 : vector<2x32xf32>
    %707 = arith.addf %704, %706 : vector<2x32xf32>
    %708 = math.tanh %707 : vector<2x32xf32>
    %cst_96 = arith.constant 1.000000e+00 : f32
    %709 = vector.broadcast %cst_96 : f32 to vector<2x32xf32>
    %710 = arith.subf %709, %703 : vector<2x32xf32>
    %711 = arith.mulf %710, %708 : vector<2x32xf32>
    %712 = vector.extract_strided_slice %653 {offsets = [0, 32], sizes = [2, 32], strides = [1, 1]} : vector<2x64xf32> to vector<2x32xf32>
    %713 = arith.mulf %703, %712 : vector<2x32xf32>
    %714 = arith.addf %711, %713 : vector<2x32xf32>
    %715 = tpu.concatenate %687, %714 in 1 : vector<2x32xf32>, vector<2x32xf32> -> vector<2x64xf32>
    %cst_97 = arith.constant dense<0.000000e+00> : vector<2x192xf32>
    %716 = tpu.matmul %715, %523, %cst_97 {dimension_numbers = #tpu.dot_dimension_numbers<[1], [0], [0], [1], [0, 0, 1, 1], [], []>} : vector<2x64xf32>, vector<64x192xf32>, vector<2x192xf32> -> vector<2x192xf32>
    %717 = vector.broadcast %525 : vector<1x192xf32> to vector<2x192xf32>
    %718 = arith.addf %716, %717 : vector<2x192xf32>
    %719 = vector.extract_strided_slice %528 {offsets = [6, 0], sizes = [2, 96], strides = [1, 1]} : vector<16x192xf32> to vector<2x96xf32>
    %720 = vector.extract_strided_slice %528 {offsets = [8, 96], sizes = [2, 96], strides = [1, 1]} : vector<16x192xf32> to vector<2x96xf32>
    %721 = vector.extract_strided_slice %718 {offsets = [0, 0], sizes = [2, 96], strides = [1, 1]} : vector<2x192xf32> to vector<2x96xf32>
    %722 = vector.extract_strided_slice %718 {offsets = [0, 96], sizes = [2, 96], strides = [1, 1]} : vector<2x192xf32> to vector<2x96xf32>
    %723 = vector.extract_strided_slice %719 {offsets = [0, 0], sizes = [2, 32], strides = [1, 1]} : vector<2x96xf32> to vector<2x32xf32>
    %724 = vector.extract_strided_slice %721 {offsets = [0, 0], sizes = [2, 32], strides = [1, 1]} : vector<2x96xf32> to vector<2x32xf32>
    %725 = arith.addf %723, %724 : vector<2x32xf32>
    %726 = arith.negf %725 : vector<2x32xf32>
    %727 = math.exp %726 : vector<2x32xf32>
    %cst_98 = arith.constant 1.000000e+00 : f32
    %728 = vector.broadcast %cst_98 : f32 to vector<2x32xf32>
    %729 = arith.addf %728, %727 : vector<2x32xf32>
    %730 = arith.divf %728, %729 : vector<2x32xf32>
    %731 = vector.extract_strided_slice %719 {offsets = [0, 32], sizes = [2, 32], strides = [1, 1]} : vector<2x96xf32> to vector<2x32xf32>
    %732 = vector.extract_strided_slice %721 {offsets = [0, 32], sizes = [2, 32], strides = [1, 1]} : vector<2x96xf32> to vector<2x32xf32>
    %733 = arith.addf %731, %732 : vector<2x32xf32>
    %734 = arith.negf %733 : vector<2x32xf32>
    %735 = math.exp %734 : vector<2x32xf32>
    %cst_99 = arith.constant 1.000000e+00 : f32
    %736 = vector.broadcast %cst_99 : f32 to vector<2x32xf32>
    %737 = arith.addf %736, %735 : vector<2x32xf32>
    %738 = arith.divf %736, %737 : vector<2x32xf32>
    %739 = vector.extract_strided_slice %719 {offsets = [0, 64], sizes = [2, 32], strides = [1, 1]} : vector<2x96xf32> to vector<2x32xf32>
    %740 = vector.extract_strided_slice %721 {offsets = [0, 64], sizes = [2, 32], strides = [1, 1]} : vector<2x96xf32> to vector<2x32xf32>
    %741 = arith.mulf %730, %740 : vector<2x32xf32>
    %742 = arith.addf %739, %741 : vector<2x32xf32>
    %743 = math.tanh %742 : vector<2x32xf32>
    %cst_100 = arith.constant 1.000000e+00 : f32
    %744 = vector.broadcast %cst_100 : f32 to vector<2x32xf32>
    %745 = arith.subf %744, %738 : vector<2x32xf32>
    %746 = arith.mulf %745, %743 : vector<2x32xf32>
    %747 = vector.extract_strided_slice %715 {offsets = [0, 0], sizes = [2, 32], strides = [1, 1]} : vector<2x64xf32> to vector<2x32xf32>
    %748 = arith.mulf %738, %747 : vector<2x32xf32>
    %749 = arith.addf %746, %748 : vector<2x32xf32>
    %750 = vector.extract_strided_slice %720 {offsets = [0, 0], sizes = [2, 32], strides = [1, 1]} : vector<2x96xf32> to vector<2x32xf32>
    %751 = vector.extract_strided_slice %722 {offsets = [0, 0], sizes = [2, 32], strides = [1, 1]} : vector<2x96xf32> to vector<2x32xf32>
    %752 = arith.addf %750, %751 : vector<2x32xf32>
    %753 = arith.negf %752 : vector<2x32xf32>
    %754 = math.exp %753 : vector<2x32xf32>
    %cst_101 = arith.constant 1.000000e+00 : f32
    %755 = vector.broadcast %cst_101 : f32 to vector<2x32xf32>
    %756 = arith.addf %755, %754 : vector<2x32xf32>
    %757 = arith.divf %755, %756 : vector<2x32xf32>
    %758 = vector.extract_strided_slice %720 {offsets = [0, 32], sizes = [2, 32], strides = [1, 1]} : vector<2x96xf32> to vector<2x32xf32>
    %759 = vector.extract_strided_slice %722 {offsets = [0, 32], sizes = [2, 32], strides = [1, 1]} : vector<2x96xf32> to vector<2x32xf32>
    %760 = arith.addf %758, %759 : vector<2x32xf32>
    %761 = arith.negf %760 : vector<2x32xf32>
    %762 = math.exp %761 : vector<2x32xf32>
    %cst_102 = arith.constant 1.000000e+00 : f32
    %763 = vector.broadcast %cst_102 : f32 to vector<2x32xf32>
    %764 = arith.addf %763, %762 : vector<2x32xf32>
    %765 = arith.divf %763, %764 : vector<2x32xf32>
    %766 = vector.extract_strided_slice %720 {offsets = [0, 64], sizes = [2, 32], strides = [1, 1]} : vector<2x96xf32> to vector<2x32xf32>
    %767 = vector.extract_strided_slice %722 {offsets = [0, 64], sizes = [2, 32], strides = [1, 1]} : vector<2x96xf32> to vector<2x32xf32>
    %768 = arith.mulf %757, %767 : vector<2x32xf32>
    %769 = arith.addf %766, %768 : vector<2x32xf32>
    %770 = math.tanh %769 : vector<2x32xf32>
    %cst_103 = arith.constant 1.000000e+00 : f32
    %771 = vector.broadcast %cst_103 : f32 to vector<2x32xf32>
    %772 = arith.subf %771, %765 : vector<2x32xf32>
    %773 = arith.mulf %772, %770 : vector<2x32xf32>
    %774 = vector.extract_strided_slice %715 {offsets = [0, 32], sizes = [2, 32], strides = [1, 1]} : vector<2x64xf32> to vector<2x32xf32>
    %775 = arith.mulf %765, %774 : vector<2x32xf32>
    %776 = arith.addf %773, %775 : vector<2x32xf32>
    %777 = tpu.concatenate %749, %776 in 1 : vector<2x32xf32>, vector<2x32xf32> -> vector<2x64xf32>
    %cst_104 = arith.constant dense<0.000000e+00> : vector<2x192xf32>
    %778 = tpu.matmul %777, %523, %cst_104 {dimension_numbers = #tpu.dot_dimension_numbers<[1], [0], [0], [1], [0, 0, 1, 1], [], []>} : vector<2x64xf32>, vector<64x192xf32>, vector<2x192xf32> -> vector<2x192xf32>
    %779 = vector.broadcast %525 : vector<1x192xf32> to vector<2x192xf32>
    %780 = arith.addf %778, %779 : vector<2x192xf32>
    %781 = vector.extract_strided_slice %528 {offsets = [8, 0], sizes = [2, 96], strides = [1, 1]} : vector<16x192xf32> to vector<2x96xf32>
    %782 = vector.extract_strided_slice %528 {offsets = [6, 96], sizes = [2, 96], strides = [1, 1]} : vector<16x192xf32> to vector<2x96xf32>
    %783 = vector.extract_strided_slice %780 {offsets = [0, 0], sizes = [2, 96], strides = [1, 1]} : vector<2x192xf32> to vector<2x96xf32>
    %784 = vector.extract_strided_slice %780 {offsets = [0, 96], sizes = [2, 96], strides = [1, 1]} : vector<2x192xf32> to vector<2x96xf32>
    %785 = vector.extract_strided_slice %781 {offsets = [0, 0], sizes = [2, 32], strides = [1, 1]} : vector<2x96xf32> to vector<2x32xf32>
    %786 = vector.extract_strided_slice %783 {offsets = [0, 0], sizes = [2, 32], strides = [1, 1]} : vector<2x96xf32> to vector<2x32xf32>
    %787 = arith.addf %785, %786 : vector<2x32xf32>
    %788 = arith.negf %787 : vector<2x32xf32>
    %789 = math.exp %788 : vector<2x32xf32>
    %cst_105 = arith.constant 1.000000e+00 : f32
    %790 = vector.broadcast %cst_105 : f32 to vector<2x32xf32>
    %791 = arith.addf %790, %789 : vector<2x32xf32>
    %792 = arith.divf %790, %791 : vector<2x32xf32>
    %793 = vector.extract_strided_slice %781 {offsets = [0, 32], sizes = [2, 32], strides = [1, 1]} : vector<2x96xf32> to vector<2x32xf32>
    %794 = vector.extract_strided_slice %783 {offsets = [0, 32], sizes = [2, 32], strides = [1, 1]} : vector<2x96xf32> to vector<2x32xf32>
    %795 = arith.addf %793, %794 : vector<2x32xf32>
    %796 = arith.negf %795 : vector<2x32xf32>
    %797 = math.exp %796 : vector<2x32xf32>
    %cst_106 = arith.constant 1.000000e+00 : f32
    %798 = vector.broadcast %cst_106 : f32 to vector<2x32xf32>
    %799 = arith.addf %798, %797 : vector<2x32xf32>
    %800 = arith.divf %798, %799 : vector<2x32xf32>
    %801 = vector.extract_strided_slice %781 {offsets = [0, 64], sizes = [2, 32], strides = [1, 1]} : vector<2x96xf32> to vector<2x32xf32>
    %802 = vector.extract_strided_slice %783 {offsets = [0, 64], sizes = [2, 32], strides = [1, 1]} : vector<2x96xf32> to vector<2x32xf32>
    %803 = arith.mulf %792, %802 : vector<2x32xf32>
    %804 = arith.addf %801, %803 : vector<2x32xf32>
    %805 = math.tanh %804 : vector<2x32xf32>
    %cst_107 = arith.constant 1.000000e+00 : f32
    %806 = vector.broadcast %cst_107 : f32 to vector<2x32xf32>
    %807 = arith.subf %806, %800 : vector<2x32xf32>
    %808 = arith.mulf %807, %805 : vector<2x32xf32>
    %809 = vector.extract_strided_slice %777 {offsets = [0, 0], sizes = [2, 32], strides = [1, 1]} : vector<2x64xf32> to vector<2x32xf32>
    %810 = arith.mulf %800, %809 : vector<2x32xf32>
    %811 = arith.addf %808, %810 : vector<2x32xf32>
    %812 = vector.extract_strided_slice %782 {offsets = [0, 0], sizes = [2, 32], strides = [1, 1]} : vector<2x96xf32> to vector<2x32xf32>
    %813 = vector.extract_strided_slice %784 {offsets = [0, 0], sizes = [2, 32], strides = [1, 1]} : vector<2x96xf32> to vector<2x32xf32>
    %814 = arith.addf %812, %813 : vector<2x32xf32>
    %815 = arith.negf %814 : vector<2x32xf32>
    %816 = math.exp %815 : vector<2x32xf32>
    %cst_108 = arith.constant 1.000000e+00 : f32
    %817 = vector.broadcast %cst_108 : f32 to vector<2x32xf32>
    %818 = arith.addf %817, %816 : vector<2x32xf32>
    %819 = arith.divf %817, %818 : vector<2x32xf32>
    %820 = vector.extract_strided_slice %782 {offsets = [0, 32], sizes = [2, 32], strides = [1, 1]} : vector<2x96xf32> to vector<2x32xf32>
    %821 = vector.extract_strided_slice %784 {offsets = [0, 32], sizes = [2, 32], strides = [1, 1]} : vector<2x96xf32> to vector<2x32xf32>
    %822 = arith.addf %820, %821 : vector<2x32xf32>
    %823 = arith.negf %822 : vector<2x32xf32>
    %824 = math.exp %823 : vector<2x32xf32>
    %cst_109 = arith.constant 1.000000e+00 : f32
    %825 = vector.broadcast %cst_109 : f32 to vector<2x32xf32>
    %826 = arith.addf %825, %824 : vector<2x32xf32>
    %827 = arith.divf %825, %826 : vector<2x32xf32>
    %828 = vector.extract_strided_slice %782 {offsets = [0, 64], sizes = [2, 32], strides = [1, 1]} : vector<2x96xf32> to vector<2x32xf32>
    %829 = vector.extract_strided_slice %784 {offsets = [0, 64], sizes = [2, 32], strides = [1, 1]} : vector<2x96xf32> to vector<2x32xf32>
    %830 = arith.mulf %819, %829 : vector<2x32xf32>
    %831 = arith.addf %828, %830 : vector<2x32xf32>
    %832 = math.tanh %831 : vector<2x32xf32>
    %cst_110 = arith.constant 1.000000e+00 : f32
    %833 = vector.broadcast %cst_110 : f32 to vector<2x32xf32>
    %834 = arith.subf %833, %827 : vector<2x32xf32>
    %835 = arith.mulf %834, %832 : vector<2x32xf32>
    %836 = vector.extract_strided_slice %777 {offsets = [0, 32], sizes = [2, 32], strides = [1, 1]} : vector<2x64xf32> to vector<2x32xf32>
    %837 = arith.mulf %827, %836 : vector<2x32xf32>
    %838 = arith.addf %835, %837 : vector<2x32xf32>
    %839 = tpu.concatenate %811, %838 in 1 : vector<2x32xf32>, vector<2x32xf32> -> vector<2x64xf32>
    %cst_111 = arith.constant dense<0.000000e+00> : vector<2x192xf32>
    %840 = tpu.matmul %839, %523, %cst_111 {dimension_numbers = #tpu.dot_dimension_numbers<[1], [0], [0], [1], [0, 0, 1, 1], [], []>} : vector<2x64xf32>, vector<64x192xf32>, vector<2x192xf32> -> vector<2x192xf32>
    %841 = vector.broadcast %525 : vector<1x192xf32> to vector<2x192xf32>
    %842 = arith.addf %840, %841 : vector<2x192xf32>
    %843 = vector.extract_strided_slice %528 {offsets = [10, 0], sizes = [2, 96], strides = [1, 1]} : vector<16x192xf32> to vector<2x96xf32>
    %844 = vector.extract_strided_slice %528 {offsets = [4, 96], sizes = [2, 96], strides = [1, 1]} : vector<16x192xf32> to vector<2x96xf32>
    %845 = vector.extract_strided_slice %842 {offsets = [0, 0], sizes = [2, 96], strides = [1, 1]} : vector<2x192xf32> to vector<2x96xf32>
    %846 = vector.extract_strided_slice %842 {offsets = [0, 96], sizes = [2, 96], strides = [1, 1]} : vector<2x192xf32> to vector<2x96xf32>
    %847 = vector.extract_strided_slice %843 {offsets = [0, 0], sizes = [2, 32], strides = [1, 1]} : vector<2x96xf32> to vector<2x32xf32>
    %848 = vector.extract_strided_slice %845 {offsets = [0, 0], sizes = [2, 32], strides = [1, 1]} : vector<2x96xf32> to vector<2x32xf32>
    %849 = arith.addf %847, %848 : vector<2x32xf32>
    %850 = arith.negf %849 : vector<2x32xf32>
    %851 = math.exp %850 : vector<2x32xf32>
    %cst_112 = arith.constant 1.000000e+00 : f32
    %852 = vector.broadcast %cst_112 : f32 to vector<2x32xf32>
    %853 = arith.addf %852, %851 : vector<2x32xf32>
    %854 = arith.divf %852, %853 : vector<2x32xf32>
    %855 = vector.extract_strided_slice %843 {offsets = [0, 32], sizes = [2, 32], strides = [1, 1]} : vector<2x96xf32> to vector<2x32xf32>
    %856 = vector.extract_strided_slice %845 {offsets = [0, 32], sizes = [2, 32], strides = [1, 1]} : vector<2x96xf32> to vector<2x32xf32>
    %857 = arith.addf %855, %856 : vector<2x32xf32>
    %858 = arith.negf %857 : vector<2x32xf32>
    %859 = math.exp %858 : vector<2x32xf32>
    %cst_113 = arith.constant 1.000000e+00 : f32
    %860 = vector.broadcast %cst_113 : f32 to vector<2x32xf32>
    %861 = arith.addf %860, %859 : vector<2x32xf32>
    %862 = arith.divf %860, %861 : vector<2x32xf32>
    %863 = vector.extract_strided_slice %843 {offsets = [0, 64], sizes = [2, 32], strides = [1, 1]} : vector<2x96xf32> to vector<2x32xf32>
    %864 = vector.extract_strided_slice %845 {offsets = [0, 64], sizes = [2, 32], strides = [1, 1]} : vector<2x96xf32> to vector<2x32xf32>
    %865 = arith.mulf %854, %864 : vector<2x32xf32>
    %866 = arith.addf %863, %865 : vector<2x32xf32>
    %867 = math.tanh %866 : vector<2x32xf32>
    %cst_114 = arith.constant 1.000000e+00 : f32
    %868 = vector.broadcast %cst_114 : f32 to vector<2x32xf32>
    %869 = arith.subf %868, %862 : vector<2x32xf32>
    %870 = arith.mulf %869, %867 : vector<2x32xf32>
    %871 = vector.extract_strided_slice %839 {offsets = [0, 0], sizes = [2, 32], strides = [1, 1]} : vector<2x64xf32> to vector<2x32xf32>
    %872 = arith.mulf %862, %871 : vector<2x32xf32>
    %873 = arith.addf %870, %872 : vector<2x32xf32>
    %874 = vector.extract_strided_slice %844 {offsets = [0, 0], sizes = [2, 32], strides = [1, 1]} : vector<2x96xf32> to vector<2x32xf32>
    %875 = vector.extract_strided_slice %846 {offsets = [0, 0], sizes = [2, 32], strides = [1, 1]} : vector<2x96xf32> to vector<2x32xf32>
    %876 = arith.addf %874, %875 : vector<2x32xf32>
    %877 = arith.negf %876 : vector<2x32xf32>
    %878 = math.exp %877 : vector<2x32xf32>
    %cst_115 = arith.constant 1.000000e+00 : f32
    %879 = vector.broadcast %cst_115 : f32 to vector<2x32xf32>
    %880 = arith.addf %879, %878 : vector<2x32xf32>
    %881 = arith.divf %879, %880 : vector<2x32xf32>
    %882 = vector.extract_strided_slice %844 {offsets = [0, 32], sizes = [2, 32], strides = [1, 1]} : vector<2x96xf32> to vector<2x32xf32>
    %883 = vector.extract_strided_slice %846 {offsets = [0, 32], sizes = [2, 32], strides = [1, 1]} : vector<2x96xf32> to vector<2x32xf32>
    %884 = arith.addf %882, %883 : vector<2x32xf32>
    %885 = arith.negf %884 : vector<2x32xf32>
    %886 = math.exp %885 : vector<2x32xf32>
    %cst_116 = arith.constant 1.000000e+00 : f32
    %887 = vector.broadcast %cst_116 : f32 to vector<2x32xf32>
    %888 = arith.addf %887, %886 : vector<2x32xf32>
    %889 = arith.divf %887, %888 : vector<2x32xf32>
    %890 = vector.extract_strided_slice %844 {offsets = [0, 64], sizes = [2, 32], strides = [1, 1]} : vector<2x96xf32> to vector<2x32xf32>
    %891 = vector.extract_strided_slice %846 {offsets = [0, 64], sizes = [2, 32], strides = [1, 1]} : vector<2x96xf32> to vector<2x32xf32>
    %892 = arith.mulf %881, %891 : vector<2x32xf32>
    %893 = arith.addf %890, %892 : vector<2x32xf32>
    %894 = math.tanh %893 : vector<2x32xf32>
    %cst_117 = arith.constant 1.000000e+00 : f32
    %895 = vector.broadcast %cst_117 : f32 to vector<2x32xf32>
    %896 = arith.subf %895, %889 : vector<2x32xf32>
    %897 = arith.mulf %896, %894 : vector<2x32xf32>
    %898 = vector.extract_strided_slice %839 {offsets = [0, 32], sizes = [2, 32], strides = [1, 1]} : vector<2x64xf32> to vector<2x32xf32>
    %899 = arith.mulf %889, %898 : vector<2x32xf32>
    %900 = arith.addf %897, %899 : vector<2x32xf32>
    %901 = tpu.concatenate %873, %900 in 1 : vector<2x32xf32>, vector<2x32xf32> -> vector<2x64xf32>
    %cst_118 = arith.constant dense<0.000000e+00> : vector<2x192xf32>
    %902 = tpu.matmul %901, %523, %cst_118 {dimension_numbers = #tpu.dot_dimension_numbers<[1], [0], [0], [1], [0, 0, 1, 1], [], []>} : vector<2x64xf32>, vector<64x192xf32>, vector<2x192xf32> -> vector<2x192xf32>
    %903 = vector.broadcast %525 : vector<1x192xf32> to vector<2x192xf32>
    %904 = arith.addf %902, %903 : vector<2x192xf32>
    %905 = vector.extract_strided_slice %528 {offsets = [12, 0], sizes = [2, 96], strides = [1, 1]} : vector<16x192xf32> to vector<2x96xf32>
    %906 = vector.extract_strided_slice %528 {offsets = [2, 96], sizes = [2, 96], strides = [1, 1]} : vector<16x192xf32> to vector<2x96xf32>
    %907 = vector.extract_strided_slice %904 {offsets = [0, 0], sizes = [2, 96], strides = [1, 1]} : vector<2x192xf32> to vector<2x96xf32>
    %908 = vector.extract_strided_slice %904 {offsets = [0, 96], sizes = [2, 96], strides = [1, 1]} : vector<2x192xf32> to vector<2x96xf32>
    %909 = vector.extract_strided_slice %905 {offsets = [0, 0], sizes = [2, 32], strides = [1, 1]} : vector<2x96xf32> to vector<2x32xf32>
    %910 = vector.extract_strided_slice %907 {offsets = [0, 0], sizes = [2, 32], strides = [1, 1]} : vector<2x96xf32> to vector<2x32xf32>
    %911 = arith.addf %909, %910 : vector<2x32xf32>
    %912 = arith.negf %911 : vector<2x32xf32>
    %913 = math.exp %912 : vector<2x32xf32>
    %cst_119 = arith.constant 1.000000e+00 : f32
    %914 = vector.broadcast %cst_119 : f32 to vector<2x32xf32>
    %915 = arith.addf %914, %913 : vector<2x32xf32>
    %916 = arith.divf %914, %915 : vector<2x32xf32>
    %917 = vector.extract_strided_slice %905 {offsets = [0, 32], sizes = [2, 32], strides = [1, 1]} : vector<2x96xf32> to vector<2x32xf32>
    %918 = vector.extract_strided_slice %907 {offsets = [0, 32], sizes = [2, 32], strides = [1, 1]} : vector<2x96xf32> to vector<2x32xf32>
    %919 = arith.addf %917, %918 : vector<2x32xf32>
    %920 = arith.negf %919 : vector<2x32xf32>
    %921 = math.exp %920 : vector<2x32xf32>
    %cst_120 = arith.constant 1.000000e+00 : f32
    %922 = vector.broadcast %cst_120 : f32 to vector<2x32xf32>
    %923 = arith.addf %922, %921 : vector<2x32xf32>
    %924 = arith.divf %922, %923 : vector<2x32xf32>
    %925 = vector.extract_strided_slice %905 {offsets = [0, 64], sizes = [2, 32], strides = [1, 1]} : vector<2x96xf32> to vector<2x32xf32>
    %926 = vector.extract_strided_slice %907 {offsets = [0, 64], sizes = [2, 32], strides = [1, 1]} : vector<2x96xf32> to vector<2x32xf32>
    %927 = arith.mulf %916, %926 : vector<2x32xf32>
    %928 = arith.addf %925, %927 : vector<2x32xf32>
    %929 = math.tanh %928 : vector<2x32xf32>
    %cst_121 = arith.constant 1.000000e+00 : f32
    %930 = vector.broadcast %cst_121 : f32 to vector<2x32xf32>
    %931 = arith.subf %930, %924 : vector<2x32xf32>
    %932 = arith.mulf %931, %929 : vector<2x32xf32>
    %933 = vector.extract_strided_slice %901 {offsets = [0, 0], sizes = [2, 32], strides = [1, 1]} : vector<2x64xf32> to vector<2x32xf32>
    %934 = arith.mulf %924, %933 : vector<2x32xf32>
    %935 = arith.addf %932, %934 : vector<2x32xf32>
    %936 = vector.extract_strided_slice %906 {offsets = [0, 0], sizes = [2, 32], strides = [1, 1]} : vector<2x96xf32> to vector<2x32xf32>
    %937 = vector.extract_strided_slice %908 {offsets = [0, 0], sizes = [2, 32], strides = [1, 1]} : vector<2x96xf32> to vector<2x32xf32>
    %938 = arith.addf %936, %937 : vector<2x32xf32>
    %939 = arith.negf %938 : vector<2x32xf32>
    %940 = math.exp %939 : vector<2x32xf32>
    %cst_122 = arith.constant 1.000000e+00 : f32
    %941 = vector.broadcast %cst_122 : f32 to vector<2x32xf32>
    %942 = arith.addf %941, %940 : vector<2x32xf32>
    %943 = arith.divf %941, %942 : vector<2x32xf32>
    %944 = vector.extract_strided_slice %906 {offsets = [0, 32], sizes = [2, 32], strides = [1, 1]} : vector<2x96xf32> to vector<2x32xf32>
    %945 = vector.extract_strided_slice %908 {offsets = [0, 32], sizes = [2, 32], strides = [1, 1]} : vector<2x96xf32> to vector<2x32xf32>
    %946 = arith.addf %944, %945 : vector<2x32xf32>
    %947 = arith.negf %946 : vector<2x32xf32>
    %948 = math.exp %947 : vector<2x32xf32>
    %cst_123 = arith.constant 1.000000e+00 : f32
    %949 = vector.broadcast %cst_123 : f32 to vector<2x32xf32>
    %950 = arith.addf %949, %948 : vector<2x32xf32>
    %951 = arith.divf %949, %950 : vector<2x32xf32>
    %952 = vector.extract_strided_slice %906 {offsets = [0, 64], sizes = [2, 32], strides = [1, 1]} : vector<2x96xf32> to vector<2x32xf32>
    %953 = vector.extract_strided_slice %908 {offsets = [0, 64], sizes = [2, 32], strides = [1, 1]} : vector<2x96xf32> to vector<2x32xf32>
    %954 = arith.mulf %943, %953 : vector<2x32xf32>
    %955 = arith.addf %952, %954 : vector<2x32xf32>
    %956 = math.tanh %955 : vector<2x32xf32>
    %cst_124 = arith.constant 1.000000e+00 : f32
    %957 = vector.broadcast %cst_124 : f32 to vector<2x32xf32>
    %958 = arith.subf %957, %951 : vector<2x32xf32>
    %959 = arith.mulf %958, %956 : vector<2x32xf32>
    %960 = vector.extract_strided_slice %901 {offsets = [0, 32], sizes = [2, 32], strides = [1, 1]} : vector<2x64xf32> to vector<2x32xf32>
    %961 = arith.mulf %951, %960 : vector<2x32xf32>
    %962 = arith.addf %959, %961 : vector<2x32xf32>
    %963 = tpu.concatenate %935, %962 in 1 : vector<2x32xf32>, vector<2x32xf32> -> vector<2x64xf32>
    %cst_125 = arith.constant dense<0.000000e+00> : vector<2x192xf32>
    %964 = tpu.matmul %963, %523, %cst_125 {dimension_numbers = #tpu.dot_dimension_numbers<[1], [0], [0], [1], [0, 0, 1, 1], [], []>} : vector<2x64xf32>, vector<64x192xf32>, vector<2x192xf32> -> vector<2x192xf32>
    %965 = vector.broadcast %525 : vector<1x192xf32> to vector<2x192xf32>
    %966 = arith.addf %964, %965 : vector<2x192xf32>
    %967 = vector.extract_strided_slice %528 {offsets = [14, 0], sizes = [2, 96], strides = [1, 1]} : vector<16x192xf32> to vector<2x96xf32>
    %968 = vector.extract_strided_slice %528 {offsets = [0, 96], sizes = [2, 96], strides = [1, 1]} : vector<16x192xf32> to vector<2x96xf32>
    %969 = vector.extract_strided_slice %966 {offsets = [0, 0], sizes = [2, 96], strides = [1, 1]} : vector<2x192xf32> to vector<2x96xf32>
    %970 = vector.extract_strided_slice %966 {offsets = [0, 96], sizes = [2, 96], strides = [1, 1]} : vector<2x192xf32> to vector<2x96xf32>
    %971 = vector.extract_strided_slice %967 {offsets = [0, 0], sizes = [2, 32], strides = [1, 1]} : vector<2x96xf32> to vector<2x32xf32>
    %972 = vector.extract_strided_slice %969 {offsets = [0, 0], sizes = [2, 32], strides = [1, 1]} : vector<2x96xf32> to vector<2x32xf32>
    %973 = arith.addf %971, %972 : vector<2x32xf32>
    %974 = arith.negf %973 : vector<2x32xf32>
    %975 = math.exp %974 : vector<2x32xf32>
    %cst_126 = arith.constant 1.000000e+00 : f32
    %976 = vector.broadcast %cst_126 : f32 to vector<2x32xf32>
    %977 = arith.addf %976, %975 : vector<2x32xf32>
    %978 = arith.divf %976, %977 : vector<2x32xf32>
    %979 = vector.extract_strided_slice %967 {offsets = [0, 32], sizes = [2, 32], strides = [1, 1]} : vector<2x96xf32> to vector<2x32xf32>
    %980 = vector.extract_strided_slice %969 {offsets = [0, 32], sizes = [2, 32], strides = [1, 1]} : vector<2x96xf32> to vector<2x32xf32>
    %981 = arith.addf %979, %980 : vector<2x32xf32>
    %982 = arith.negf %981 : vector<2x32xf32>
    %983 = math.exp %982 : vector<2x32xf32>
    %cst_127 = arith.constant 1.000000e+00 : f32
    %984 = vector.broadcast %cst_127 : f32 to vector<2x32xf32>
    %985 = arith.addf %984, %983 : vector<2x32xf32>
    %986 = arith.divf %984, %985 : vector<2x32xf32>
    %987 = vector.extract_strided_slice %967 {offsets = [0, 64], sizes = [2, 32], strides = [1, 1]} : vector<2x96xf32> to vector<2x32xf32>
    %988 = vector.extract_strided_slice %969 {offsets = [0, 64], sizes = [2, 32], strides = [1, 1]} : vector<2x96xf32> to vector<2x32xf32>
    %989 = arith.mulf %978, %988 : vector<2x32xf32>
    %990 = arith.addf %987, %989 : vector<2x32xf32>
    %991 = math.tanh %990 : vector<2x32xf32>
    %cst_128 = arith.constant 1.000000e+00 : f32
    %992 = vector.broadcast %cst_128 : f32 to vector<2x32xf32>
    %993 = arith.subf %992, %986 : vector<2x32xf32>
    %994 = arith.mulf %993, %991 : vector<2x32xf32>
    %995 = vector.extract_strided_slice %963 {offsets = [0, 0], sizes = [2, 32], strides = [1, 1]} : vector<2x64xf32> to vector<2x32xf32>
    %996 = arith.mulf %986, %995 : vector<2x32xf32>
    %997 = arith.addf %994, %996 : vector<2x32xf32>
    %998 = vector.extract_strided_slice %968 {offsets = [0, 0], sizes = [2, 32], strides = [1, 1]} : vector<2x96xf32> to vector<2x32xf32>
    %999 = vector.extract_strided_slice %970 {offsets = [0, 0], sizes = [2, 32], strides = [1, 1]} : vector<2x96xf32> to vector<2x32xf32>
    %1000 = arith.addf %998, %999 : vector<2x32xf32>
    %1001 = arith.negf %1000 : vector<2x32xf32>
    %1002 = math.exp %1001 : vector<2x32xf32>
    %cst_129 = arith.constant 1.000000e+00 : f32
    %1003 = vector.broadcast %cst_129 : f32 to vector<2x32xf32>
    %1004 = arith.addf %1003, %1002 : vector<2x32xf32>
    %1005 = arith.divf %1003, %1004 : vector<2x32xf32>
    %1006 = vector.extract_strided_slice %968 {offsets = [0, 32], sizes = [2, 32], strides = [1, 1]} : vector<2x96xf32> to vector<2x32xf32>
    %1007 = vector.extract_strided_slice %970 {offsets = [0, 32], sizes = [2, 32], strides = [1, 1]} : vector<2x96xf32> to vector<2x32xf32>
    %1008 = arith.addf %1006, %1007 : vector<2x32xf32>
    %1009 = arith.negf %1008 : vector<2x32xf32>
    %1010 = math.exp %1009 : vector<2x32xf32>
    %cst_130 = arith.constant 1.000000e+00 : f32
    %1011 = vector.broadcast %cst_130 : f32 to vector<2x32xf32>
    %1012 = arith.addf %1011, %1010 : vector<2x32xf32>
    %1013 = arith.divf %1011, %1012 : vector<2x32xf32>
    %1014 = vector.extract_strided_slice %968 {offsets = [0, 64], sizes = [2, 32], strides = [1, 1]} : vector<2x96xf32> to vector<2x32xf32>
    %1015 = vector.extract_strided_slice %970 {offsets = [0, 64], sizes = [2, 32], strides = [1, 1]} : vector<2x96xf32> to vector<2x32xf32>
    %1016 = arith.mulf %1005, %1015 : vector<2x32xf32>
    %1017 = arith.addf %1014, %1016 : vector<2x32xf32>
    %1018 = math.tanh %1017 : vector<2x32xf32>
    %cst_131 = arith.constant 1.000000e+00 : f32
    %1019 = vector.broadcast %cst_131 : f32 to vector<2x32xf32>
    %1020 = arith.subf %1019, %1013 : vector<2x32xf32>
    %1021 = arith.mulf %1020, %1018 : vector<2x32xf32>
    %1022 = vector.extract_strided_slice %963 {offsets = [0, 32], sizes = [2, 32], strides = [1, 1]} : vector<2x64xf32> to vector<2x32xf32>
    %1023 = arith.mulf %1013, %1022 : vector<2x32xf32>
    %1024 = arith.addf %1021, %1023 : vector<2x32xf32>
    %1025 = tpu.concatenate %563, %1024 in 1 : vector<2x32xf32>, vector<2x32xf32> -> vector<2x64xf32>
    %1026 = tpu.concatenate %625, %962 in 1 : vector<2x32xf32>, vector<2x32xf32> -> vector<2x64xf32>
    %1027 = tpu.concatenate %687, %900 in 1 : vector<2x32xf32>, vector<2x32xf32> -> vector<2x64xf32>
    %1028 = tpu.concatenate %749, %838 in 1 : vector<2x32xf32>, vector<2x32xf32> -> vector<2x64xf32>
    %1029 = tpu.concatenate %811, %776 in 1 : vector<2x32xf32>, vector<2x32xf32> -> vector<2x64xf32>
    %1030 = tpu.concatenate %873, %714 in 1 : vector<2x32xf32>, vector<2x32xf32> -> vector<2x64xf32>
    %1031 = tpu.concatenate %935, %652 in 1 : vector<2x32xf32>, vector<2x32xf32> -> vector<2x64xf32>
    %1032 = tpu.concatenate %997, %590 in 1 : vector<2x32xf32>, vector<2x32xf32> -> vector<2x64xf32>
    %1033 = tpu.concatenate %1025, %1026, %1027, %1028, %1029, %1030, %1031, %1032 in 0 : vector<2x64xf32>, vector<2x64xf32>, vector<2x64xf32>, vector<2x64xf32>, vector<2x64xf32>, vector<2x64xf32>, vector<2x64xf32>, vector<2x64xf32> -> vector<16x64xf32>
    %c0_132 = arith.constant 0 : index
    %c0_133 = arith.constant 0 : index
    %1034 = vector.load %arg10[%c0_132, %c0_133] : memref<64x192xf32, #tpu.memory_space<vmem>>, vector<64x192xf32>
    %cst_134 = arith.constant dense<0.000000e+00> : vector<16x192xf32>
    %1035 = tpu.matmul %1033, %1034, %cst_134 {dimension_numbers = #tpu.dot_dimension_numbers<[1], [0], [0], [1], [0, 0, 1, 1], [], []>} : vector<16x64xf32>, vector<64x192xf32>, vector<16x192xf32> -> vector<16x192xf32>
    %c0_135 = arith.constant 0 : index
    %c0_136 = arith.constant 0 : index
    %1036 = vector.load %arg11[%c0_135, %c0_136] : memref<1x192xf32, #tpu.memory_space<vmem>>, vector<1x192xf32>
    %1037 = vector.broadcast %1036 : vector<1x192xf32> to vector<16x192xf32>
    %1038 = arith.addf %1035, %1037 : vector<16x192xf32>
    %1039 = vector.extract_strided_slice %1038 {offsets = [0, 0], sizes = [16, 64], strides = [1, 1]} : vector<16x192xf32> to vector<16x64xf32>
    %1040 = vector.extract_strided_slice %1038 {offsets = [0, 64], sizes = [16, 64], strides = [1, 1]} : vector<16x192xf32> to vector<16x64xf32>
    %1041 = vector.extract_strided_slice %1038 {offsets = [0, 128], sizes = [16, 64], strides = [1, 1]} : vector<16x192xf32> to vector<16x64xf32>
    %1042 = tpu.iota {dimensions = array<i32: 0>} : vector<16x16xi32>
    %1043 = tpu.iota {dimensions = array<i32: 1>} : vector<16x16xi32>
    %c2_i32 = arith.constant 2 : i32
    %c0_i32 = arith.constant 0 : i32
    %1044 = arith.cmpi eq, %c2_i32, %c0_i32 : i32
    %c1_i32 = arith.constant 1 : i32
    %1045 = arith.select %1044, %c1_i32, %c2_i32 : i32
    %1046 = vector.broadcast %1045 : i32 to vector<16x16xi32>
    %1047 = arith.remsi %1042, %1046 : vector<16x16xi32>
    %c0_i32_137 = arith.constant 0 : i32
    %1048 = vector.broadcast %c0_i32_137 : i32 to vector<16x16xi32>
    %1049 = arith.cmpi ne, %1047, %1048 : vector<16x16xi32>
    %c0_i32_138 = arith.constant 0 : i32
    %1050 = vector.broadcast %c0_i32_138 : i32 to vector<16x16xi32>
    %1051 = arith.cmpi slt, %1047, %1050 : vector<16x16xi32>
    %c0_i32_139 = arith.constant 0 : i32
    %1052 = arith.cmpi slt, %1045, %c0_i32_139 : i32
    %1053 = vector.broadcast %1052 : i1 to vector<16x16xi1>
    %1054 = vector.broadcast %1053 : vector<16x16xi1> to vector<16x16xi1>
    %1055 = arith.xori %1051, %1054 : vector<16x16xi1>
    %1056 = arith.andi %1055, %1049 : vector<16x16xi1>
    %1057 = vector.broadcast %1045 : i32 to vector<16x16xi32>
    %1058 = arith.addi %1047, %1057 : vector<16x16xi32>
    %1059 = arith.select %1056, %1058, %1047 : vector<16x16xi1>, vector<16x16xi32>
    %c2_i32_140 = arith.constant 2 : i32
    %c0_i32_141 = arith.constant 0 : i32
    %1060 = arith.cmpi eq, %c2_i32_140, %c0_i32_141 : i32
    %c1_i32_142 = arith.constant 1 : i32
    %1061 = arith.select %1060, %c1_i32_142, %c2_i32_140 : i32
    %1062 = vector.broadcast %1061 : i32 to vector<16x16xi32>
    %1063 = arith.remsi %1043, %1062 : vector<16x16xi32>
    %c0_i32_143 = arith.constant 0 : i32
    %1064 = vector.broadcast %c0_i32_143 : i32 to vector<16x16xi32>
    %1065 = arith.cmpi ne, %1063, %1064 : vector<16x16xi32>
    %c0_i32_144 = arith.constant 0 : i32
    %1066 = vector.broadcast %c0_i32_144 : i32 to vector<16x16xi32>
    %1067 = arith.cmpi slt, %1063, %1066 : vector<16x16xi32>
    %c0_i32_145 = arith.constant 0 : i32
    %1068 = arith.cmpi slt, %1061, %c0_i32_145 : i32
    %1069 = vector.broadcast %1068 : i1 to vector<16x16xi1>
    %1070 = vector.broadcast %1069 : vector<16x16xi1> to vector<16x16xi1>
    %1071 = arith.xori %1067, %1070 : vector<16x16xi1>
    %1072 = arith.andi %1071, %1065 : vector<16x16xi1>
    %1073 = vector.broadcast %1061 : i32 to vector<16x16xi32>
    %1074 = arith.addi %1063, %1073 : vector<16x16xi32>
    %1075 = arith.select %1072, %1074, %1063 : vector<16x16xi1>, vector<16x16xi32>
    %1076 = arith.cmpi eq, %1059, %1075 : vector<16x16xi32>
    %cst_146 = arith.constant 0.000000e+00 : f32
    %cst_147 = arith.constant -1.000000e+30 : f32
    %1077 = vector.broadcast %cst_146 : f32 to vector<16x16xf32>
    %1078 = vector.broadcast %cst_147 : f32 to vector<16x16xf32>
    %1079 = arith.select %1076, %1077, %1078 : vector<16x16xi1>, vector<16x16xf32>
    %1080 = vector.extract_strided_slice %1039 {offsets = [0, 0], sizes = [16, 8], strides = [1, 1]} : vector<16x64xf32> to vector<16x8xf32>
    %1081 = vector.extract_strided_slice %1040 {offsets = [0, 0], sizes = [16, 8], strides = [1, 1]} : vector<16x64xf32> to vector<16x8xf32>
    %1082 = vector.extract_strided_slice %1041 {offsets = [0, 0], sizes = [16, 8], strides = [1, 1]} : vector<16x64xf32> to vector<16x8xf32>
    %cst_148 = arith.constant dense<0.000000e+00> : vector<16x16xf32>
    %1083 = tpu.matmul %1080, %1081, %cst_148 {dimension_numbers = #tpu.dot_dimension_numbers<[1], [1], [0], [0], [0, 0, 1, 0], [], []>} : vector<16x8xf32>, vector<16x8xf32>, vector<16x16xf32> -> vector<16x16xf32>
    %1084 = arith.addf %1083, %1079 : vector<16x16xf32>
    %cst_149 = arith.constant dense<0xFF800000> : vector<16xf32>
    %1085 = vector.multi_reduction <maximumf>, %1084, %cst_149 [1] : vector<16x16xf32> to vector<16xf32>
    %1086 = vector.shape_cast %1085 : vector<16xf32> to vector<16x1xf32>
    %1087 = vector.broadcast %1086 : vector<16x1xf32> to vector<16x16xf32>
    %1088 = arith.subf %1084, %1087 : vector<16x16xf32>
    %1089 = math.exp %1088 : vector<16x16xf32>
    %cst_150 = arith.constant dense<0.000000e+00> : vector<16xf32>
    %1090 = vector.multi_reduction <add>, %1089, %cst_150 [1] : vector<16x16xf32> to vector<16xf32>
    %1091 = vector.shape_cast %1090 : vector<16xf32> to vector<16x1xf32>
    %1092 = tpu.reciprocal %1091 {approx = true} : vector<16x1xf32> -> vector<16x1xf32>
    %1093 = vector.broadcast %1092 : vector<16x1xf32> to vector<16x16xf32>
    %1094 = arith.mulf %1089, %1093 : vector<16x16xf32>
    %cst_151 = arith.constant dense<0.000000e+00> : vector<16x8xf32>
    %1095 = tpu.matmul %1094, %1082, %cst_151 {dimension_numbers = #tpu.dot_dimension_numbers<[1], [0], [0], [1], [0, 0, 1, 1], [], []>} : vector<16x16xf32>, vector<16x8xf32>, vector<16x8xf32> -> vector<16x8xf32>
    %1096 = vector.extract_strided_slice %1039 {offsets = [0, 8], sizes = [16, 8], strides = [1, 1]} : vector<16x64xf32> to vector<16x8xf32>
    %1097 = vector.extract_strided_slice %1040 {offsets = [0, 8], sizes = [16, 8], strides = [1, 1]} : vector<16x64xf32> to vector<16x8xf32>
    %1098 = vector.extract_strided_slice %1041 {offsets = [0, 8], sizes = [16, 8], strides = [1, 1]} : vector<16x64xf32> to vector<16x8xf32>
    %cst_152 = arith.constant dense<0.000000e+00> : vector<16x16xf32>
    %1099 = tpu.matmul %1096, %1097, %cst_152 {dimension_numbers = #tpu.dot_dimension_numbers<[1], [1], [0], [0], [0, 0, 1, 0], [], []>} : vector<16x8xf32>, vector<16x8xf32>, vector<16x16xf32> -> vector<16x16xf32>
    %1100 = arith.addf %1099, %1079 : vector<16x16xf32>
    %cst_153 = arith.constant dense<0xFF800000> : vector<16xf32>
    %1101 = vector.multi_reduction <maximumf>, %1100, %cst_153 [1] : vector<16x16xf32> to vector<16xf32>
    %1102 = vector.shape_cast %1101 : vector<16xf32> to vector<16x1xf32>
    %1103 = vector.broadcast %1102 : vector<16x1xf32> to vector<16x16xf32>
    %1104 = arith.subf %1100, %1103 : vector<16x16xf32>
    %1105 = math.exp %1104 : vector<16x16xf32>
    %cst_154 = arith.constant dense<0.000000e+00> : vector<16xf32>
    %1106 = vector.multi_reduction <add>, %1105, %cst_154 [1] : vector<16x16xf32> to vector<16xf32>
    %1107 = vector.shape_cast %1106 : vector<16xf32> to vector<16x1xf32>
    %1108 = tpu.reciprocal %1107 {approx = true} : vector<16x1xf32> -> vector<16x1xf32>
    %1109 = vector.broadcast %1108 : vector<16x1xf32> to vector<16x16xf32>
    %1110 = arith.mulf %1105, %1109 : vector<16x16xf32>
    %cst_155 = arith.constant dense<0.000000e+00> : vector<16x8xf32>
    %1111 = tpu.matmul %1110, %1098, %cst_155 {dimension_numbers = #tpu.dot_dimension_numbers<[1], [0], [0], [1], [0, 0, 1, 1], [], []>} : vector<16x16xf32>, vector<16x8xf32>, vector<16x8xf32> -> vector<16x8xf32>
    %1112 = vector.extract_strided_slice %1039 {offsets = [0, 16], sizes = [16, 8], strides = [1, 1]} : vector<16x64xf32> to vector<16x8xf32>
    %1113 = vector.extract_strided_slice %1040 {offsets = [0, 16], sizes = [16, 8], strides = [1, 1]} : vector<16x64xf32> to vector<16x8xf32>
    %1114 = vector.extract_strided_slice %1041 {offsets = [0, 16], sizes = [16, 8], strides = [1, 1]} : vector<16x64xf32> to vector<16x8xf32>
    %cst_156 = arith.constant dense<0.000000e+00> : vector<16x16xf32>
    %1115 = tpu.matmul %1112, %1113, %cst_156 {dimension_numbers = #tpu.dot_dimension_numbers<[1], [1], [0], [0], [0, 0, 1, 0], [], []>} : vector<16x8xf32>, vector<16x8xf32>, vector<16x16xf32> -> vector<16x16xf32>
    %1116 = arith.addf %1115, %1079 : vector<16x16xf32>
    %cst_157 = arith.constant dense<0xFF800000> : vector<16xf32>
    %1117 = vector.multi_reduction <maximumf>, %1116, %cst_157 [1] : vector<16x16xf32> to vector<16xf32>
    %1118 = vector.shape_cast %1117 : vector<16xf32> to vector<16x1xf32>
    %1119 = vector.broadcast %1118 : vector<16x1xf32> to vector<16x16xf32>
    %1120 = arith.subf %1116, %1119 : vector<16x16xf32>
    %1121 = math.exp %1120 : vector<16x16xf32>
    %cst_158 = arith.constant dense<0.000000e+00> : vector<16xf32>
    %1122 = vector.multi_reduction <add>, %1121, %cst_158 [1] : vector<16x16xf32> to vector<16xf32>
    %1123 = vector.shape_cast %1122 : vector<16xf32> to vector<16x1xf32>
    %1124 = tpu.reciprocal %1123 {approx = true} : vector<16x1xf32> -> vector<16x1xf32>
    %1125 = vector.broadcast %1124 : vector<16x1xf32> to vector<16x16xf32>
    %1126 = arith.mulf %1121, %1125 : vector<16x16xf32>
    %cst_159 = arith.constant dense<0.000000e+00> : vector<16x8xf32>
    %1127 = tpu.matmul %1126, %1114, %cst_159 {dimension_numbers = #tpu.dot_dimension_numbers<[1], [0], [0], [1], [0, 0, 1, 1], [], []>} : vector<16x16xf32>, vector<16x8xf32>, vector<16x8xf32> -> vector<16x8xf32>
    %1128 = vector.extract_strided_slice %1039 {offsets = [0, 24], sizes = [16, 8], strides = [1, 1]} : vector<16x64xf32> to vector<16x8xf32>
    %1129 = vector.extract_strided_slice %1040 {offsets = [0, 24], sizes = [16, 8], strides = [1, 1]} : vector<16x64xf32> to vector<16x8xf32>
    %1130 = vector.extract_strided_slice %1041 {offsets = [0, 24], sizes = [16, 8], strides = [1, 1]} : vector<16x64xf32> to vector<16x8xf32>
    %cst_160 = arith.constant dense<0.000000e+00> : vector<16x16xf32>
    %1131 = tpu.matmul %1128, %1129, %cst_160 {dimension_numbers = #tpu.dot_dimension_numbers<[1], [1], [0], [0], [0, 0, 1, 0], [], []>} : vector<16x8xf32>, vector<16x8xf32>, vector<16x16xf32> -> vector<16x16xf32>
    %1132 = arith.addf %1131, %1079 : vector<16x16xf32>
    %cst_161 = arith.constant dense<0xFF800000> : vector<16xf32>
    %1133 = vector.multi_reduction <maximumf>, %1132, %cst_161 [1] : vector<16x16xf32> to vector<16xf32>
    %1134 = vector.shape_cast %1133 : vector<16xf32> to vector<16x1xf32>
    %1135 = vector.broadcast %1134 : vector<16x1xf32> to vector<16x16xf32>
    %1136 = arith.subf %1132, %1135 : vector<16x16xf32>
    %1137 = math.exp %1136 : vector<16x16xf32>
    %cst_162 = arith.constant dense<0.000000e+00> : vector<16xf32>
    %1138 = vector.multi_reduction <add>, %1137, %cst_162 [1] : vector<16x16xf32> to vector<16xf32>
    %1139 = vector.shape_cast %1138 : vector<16xf32> to vector<16x1xf32>
    %1140 = tpu.reciprocal %1139 {approx = true} : vector<16x1xf32> -> vector<16x1xf32>
    %1141 = vector.broadcast %1140 : vector<16x1xf32> to vector<16x16xf32>
    %1142 = arith.mulf %1137, %1141 : vector<16x16xf32>
    %cst_163 = arith.constant dense<0.000000e+00> : vector<16x8xf32>
    %1143 = tpu.matmul %1142, %1130, %cst_163 {dimension_numbers = #tpu.dot_dimension_numbers<[1], [0], [0], [1], [0, 0, 1, 1], [], []>} : vector<16x16xf32>, vector<16x8xf32>, vector<16x8xf32> -> vector<16x8xf32>
    %1144 = vector.extract_strided_slice %1039 {offsets = [0, 32], sizes = [16, 8], strides = [1, 1]} : vector<16x64xf32> to vector<16x8xf32>
    %1145 = vector.extract_strided_slice %1040 {offsets = [0, 32], sizes = [16, 8], strides = [1, 1]} : vector<16x64xf32> to vector<16x8xf32>
    %1146 = vector.extract_strided_slice %1041 {offsets = [0, 32], sizes = [16, 8], strides = [1, 1]} : vector<16x64xf32> to vector<16x8xf32>
    %cst_164 = arith.constant dense<0.000000e+00> : vector<16x16xf32>
    %1147 = tpu.matmul %1144, %1145, %cst_164 {dimension_numbers = #tpu.dot_dimension_numbers<[1], [1], [0], [0], [0, 0, 1, 0], [], []>} : vector<16x8xf32>, vector<16x8xf32>, vector<16x16xf32> -> vector<16x16xf32>
    %1148 = arith.addf %1147, %1079 : vector<16x16xf32>
    %cst_165 = arith.constant dense<0xFF800000> : vector<16xf32>
    %1149 = vector.multi_reduction <maximumf>, %1148, %cst_165 [1] : vector<16x16xf32> to vector<16xf32>
    %1150 = vector.shape_cast %1149 : vector<16xf32> to vector<16x1xf32>
    %1151 = vector.broadcast %1150 : vector<16x1xf32> to vector<16x16xf32>
    %1152 = arith.subf %1148, %1151 : vector<16x16xf32>
    %1153 = math.exp %1152 : vector<16x16xf32>
    %cst_166 = arith.constant dense<0.000000e+00> : vector<16xf32>
    %1154 = vector.multi_reduction <add>, %1153, %cst_166 [1] : vector<16x16xf32> to vector<16xf32>
    %1155 = vector.shape_cast %1154 : vector<16xf32> to vector<16x1xf32>
    %1156 = tpu.reciprocal %1155 {approx = true} : vector<16x1xf32> -> vector<16x1xf32>
    %1157 = vector.broadcast %1156 : vector<16x1xf32> to vector<16x16xf32>
    %1158 = arith.mulf %1153, %1157 : vector<16x16xf32>
    %cst_167 = arith.constant dense<0.000000e+00> : vector<16x8xf32>
    %1159 = tpu.matmul %1158, %1146, %cst_167 {dimension_numbers = #tpu.dot_dimension_numbers<[1], [0], [0], [1], [0, 0, 1, 1], [], []>} : vector<16x16xf32>, vector<16x8xf32>, vector<16x8xf32> -> vector<16x8xf32>
    %1160 = vector.extract_strided_slice %1039 {offsets = [0, 40], sizes = [16, 8], strides = [1, 1]} : vector<16x64xf32> to vector<16x8xf32>
    %1161 = vector.extract_strided_slice %1040 {offsets = [0, 40], sizes = [16, 8], strides = [1, 1]} : vector<16x64xf32> to vector<16x8xf32>
    %1162 = vector.extract_strided_slice %1041 {offsets = [0, 40], sizes = [16, 8], strides = [1, 1]} : vector<16x64xf32> to vector<16x8xf32>
    %cst_168 = arith.constant dense<0.000000e+00> : vector<16x16xf32>
    %1163 = tpu.matmul %1160, %1161, %cst_168 {dimension_numbers = #tpu.dot_dimension_numbers<[1], [1], [0], [0], [0, 0, 1, 0], [], []>} : vector<16x8xf32>, vector<16x8xf32>, vector<16x16xf32> -> vector<16x16xf32>
    %1164 = arith.addf %1163, %1079 : vector<16x16xf32>
    %cst_169 = arith.constant dense<0xFF800000> : vector<16xf32>
    %1165 = vector.multi_reduction <maximumf>, %1164, %cst_169 [1] : vector<16x16xf32> to vector<16xf32>
    %1166 = vector.shape_cast %1165 : vector<16xf32> to vector<16x1xf32>
    %1167 = vector.broadcast %1166 : vector<16x1xf32> to vector<16x16xf32>
    %1168 = arith.subf %1164, %1167 : vector<16x16xf32>
    %1169 = math.exp %1168 : vector<16x16xf32>
    %cst_170 = arith.constant dense<0.000000e+00> : vector<16xf32>
    %1170 = vector.multi_reduction <add>, %1169, %cst_170 [1] : vector<16x16xf32> to vector<16xf32>
    %1171 = vector.shape_cast %1170 : vector<16xf32> to vector<16x1xf32>
    %1172 = tpu.reciprocal %1171 {approx = true} : vector<16x1xf32> -> vector<16x1xf32>
    %1173 = vector.broadcast %1172 : vector<16x1xf32> to vector<16x16xf32>
    %1174 = arith.mulf %1169, %1173 : vector<16x16xf32>
    %cst_171 = arith.constant dense<0.000000e+00> : vector<16x8xf32>
    %1175 = tpu.matmul %1174, %1162, %cst_171 {dimension_numbers = #tpu.dot_dimension_numbers<[1], [0], [0], [1], [0, 0, 1, 1], [], []>} : vector<16x16xf32>, vector<16x8xf32>, vector<16x8xf32> -> vector<16x8xf32>
    %1176 = vector.extract_strided_slice %1039 {offsets = [0, 48], sizes = [16, 8], strides = [1, 1]} : vector<16x64xf32> to vector<16x8xf32>
    %1177 = vector.extract_strided_slice %1040 {offsets = [0, 48], sizes = [16, 8], strides = [1, 1]} : vector<16x64xf32> to vector<16x8xf32>
    %1178 = vector.extract_strided_slice %1041 {offsets = [0, 48], sizes = [16, 8], strides = [1, 1]} : vector<16x64xf32> to vector<16x8xf32>
    %cst_172 = arith.constant dense<0.000000e+00> : vector<16x16xf32>
    %1179 = tpu.matmul %1176, %1177, %cst_172 {dimension_numbers = #tpu.dot_dimension_numbers<[1], [1], [0], [0], [0, 0, 1, 0], [], []>} : vector<16x8xf32>, vector<16x8xf32>, vector<16x16xf32> -> vector<16x16xf32>
    %1180 = arith.addf %1179, %1079 : vector<16x16xf32>
    %cst_173 = arith.constant dense<0xFF800000> : vector<16xf32>
    %1181 = vector.multi_reduction <maximumf>, %1180, %cst_173 [1] : vector<16x16xf32> to vector<16xf32>
    %1182 = vector.shape_cast %1181 : vector<16xf32> to vector<16x1xf32>
    %1183 = vector.broadcast %1182 : vector<16x1xf32> to vector<16x16xf32>
    %1184 = arith.subf %1180, %1183 : vector<16x16xf32>
    %1185 = math.exp %1184 : vector<16x16xf32>
    %cst_174 = arith.constant dense<0.000000e+00> : vector<16xf32>
    %1186 = vector.multi_reduction <add>, %1185, %cst_174 [1] : vector<16x16xf32> to vector<16xf32>
    %1187 = vector.shape_cast %1186 : vector<16xf32> to vector<16x1xf32>
    %1188 = tpu.reciprocal %1187 {approx = true} : vector<16x1xf32> -> vector<16x1xf32>
    %1189 = vector.broadcast %1188 : vector<16x1xf32> to vector<16x16xf32>
    %1190 = arith.mulf %1185, %1189 : vector<16x16xf32>
    %cst_175 = arith.constant dense<0.000000e+00> : vector<16x8xf32>
    %1191 = tpu.matmul %1190, %1178, %cst_175 {dimension_numbers = #tpu.dot_dimension_numbers<[1], [0], [0], [1], [0, 0, 1, 1], [], []>} : vector<16x16xf32>, vector<16x8xf32>, vector<16x8xf32> -> vector<16x8xf32>
    %1192 = vector.extract_strided_slice %1039 {offsets = [0, 56], sizes = [16, 8], strides = [1, 1]} : vector<16x64xf32> to vector<16x8xf32>
    %1193 = vector.extract_strided_slice %1040 {offsets = [0, 56], sizes = [16, 8], strides = [1, 1]} : vector<16x64xf32> to vector<16x8xf32>
    %1194 = vector.extract_strided_slice %1041 {offsets = [0, 56], sizes = [16, 8], strides = [1, 1]} : vector<16x64xf32> to vector<16x8xf32>
    %cst_176 = arith.constant dense<0.000000e+00> : vector<16x16xf32>
    %1195 = tpu.matmul %1192, %1193, %cst_176 {dimension_numbers = #tpu.dot_dimension_numbers<[1], [1], [0], [0], [0, 0, 1, 0], [], []>} : vector<16x8xf32>, vector<16x8xf32>, vector<16x16xf32> -> vector<16x16xf32>
    %1196 = arith.addf %1195, %1079 : vector<16x16xf32>
    %cst_177 = arith.constant dense<0xFF800000> : vector<16xf32>
    %1197 = vector.multi_reduction <maximumf>, %1196, %cst_177 [1] : vector<16x16xf32> to vector<16xf32>
    %1198 = vector.shape_cast %1197 : vector<16xf32> to vector<16x1xf32>
    %1199 = vector.broadcast %1198 : vector<16x1xf32> to vector<16x16xf32>
    %1200 = arith.subf %1196, %1199 : vector<16x16xf32>
    %1201 = math.exp %1200 : vector<16x16xf32>
    %cst_178 = arith.constant dense<0.000000e+00> : vector<16xf32>
    %1202 = vector.multi_reduction <add>, %1201, %cst_178 [1] : vector<16x16xf32> to vector<16xf32>
    %1203 = vector.shape_cast %1202 : vector<16xf32> to vector<16x1xf32>
    %1204 = tpu.reciprocal %1203 {approx = true} : vector<16x1xf32> -> vector<16x1xf32>
    %1205 = vector.broadcast %1204 : vector<16x1xf32> to vector<16x16xf32>
    %1206 = arith.mulf %1201, %1205 : vector<16x16xf32>
    %cst_179 = arith.constant dense<0.000000e+00> : vector<16x8xf32>
    %1207 = tpu.matmul %1206, %1194, %cst_179 {dimension_numbers = #tpu.dot_dimension_numbers<[1], [0], [0], [1], [0, 0, 1, 1], [], []>} : vector<16x16xf32>, vector<16x8xf32>, vector<16x8xf32> -> vector<16x8xf32>
    %1208 = tpu.concatenate %1095, %1111, %1127, %1143, %1159, %1175, %1191, %1207 in 1 : vector<16x8xf32>, vector<16x8xf32>, vector<16x8xf32>, vector<16x8xf32>, vector<16x8xf32>, vector<16x8xf32>, vector<16x8xf32>, vector<16x8xf32> -> vector<16x64xf32>
    %1209 = tpu.iota {dimensions = array<i32: 0>} : vector<2x16xi32>
    %1210 = tpu.iota {dimensions = array<i32: 1>} : vector<2x16xi32>
    %c2_i32_180 = arith.constant 2 : i32
    %c0_i32_181 = arith.constant 0 : i32
    %1211 = arith.cmpi eq, %c2_i32_180, %c0_i32_181 : i32
    %c1_i32_182 = arith.constant 1 : i32
    %1212 = arith.select %1211, %c1_i32_182, %c2_i32_180 : i32
    %1213 = vector.broadcast %1212 : i32 to vector<2x16xi32>
    %1214 = arith.remsi %1210, %1213 : vector<2x16xi32>
    %c0_i32_183 = arith.constant 0 : i32
    %1215 = vector.broadcast %c0_i32_183 : i32 to vector<2x16xi32>
    %1216 = arith.cmpi ne, %1214, %1215 : vector<2x16xi32>
    %c0_i32_184 = arith.constant 0 : i32
    %1217 = vector.broadcast %c0_i32_184 : i32 to vector<2x16xi32>
    %1218 = arith.cmpi slt, %1214, %1217 : vector<2x16xi32>
    %c0_i32_185 = arith.constant 0 : i32
    %1219 = arith.cmpi slt, %1212, %c0_i32_185 : i32
    %1220 = vector.broadcast %1219 : i1 to vector<2x16xi1>
    %1221 = vector.broadcast %1220 : vector<2x16xi1> to vector<2x16xi1>
    %1222 = arith.xori %1218, %1221 : vector<2x16xi1>
    %1223 = arith.andi %1222, %1216 : vector<2x16xi1>
    %1224 = vector.broadcast %1212 : i32 to vector<2x16xi32>
    %1225 = arith.addi %1214, %1224 : vector<2x16xi32>
    %1226 = arith.select %1223, %1225, %1214 : vector<2x16xi1>, vector<2x16xi32>
    %1227 = arith.cmpi eq, %1209, %1226 : vector<2x16xi32>
    %cst_186 = arith.constant 1.250000e-01 : f32
    %cst_187 = arith.constant 0.000000e+00 : f32
    %1228 = vector.broadcast %cst_186 : f32 to vector<2x16xf32>
    %1229 = vector.broadcast %cst_187 : f32 to vector<2x16xf32>
    %1230 = arith.select %1227, %1228, %1229 : vector<2x16xi1>, vector<2x16xf32>
    %cst_188 = arith.constant dense<0.000000e+00> : vector<2x64xf32>
    %1231 = tpu.matmul %1230, %1208, %cst_188 {dimension_numbers = #tpu.dot_dimension_numbers<[1], [0], [0], [1], [0, 0, 1, 1], [], []>} : vector<2x16xf32>, vector<16x64xf32>, vector<2x64xf32> -> vector<2x64xf32>
    %c0_189 = arith.constant 0 : index
    %c0_190 = arith.constant 0 : index
    %1232 = vector.load %arg12[%c0_189, %c0_190] : memref<64x64xf32, #tpu.memory_space<vmem>>, vector<64x64xf32>
    %cst_191 = arith.constant dense<0.000000e+00> : vector<2x64xf32>
    %1233 = tpu.matmul %1231, %1232, %cst_191 {dimension_numbers = #tpu.dot_dimension_numbers<[1], [0], [0], [1], [0, 0, 1, 1], [], []>} : vector<2x64xf32>, vector<64x64xf32>, vector<2x64xf32> -> vector<2x64xf32>
    %c0_192 = arith.constant 0 : index
    %c0_193 = arith.constant 0 : index
    %1234 = vector.load %arg13[%c0_192, %c0_193] : memref<1x64xf32, #tpu.memory_space<vmem>>, vector<1x64xf32>
    %1235 = vector.broadcast %1234 : vector<1x64xf32> to vector<2x64xf32>
    %1236 = arith.addf %1233, %1235 : vector<2x64xf32>
    %c0_194 = arith.constant 0 : index
    %c0_195 = arith.constant 0 : index
    %1237 = vector.load %arg14[%c0_194, %c0_195] : memref<64x32xf32, #tpu.memory_space<vmem>>, vector<64x32xf32>
    %cst_196 = arith.constant dense<0.000000e+00> : vector<2x32xf32>
    %1238 = tpu.matmul %1236, %1237, %cst_196 {dimension_numbers = #tpu.dot_dimension_numbers<[1], [0], [0], [1], [0, 0, 1, 1], [], []>} : vector<2x64xf32>, vector<64x32xf32>, vector<2x32xf32> -> vector<2x32xf32>
    %c0_197 = arith.constant 0 : index
    %c0_198 = arith.constant 0 : index
    %1239 = vector.load %arg15[%c0_197, %c0_198] : memref<1x32xf32, #tpu.memory_space<vmem>>, vector<1x32xf32>
    %1240 = vector.broadcast %1239 : vector<1x32xf32> to vector<2x32xf32>
    %1241 = arith.addf %1238, %1240 : vector<2x32xf32>
    %cst_199 = arith.constant 0.000000e+00 : f32
    %1242 = vector.broadcast %cst_199 : f32 to vector<2x32xf32>
    %1243 = arith.maximumf %1241, %1242 : vector<2x32xf32>
    %c0_200 = arith.constant 0 : index
    %c0_201 = arith.constant 0 : index
    %1244 = vector.load %arg16[%c0_200, %c0_201] : memref<32x32xf32, #tpu.memory_space<vmem>>, vector<32x32xf32>
    %cst_202 = arith.constant dense<0.000000e+00> : vector<2x32xf32>
    %1245 = tpu.matmul %1243, %1244, %cst_202 {dimension_numbers = #tpu.dot_dimension_numbers<[1], [0], [0], [1], [0, 0, 1, 1], [], []>} : vector<2x32xf32>, vector<32x32xf32>, vector<2x32xf32> -> vector<2x32xf32>
    %c0_203 = arith.constant 0 : index
    %c0_204 = arith.constant 0 : index
    %1246 = vector.load %arg17[%c0_203, %c0_204] : memref<1x32xf32, #tpu.memory_space<vmem>>, vector<1x32xf32>
    %1247 = vector.broadcast %1246 : vector<1x32xf32> to vector<2x32xf32>
    %1248 = arith.addf %1245, %1247 : vector<2x32xf32>
    %cst_205 = arith.constant 0.000000e+00 : f32
    %1249 = vector.broadcast %cst_205 : f32 to vector<2x32xf32>
    %1250 = arith.maximumf %1248, %1249 : vector<2x32xf32>
    %c0_206 = arith.constant 0 : index
    %c0_207 = arith.constant 0 : index
    %1251 = vector.load %arg18[%c0_206, %c0_207] : memref<1x32xf32, #tpu.memory_space<vmem>>, vector<1x32xf32>
    %1252 = vector.broadcast %1251 : vector<1x32xf32> to vector<2x32xf32>
    %1253 = arith.mulf %1250, %1252 : vector<2x32xf32>
    %cst_208 = arith.constant dense<0.000000e+00> : vector<2xf32>
    %1254 = vector.multi_reduction <add>, %1253, %cst_208 [1] : vector<2x32xf32> to vector<2xf32>
    %1255 = vector.shape_cast %1254 : vector<2xf32> to vector<2x1xf32>
    %c0_209 = arith.constant 0 : index
    %c0_210 = arith.constant 0 : index
    %1256 = vector.load %arg19[%c0_209, %c0_210] : memref<1x1xf32, #tpu.memory_space<vmem>>, vector<1x1xf32>
    %1257 = vector.broadcast %1256 : vector<1x1xf32> to vector<2x1xf32>
    %1258 = arith.addf %1255, %1257 : vector<2x1xf32>
    %c0_211 = arith.constant 0 : index
    %c0_212 = arith.constant 0 : index
    %1259 = vector.load %arg20[%c0_211, %c0_212] : memref<2x1xf32, #tpu.memory_space<vmem>>, vector<2x1xf32>
    tpu.vector_store %arg20[%c0_211, %c0_212], %1258 {strides = array<i32>} : memref<2x1xf32, #tpu.memory_space<vmem>>, vector<2x1xf32>,
    return
  }
  func.func @transform_0(%arg0: i32) -> (i32, i32) {
    %c0_i32 = arith.constant 0 : i32
    %c0_i32_0 = arith.constant 0 : i32
    %c0_i32_1 = arith.constant 0 : i32
    return %c0_i32, %c0_i32_0 : i32, i32
  }
  func.func @transform_1(%arg0: i32) -> (i32, i32) {
    %c0_i32 = arith.constant 0 : i32
    %c0_i32_0 = arith.constant 0 : i32
    %c0_i32_1 = arith.constant 0 : i32
    return %c0_i32, %c0_i32_0 : i32, i32
  }
  func.func @transform_2(%arg0: i32) -> (i32, i32) {
    %c0_i32 = arith.constant 0 : i32
    %c0_i32_0 = arith.constant 0 : i32
    %c0_i32_1 = arith.constant 0 : i32
    return %c0_i32, %c0_i32_0 : i32, i32
  }
  func.func @transform_3(%arg0: i32) -> (i32, i32) {
    %c0_i32 = arith.constant 0 : i32
    %c0_i32_0 = arith.constant 0 : i32
    %c0_i32_1 = arith.constant 0 : i32
    return %c0_i32, %c0_i32_0 : i32, i32
  }
  func.func @transform_4(%arg0: i32) -> (i32, i32) {
    %c0_i32 = arith.constant 0 : i32
    %c0_i32_0 = arith.constant 0 : i32
    %c0_i32_1 = arith.constant 0 : i32
    return %c0_i32, %c0_i32_0 : i32, i32
  }
  func.func @transform_5(%arg0: i32) -> (i32, i32) {
    %c0_i32 = arith.constant 0 : i32
    %c0_i32_0 = arith.constant 0 : i32
    %c0_i32_1 = arith.constant 0 : i32
    return %c0_i32, %c0_i32_0 : i32, i32
  }
  func.func @transform_6(%arg0: i32) -> (i32, i32) {
    %c0_i32 = arith.constant 0 : i32
    %c0_i32_0 = arith.constant 0 : i32
    %c0_i32_1 = arith.constant 0 : i32
    return %c0_i32, %c0_i32_0 : i32, i32
  }
  func.func @transform_7(%arg0: i32) -> (i32, i32) {
    %c0_i32 = arith.constant 0 : i32
    %c0_i32_0 = arith.constant 0 : i32
    %c0_i32_1 = arith.constant 0 : i32
    return %c0_i32, %c0_i32_0 : i32, i32
  }
  func.func @transform_8(%arg0: i32) -> (i32, i32) {
    %c0_i32 = arith.constant 0 : i32
    %c0_i32_0 = arith.constant 0 : i32
    %c0_i32_1 = arith.constant 0 : i32
    return %c0_i32, %c0_i32_0 : i32, i32
  }
  func.func @transform_9(%arg0: i32) -> (i32, i32) {
    %c0_i32 = arith.constant 0 : i32
    %c0_i32_0 = arith.constant 0 : i32
    %c0_i32_1 = arith.constant 0 : i32
    return %c0_i32, %c0_i32_0 : i32, i32
  }
  func.func @transform_10(%arg0: i32) -> (i32, i32) {
    %c0_i32 = arith.constant 0 : i32
    %c0_i32_0 = arith.constant 0 : i32
    %c0_i32_1 = arith.constant 0 : i32
    return %c0_i32, %c0_i32_0 : i32, i32
  }
  func.func @transform_11(%arg0: i32) -> (i32, i32) {
    %c0_i32 = arith.constant 0 : i32
    %c0_i32_0 = arith.constant 0 : i32
    %c0_i32_1 = arith.constant 0 : i32
    return %c0_i32, %c0_i32_0 : i32, i32
  }
  func.func @transform_12(%arg0: i32) -> (i32, i32) {
    %c0_i32 = arith.constant 0 : i32
    %c0_i32_0 = arith.constant 0 : i32
    %c0_i32_1 = arith.constant 0 : i32
    return %c0_i32, %c0_i32_0 : i32, i32
  }
  func.func @transform_13(%arg0: i32) -> (i32, i32) {
    %c0_i32 = arith.constant 0 : i32
    %c0_i32_0 = arith.constant 0 : i32
    %c0_i32_1 = arith.constant 0 : i32
    return %c0_i32, %c0_i32_0 : i32, i32
  }
  func.func @transform_14(%arg0: i32) -> (i32, i32) {
    %c0_i32 = arith.constant 0 : i32
    %c0_i32_0 = arith.constant 0 : i32
    %c0_i32_1 = arith.constant 0 : i32
    return %c0_i32, %c0_i32_0 : i32, i32
  }
  func.func @transform_15(%arg0: i32) -> (i32, i32) {
    %c0_i32 = arith.constant 0 : i32
    %c0_i32_0 = arith.constant 0 : i32
    %c0_i32_1 = arith.constant 0 : i32
    return %c0_i32, %c0_i32_0 : i32, i32
  }
  func.func @transform_16(%arg0: i32) -> (i32, i32) {
    %c0_i32 = arith.constant 0 : i32
    %c0_i32_0 = arith.constant 0 : i32
    %c0_i32_1 = arith.constant 0 : i32
    return %c0_i32, %c0_i32_0 : i32, i32
  }
  func.func @transform_17(%arg0: i32) -> (i32, i32) {
    %c0_i32 = arith.constant 0 : i32
    %c0_i32_0 = arith.constant 0 : i32
    %c0_i32_1 = arith.constant 0 : i32
    return %c0_i32, %c0_i32_0 : i32, i32
  }
  func.func @transform_18(%arg0: i32) -> (i32, i32) {
    %c0_i32 = arith.constant 0 : i32
    %c0_i32_0 = arith.constant 0 : i32
    %c0_i32_1 = arith.constant 0 : i32
    return %c0_i32, %c0_i32_0 : i32, i32
  }
  func.func @transform_19(%arg0: i32) -> (i32, i32) {
    %c0_i32 = arith.constant 0 : i32
    %c0_i32_0 = arith.constant 0 : i32
    %c0_i32_1 = arith.constant 0 : i32
    return %c0_i32, %c0_i32_0 : i32, i32
  }
}

</mosaic_0001>

<bundles_post_ra>
// kernel: model_forward.1
= control target key start
LH: loop header
LB: loop body
LE: loop exit
PB: predicated region body
PF: predicated region fallthrough
CT: control target
= control target key end

     0   :  { %s8078_s0 = inlined_call_operand.vmem [shape: f32[2,128], index: 0, kind: input, shape index: {}]   ;;  %s8079_s1 = inlined_call_operand.vmem [shape: f32[16,192], index: 1, kind: input, shape index: {}]   ;;  %s8080_s2 = inlined_call_operand.vmem [shape: f32[64,192], index: 2, kind: input, shape index: {}]   ;;  %s8081_s3 = inlined_call_operand.vmem [shape: f32[1,192], index: 3, kind: input, shape index: {}]   ;;  %s8082_s4 = inlined_call_operand.hbm [shape: f32[1,192], index: 4, kind: input, shape index: {}]   ;;  %s8083_s5 = inlined_call_operand.hbm [shape: f32[64,192], index: 5, kind: input, shape index: {}]   ;;  %s8084_s6 = inlined_call_operand.hbm [shape: f32[64,192], index: 6, kind: input, shape index: {}]   ;;  %s8085_s7 = inlined_call_operand.vmem [shape: f32[1,192], index: 7, kind: input, shape index: {}]   ;;  %s8086_s8 = inlined_call_operand.vmem [shape: f32[1,192], index: 8, kind: input, shape index: {}]   ;;  %s8087_s9 = inlined_call_operand.hbm [shape: f32[64,192], index: 9, kind: input, shape index: {}]   ;;  %s8088_s10 = inlined_call_operand.hbm [shape: f32[1,192], index: 10, kind: input, shape index: {}]   ;;  %s8089_s11 = inlined_call_operand.hbm [shape: f32[64,64], index: 11, kind: input, shape index: {}]   ;;  %s8090_s12 = inlined_call_operand.vmem [shape: f32[1,64], index: 12, kind: input, shape index: {}]   ;;  %s8091_s13 = inlined_call_operand.vmem [shape: f32[64,32], index: 13, kind: input, shape index: {}]   ;;  %s8092_s14 = inlined_call_operand.hbm [shape: f32[1,32], index: 14, kind: input, shape index: {}]   ;;  %s8093_s15 = inlined_call_operand.hbm [shape: f32[32,32], index: 15, kind: input, shape index: {}]   ;;  %s8094_s16 = inlined_call_operand.hbm [shape: f32[1,32], index: 16, kind: input, shape index: {}]   ;;  %s8095_s17 = inlined_call_operand.hbm [shape: f32[1,32], index: 17, kind: input, shape index: {}]   ;;  %s8096_s18 = inlined_call_operand.<no memory space> [shape: f32[1,1], index: 18, kind: input, shape index: {}]   ;;  %s8097_s19 = inlined_call_operand.vmem [shape: f32[2,1], index: 19, kind: output, shape index: {}]  }
   0x1   :  { %8100 = sst [smem:[#allocation25_spill]] %s8078_s0  ;;  %v24_v0 = vstv %s8096_s18 }
   0x2   :  { %8101 = sst [smem:[#allocation26_spill]] %s8079_s1  ;;  %25 = vst [vmem:[#allocation2] sm:$0x1] %v24_v0 }
   0x3   :  { %8102 = sst [smem:[#allocation27_spill]] %s8080_s2 }
   0x4   :  { %8103 = sst [smem:[#allocation28_spill]] %s8081_s3 }
   0x5   :  { %26 = vsyncpa [#allocation4], 0 }
   0x6   :  { %27 = vsyncpa [#allocation6], 0 }
   0x7   :  { %28 = vsyncpa [#allocation9], 0 }
   0x8   :  { %29 = vsyncpa [#allocation12], 0 }
   0x9   :  { %30 = vsyncpa [#allocation15], 0 }
   0xa   :  { %31 = vsyncpa [#allocation18], 0  ;;  %s6702_s20 = smov [#allocation5]   ;;  %s6470_s2 = scalar_lea.hbm %s8083_s5, 2048 }
   0xb   :  { %s55_s21 = sshll.u32 %s6702_s20, 4  ;;  %p6471_p0 = scmp.ne.s32.totalorder %s8083_s5, %s6470_s2  ;;  %s56_s21 = int_to_ptr.vmem [resolvable:$true] %s55_s21 }
   0xc   :  { %p6474_p1 = scmp.lt.u32.totalorder %s6470_s2, %s8083_s5 }
   0xe   :  { %p6476_p2 = pnand %p6474_p1, %p6471_p0 }
  0x10   :  { %6479 = shalt.err (!%p6476_p2)
}
  0x11   :  { %s6480_s3 = scalar_lea.vmem %s56_s21, 2048  ;;  %p6485_p4 = scmp.lt.s32.totalorder %s56_s21, %s56_s21 }
  0x12   :  { %p6481_p3 = scmp.ne.s32.totalorder %s56_s21, %s6480_s3  ;;  %p6486_p5 = scmp.lt.s32.totalorder %s6480_s3, %s6480_s3 }
  0x14   :  { %p6487_p6 = por %p6486_p5, %p6485_p4 }
  0x16   :  { %p6488_p7 = pnand %p6487_p6, %p6481_p3 }
  0x18   :  { %6491 = shalt.err (!%p6488_p7)
}
  0x19   :  { %s6703_s26 = smov 256   ;;  %s6704_s27 = smov 16  }
  0x1a   :  { %61 = dma.hbm_to_vmem [thread:$0]  %s8083_s5, 2048, %s56_s21, [#allocation6], %s6703_s26, %s6703_s26, %s6704_s27  }
  0x1b   :  { %s6705_s0 = smov [#allocation8]   ;;  %s6706_s20 = smov [#allocation11]  }
  0x1c   :  { %s83_s30 = sshll.u32 %s6705_s0, 4  ;;  %s105_s1 = sshll.u32 %s6706_s20, 4  ;;  %s84_s30 = int_to_ptr.vmem [resolvable:$true] %s83_s30  ;;  %s106_s1 = int_to_ptr.vmem [resolvable:$true] %s105_s1 }
  0x1d   :  { %s6492_s23 = scalar_lea.hbm %s8087_s9, 2048 }
  0x1e   :  { %p6493_p8 = scmp.ne.s32.totalorder %s8087_s9, %s6492_s23  ;;  %p6496_p9 = scmp.lt.u32.totalorder %s6492_s23, %s8087_s9 }
  0x20   :  { %p6498_p10 = pnand %p6496_p9, %p6493_p8 }
  0x22   :  { %6501 = shalt.err (!%p6498_p10)
}
  0x23   :  { %s6502_s5 = scalar_lea.vmem %s84_s30, 2048  ;;  %p6507_p12 = scmp.lt.s32.totalorder %s84_s30, %s84_s30 }
  0x24   :  { %p6503_p11 = scmp.ne.s32.totalorder %s84_s30, %s6502_s5  ;;  %p6508_p13 = scmp.lt.s32.totalorder %s6502_s5, %s6502_s5 }
  0x26   :  { %p6509_p0 = por %p6508_p13, %p6507_p12 }
  0x28   :  { %p6510_p1 = pnand %p6509_p0, %p6503_p11 }
  0x2a   :  { %6513 = shalt.err (!%p6510_p1)
}
  0x2b   :  { %89 = dma.hbm_to_vmem [thread:$0]  %s8087_s9, 2048, %s84_s30, [#allocation9], %s6703_s26, %s6703_s26, %s6704_s27  }
  0x2c   :  { %s6514_s20 = scalar_lea.hbm %s8089_s11, 1024 }
  0x2d   :  { %p6515_p2 = scmp.ne.s32.totalorder %s8089_s11, %s6514_s20  ;;  %p6518_p3 = scmp.lt.u32.totalorder %s6514_s20, %s8089_s11 }
  0x2f   :  { %p6520_p4 = pnand %p6518_p3, %p6515_p2 }
  0x31   :  { %6523 = shalt.err (!%p6520_p4)
}
  0x32   :  { %s6524_s25 = scalar_lea.vmem %s106_s1, 1024  ;;  %p6529_p6 = scmp.lt.s32.totalorder %s106_s1, %s106_s1 }
  0x33   :  { %p6525_p5 = scmp.ne.s32.totalorder %s106_s1, %s6524_s25  ;;  %p6530_p7 = scmp.lt.s32.totalorder %s6524_s25, %s6524_s25 }
  0x35   :  { %p6531_p8 = por %p6530_p7, %p6529_p6 }
  0x37   :  { %p6532_p9 = pnand %p6531_p8, %p6525_p5 }
  0x39   :  { %6535 = shalt.err (!%p6532_p9)
}
  0x3a   :  { %s6707_s9 = smov 128   ;;  %s6708_s30 = smov 8  }
  0x3b   :  { %111 = dma.hbm_to_vmem [thread:$0]  %s8089_s11, 1024, %s106_s1, [#allocation12], %s6707_s9, %s6707_s9, %s6708_s30  }
  0x3c   :  { %s6709_s5 = smov [#allocation14]   ;;  %s6710_s28 = smov [#allocation3]  }
  0x3d   :  { %s131_s21 = sshll.u32 %s6709_s5, 4  ;;  %s46_s29 = sshll.u32 %s6710_s28, 4  ;;  %s132_s21 = int_to_ptr.vmem [resolvable:$true] %s131_s21  ;;  %s47_s29 = int_to_ptr.vmem [resolvable:$true] %s46_s29 }
  0x3e   :  { %s6536_s22 = scalar_lea.hbm %s8093_s15, 512 }
  0x3f   :  { %p6537_p10 = scmp.ne.s32.totalorder %s8093_s15, %s6536_s22  ;;  %p6540_p11 = scmp.lt.u32.totalorder %s6536_s22, %s8093_s15 }
  0x41   :  { %p6542_p12 = pnand %p6540_p11, %p6537_p10 }
  0x43   :  { %6545 = shalt.err (!%p6542_p12)
}
  0x44   :  { %s6546_s11 = scalar_lea.vmem %s132_s21, 512  ;;  %p6551_p0 = scmp.lt.s32.totalorder %s132_s21, %s132_s21 }
  0x45   :  { %p6547_p13 = scmp.ne.s32.totalorder %s132_s21, %s6546_s11  ;;  %p6552_p1 = scmp.lt.s32.totalorder %s6546_s11, %s6546_s11 }
  0x47   :  { %p6553_p2 = por %p6552_p1, %p6551_p0 }
  0x49   :  { %p6554_p3 = pnand %p6553_p2, %p6547_p13 }
  0x4b   :  { %6557 = shalt.err (!%p6554_p3)
}
  0x4c   :  { %137 = dma.hbm_to_vmem [thread:$0]  %s8093_s15, 512, %s132_s21, [#allocation15], %s6707_s9, %s6707_s9, %s6708_s30  }
  0x4d   :  { %s6558_s28 = scalar_lea.hbm %s8082_s4, 32 }
  0x4e   :  { %p6559_p4 = scmp.ne.s32.totalorder %s8082_s4, %s6558_s28  ;;  %p6562_p5 = scmp.lt.u32.totalorder %s6558_s28, %s8082_s4 }
  0x50   :  { %p6564_p6 = pnand %p6562_p5, %p6559_p4 }
  0x52   :  { %6567 = shalt.err (!%p6564_p6)
}
  0x53   :  { %s6568_s23 = scalar_lea.vmem %s47_s29, 32  ;;  %p6573_p8 = scmp.lt.s32.totalorder %s47_s29, %s47_s29 }
  0x54   :  { %p6569_p7 = scmp.ne.s32.totalorder %s47_s29, %s6568_s23  ;;  %p6574_p9 = scmp.lt.s32.totalorder %s6568_s23, %s6568_s23 }
  0x56   :  { %p6575_p10 = por %p6574_p9, %p6573_p8 }
  0x58   :  { %p6576_p11 = pnand %p6575_p10, %p6569_p7 }
  0x5a   :  { %6579 = shalt.err (!%p6576_p11)
}
  0x5b   :  { %49 = dma.hbm_to_vmem [thread:$0]  %s8082_s4, 32, %s47_s29, [#allocation4]  }
  0x5c   :  { %s6711_s21 = smov [#allocation7]   ;;  %s6712_s25 = smov [#allocation10]  }
  0x5d   :  { %s67_s24 = sshll.u32 %s6711_s21, 4  ;;  %s96_s11 = sshll.u32 %s6712_s25, 4  ;;  %s68_s24 = int_to_ptr.vmem [resolvable:$true] %s67_s24  ;;  %s97_s11 = int_to_ptr.vmem [resolvable:$true] %s96_s11 }
  0x5e   :  { %s6580_s3 = scalar_lea.hbm %s8084_s6, 2048 }
  0x5f   :  { %p6581_p12 = scmp.ne.s32.totalorder %s8084_s6, %s6580_s3  ;;  %p6584_p13 = scmp.lt.u32.totalorder %s6580_s3, %s8084_s6 }
  0x61   :  { %p6586_p0 = pnand %p6584_p13, %p6581_p12 }
  0x63   :  { %6589 = shalt.err (!%p6586_p0)
}
  0x64   :  { %s6590_s4 = scalar_lea.vmem %s68_s24, 2048  ;;  %p6595_p2 = scmp.lt.s32.totalorder %s68_s24, %s68_s24 }
  0x65   :  { %p6591_p1 = scmp.ne.s32.totalorder %s68_s24, %s6590_s4  ;;  %p6596_p3 = scmp.lt.s32.totalorder %s6590_s4, %s6590_s4 }
  0x67   :  { %p6597_p4 = por %p6596_p3, %p6595_p2 }
  0x69   :  { %p6598_p5 = pnand %p6597_p4, %p6591_p1 }
  0x6b   :  { %6601 = shalt.err (!%p6598_p5)
}
  0x6c   :  { %73 = dma.hbm_to_vmem [thread:$0]  %s8084_s6, 2048, %s68_s24, [#allocation6], %s6703_s26, %s6703_s26, %s6704_s27  }
  0x6d   :  { %s6602_s15 = scalar_lea.hbm %s8088_s10, 32 }
  0x6e   :  { %p6603_p6 = scmp.ne.s32.totalorder %s8088_s10, %s6602_s15  ;;  %p6606_p7 = scmp.lt.u32.totalorder %s6602_s15, %s8088_s10 }
  0x70   :  { %p6608_p8 = pnand %p6606_p7, %p6603_p6 }
  0x72   :  { %6611 = shalt.err (!%p6608_p8)
}
  0x73   :  { %s6612_s18 = scalar_lea.vmem %s97_s11, 32  ;;  %p6617_p10 = scmp.lt.s32.totalorder %s97_s11, %s97_s11 }
  0x74   :  { %p6613_p9 = scmp.ne.s32.totalorder %s97_s11, %s6612_s18  ;;  %p6618_p11 = scmp.lt.s32.totalorder %s6612_s18, %s6612_s18 }
  0x76   :  { %p6619_p12 = por %p6618_p11, %p6617_p10 }
  0x78   :  { %p6620_p13 = pnand %p6619_p12, %p6613_p9 }
  0x7a   :  { %6623 = shalt.err (!%p6620_p13)
}
  0x7b   :  { %99 = dma.hbm_to_vmem [thread:$0]  %s8088_s10, 32, %s97_s11, [#allocation9]  }
  0x7c   :  { %s6713_s24 = smov [#allocation13]   ;;  %s6714_s5 = smov [#allocation16]  }
  0x7d   :  { %s122_s3 = sshll.u32 %s6713_s24, 4  ;;  %s144_s28 = sshll.u32 %s6714_s5, 4  ;;  %s123_s3 = int_to_ptr.vmem [resolvable:$true] %s122_s3  ;;  %s145_s28 = int_to_ptr.vmem [resolvable:$true] %s144_s28 }
  0x7e   :  { %s6624_s4 = scalar_lea.hbm %s8092_s14, 16 }
  0x7f   :  { %p6625_p0 = scmp.ne.s32.totalorder %s8092_s14, %s6624_s4  ;;  %p6628_p1 = scmp.lt.u32.totalorder %s6624_s4, %s8092_s14 }
  0x81   :  { %p6630_p2 = pnand %p6628_p1, %p6625_p0 }
  0x83   :  { %6633 = shalt.err (!%p6630_p2)
}
  0x84   :  { %s6634_s10 = scalar_lea.vmem %s123_s3, 16  ;;  %s6638_s11 = scalar_lea.vmem %s123_s3, 32 }
  0x85   :  { %p6635_p3 = scmp.ne.s32.totalorder %s123_s3, %s6634_s10  ;;  %p6639_p4 = scmp.lt.s32.totalorder %s123_s3, %s123_s3 }
  0x86   :  { %p6640_p5 = scmp.lt.s32.totalorder %s6638_s11, %s6634_s10 }
  0x88   :  { %p6641_p6 = por %p6640_p5, %p6639_p4 }
  0x8a   :  { %p6642_p7 = pnand %p6641_p6, %p6635_p3 }
  0x8c   :  { %6645 = shalt.err (!%p6642_p7)
}
  0x8d   :  { %125 = dma.hbm_to_vmem [thread:$0]  %s8092_s14, 16, %s123_s3, [#allocation12]  }
  0x8e   :  { %s6646_s1 = scalar_lea.hbm %s8094_s16, 16 }
  0x8f   :  { %p6647_p8 = scmp.ne.s32.totalorder %s8094_s16, %s6646_s1  ;;  %p6650_p9 = scmp.lt.u32.totalorder %s6646_s1, %s8094_s16 }
  0x91   :  { %p6652_p10 = pnand %p6650_p9, %p6647_p8 }
  0x93   :  { %6655 = shalt.err (!%p6652_p10)
}
  0x94   :  { %s6656_s5 = scalar_lea.vmem %s145_s28, 16  ;;  %s6660_s0 = scalar_lea.vmem %s145_s28, 32 }
  0x95   :  { %p6657_p11 = scmp.ne.s32.totalorder %s145_s28, %s6656_s5  ;;  %p6661_p12 = scmp.lt.s32.totalorder %s145_s28, %s145_s28 }
  0x96   :  { %p6662_p13 = scmp.lt.s32.totalorder %s6660_s0, %s6656_s5 }
  0x98   :  { %p6663_p0 = por %p6662_p13, %p6661_p12 }
  0x9a   :  { %p6664_p1 = pnand %p6663_p0, %p6657_p11 }
  0x9c   :  { %6667 = shalt.err (!%p6664_p1)
}
  0x9d   :  { %147 = dma.hbm_to_vmem [thread:$0]  %s8094_s16, 16, %s145_s28, [#allocation15]  }
  0x9e   :  { %s6715_s20 = smov [#allocation17]   ;;  %s6668_s2 = scalar_lea.hbm %s8095_s17, 16 }
  0x9f   :  { %s154_s4 = sshll.u32 %s6715_s20, 4  ;;  %p6669_p2 = scmp.ne.s32.totalorder %s8095_s17, %s6668_s2  ;;  %s155_s4 = int_to_ptr.vmem [resolvable:$true] %s154_s4 }
  0xa0   :  { %p6672_p3 = scmp.lt.u32.totalorder %s6668_s2, %s8095_s17 }
  0xa2   :  { %p6674_p4 = pnand %p6672_p3, %p6669_p2 }
  0xa4   :  { %6677 = shalt.err (!%p6674_p4)
}
  0xa5   :  { %s6678_s9 = scalar_lea.vmem %s155_s4, 16  ;;  %s6682_s16 = scalar_lea.vmem %s155_s4, 32 }
  0xa6   :  { %p6679_p5 = scmp.ne.s32.totalorder %s155_s4, %s6678_s9  ;;  %p6683_p6 = scmp.lt.s32.totalorder %s155_s4, %s155_s4 }
  0xa7   :  { %p6684_p7 = scmp.lt.s32.totalorder %s6682_s16, %s6678_s9 }
  0xa9   :  { %p6685_p8 = por %p6684_p7, %p6683_p6 }
  0xab   :  { %p6686_p9 = pnand %p6685_p8, %p6679_p5 }
  0xad   :  { %6689 = shalt.err (!%p6686_p9)
}
  0xae   :  { %157 = dma.hbm_to_vmem [thread:$0]  %s8095_s17, 16, %s155_s4, [#allocation18]  }
  0xaf   :  { %6690 = dma.done.wait [#allocation4], 32  }
  0xb0   :  { %6691 = vsyncadd [#allocation4], 4294967264 }
  0xb1   :  { %6692 = dma.done.wait [#allocation6], 4096  }
  0xb2   :  { %6693 = vsyncadd [#allocation6], 4294963200 }
  0xb3   :  { %6694 = dma.done.wait [#allocation9], 2080  }
  0xb4   :  { %6695 = vsyncadd [#allocation9], 4294965216 }
  0xb5   :  { %6696 = dma.done.wait [#allocation12], 1040  }
  0xb6   :  { %6697 = vsyncadd [#allocation12], 4294966256 }
  0xb7   :  { %6698 = dma.done.wait [#allocation15], 528  }
  0xb8   :  { %6699 = vsyncadd [#allocation15], 4294966768 }
  0xb9   :  { %6700 = dma.done.wait [#allocation18], 16  }
  0xba   :  { %6701 = vsyncadd [#allocation18], 4294967280  ;;  %v6716_v1 = vmov 0.0   ;;  %s8104_s17 = sld [smem:[#allocation25_spill]]  ;;  %s8105_s26 = sld [smem:[#allocation27_spill]]  ;;  %vm216_vm0 = vcmask 1041408   ;;  %v248_v49 = vlaneseq }
  0xbb   :  { %421 = vmatprep.mubr.f32.mxu1 %v6716_v1  ;;  %329 = vmatprep.mubr.f32.mxu0 %v6716_v1  ;;  %s6717_s0 = smov 64   ;;  %s6718_s16 = smov 112   ;;  %vm218_vm1 = vcmask 1043456   ;;  %vm220_vm2 = vcmask 1045504   ;;  %vm258_vm3 = vcmask 130048   ;;  %vm500_vm4 = vcmask 261120  }
  0xbc   :  { %s6719_s5 = smov 80   ;;  %s8106_s2 = sld [smem:[#allocation26_spill]]  ;;  %v7101_v50 = vshrl.u32 %v248_v49, 7  ;;  %v246_v52 = vld [vmem:[#allocation3] sm:$0x3]  ;;  %vm353_vm5 = vcmask 523264  }
  0xbd   :  { %s6720_s21 = smov 96   ;;  %s6721_s25 = smov 32   ;;  %vm3189_vm6 = vcmask 64512   ;;  %vm6732_vm10 = vmmov 0   ;;  %vm4838_vm11 = vcmask 195584   ;;  %vm4843_vm12 = vcmask 326656  }
  0xbe   :  { %s6722_s24 = smov 48   ;;  %v7104_v51 = vsub.s32 0, %v7101_v50  ;;  %v7107_v53 = vsub.s32 1, %v7101_v50  ;;  %s8107_s3 = sld [smem:[#allocation28_spill]]  ;;  %vm7781_vm7 = vmpackc.low %vm3189_vm6, %vm3189_vm6  ;;  %vm4846_vm13 = vcmask 392192   ;;  %vm4849_vm14 = vcmask 457728  }
  0xbf   :  { %s6724_s22 = smov 120   ;;  %s6729_s23 = smov 88  }
  0xc0   :  { %v6972_v2 = vld [vmem:[%s8104_s17] sm:$0x3]  ;;  %v230_v3 = vld [vmem:[%s8105_s26 + $0x8] sm:$0xff]  ;;  %v232_v4 = vld [vmem:[%s8105_s26 + $0x18] sm:$0xff]  ;;  %v7110_v54 = vrot.slane %v246_v52, %v7104_v51  ;;  %v7113_v55 = vrot.slane %v246_v52, %v7107_v53  ;;  %s6730_s10 = smov 72  }
  0xc1   :  { %v192_v5 = vrot.slane %v6972_v2, 6  ;;  %204 = vrot.lane.b32.xlu1 %v6972_v2, %s6717_s0  ;;  %v200_v6 = vrot.slane %v6972_v2, 2  ;;  %v6984_v7 = vpack.c.bf16 %v232_v4, %v230_v3  ;;  %v229_v8 = vld [vmem:[%s8105_s26] sm:$0xff]  ;;  %v231_v9 = vld [vmem:[%s8105_s26 + $0x10] sm:$0xff]  ;;  %v234_v10 = vld [vmem:[%s8105_s26 + $0x28] sm:$0xff]  ;;  %v196_v15 = vrot.slane %v6972_v2, 4 }
  0xc2   :  { %v6995_v11 = vpack.c.bf16 %v231_v9, %v229_v8  ;;  %v236_v12 = vld [vmem:[%s8105_s26 + $0x38] sm:$0xff]  ;;  %v233_v13 = vld [vmem:[%s8105_s26 + $0x20] sm:$0xff]  ;;  %v235_v14 = vld [vmem:[%s8105_s26 + $0x30] sm:$0xff] }
  0xc3   :  { %193 = vrot.lane.b32.xlu0 %v192_v5, %s6718_s16  ;;  %5609 = vmatprep.subr.bf16.mxu1 %v6984_v7  ;;  %v7009_v16 = vpack.c.bf16 %v236_v12, %v234_v10  ;;  %v238_v17 = vld [vmem:[%s8105_s26 + $0x48] sm:$0xff]  ;;  %v240_v18 = vld [vmem:[%s8105_s26 + $0x58] sm:$0xff]  ;;  %v7018_v19 = vpack.c.bf16 %v235_v14, %v233_v13  ;;  %v237_v20 = vld [vmem:[%s8105_s26 + $0x40] sm:$0xff] }
  0xc4   :  { %5611 = vmatpush1.bf16.msra.mxu1 %v6995_v11  ;;  %v239_v21 = vld [vmem:[%s8105_s26 + $0x50] sm:$0xff]  ;;  %v7028_v22 = vpack.c.bf16 %v240_v18, %v238_v17  ;;  %v242_v23 = vld [vmem:[%s8105_s26 + $0x68] sm:$0xff]  ;;  %v244_v24 = vld [vmem:[%s8105_s26 + $0x78] sm:$0xff] }
  0xc5   :  { %201 = vrot.lane.b32.xlu1 %v200_v6, %s6719_s5  ;;  %5613 = vmatprep.subr.bf16.mxu1 %v7009_v16  ;;  %v226_v25 = vld [vmem:[%s8106_s2 + $0x8] sm:$0xff]  ;;  %v228_v26 = vld [vmem:[%s8106_s2 + $0x18] sm:$0xff]  ;;  %v225_v27 = vld [vmem:[%s8106_s2] sm:$0xff]  ;;  %v7050_v31 = vpack.c.bf16 %v239_v21, %v237_v20  ;;  %v7054_v32 = vpack.c.bf16 %v244_v24, %v242_v23 }
  0xc6   :  { %v227_v28 = vld [vmem:[%s8106_s2 + $0x10] sm:$0xff]  ;;  %v5604_v29 = vpack.c.bf16 %v228_v26, %v226_v25  ;;  %v241_v33 = vld [vmem:[%s8105_s26 + $0x60] sm:$0xff]  ;;  %s6727_s2 = smov 104  }
  0xc7   :  { %197 = vrot.lane.b32.xlu0 %v196_v15, %s6720_s21  ;;  %v5606_v30 = vpack.c.bf16 %v227_v28, %v225_v27  ;;  %v243_v34 = vld [vmem:[%s8105_s26 + $0x70] sm:$0xff]  ;;  %v245_v61 = vld [vmem:[%s8107_s3] sm:$0x3] }
  0xc8   :  { %5615 = vmatpush1.bf16.msra.mxu1 %v7018_v19  ;;  %5605 = vmatprep.subr.bf16.mxu0 %v5604_v29  ;;  %v7064_v35 = vpack.c.bf16 %v243_v34, %v241_v33  ;;  %v251_v62 = vrot.slane %v245_v61, %v7104_v51  ;;  %v255_v63 = vrot.slane %v245_v61, %v7107_v53 }
  0xc9   :  { %210 = vrot.lane.b32.xlu1 %v196_v15, %s6721_s25  ;;  %5617 = vmatprep.subr.bf16.mxu1 %v7028_v22 }
  0xca   :  { %5607 = vmatpush1.bf16.msra.mxu0 %v5606_v30 }
  0xcb   :  { %207 = vrot.lane.b32.xlu0 %v192_v5, %s6722_s24  ;;  %5625 = vmatprep.subr.bf16.mxu0 %v6984_v7 }
  0xcc   :  { %5619 = vmatpush1.bf16.msra.mxu1 %v7050_v31 }
  0xcd   :  { %5621 = vmatprep.subr.bf16.mxu1 %v7054_v32 }
  0xcf   :  { %213 = vrot.lane.b32.xlu0 %v200_v6, %s6704_s27 }
  0xd0   :  { %5623 = vmatpush1.bf16.msra.mxu1 %v7064_v35 }
  0xd1   :  { %5641 = vmatprep.subr.bf16.mxu1 %v6984_v7 }
  0xd3   :  { %422 = vmatmul.mubr.f32.vlgmr.msra.gmra.mrb[0].mxu1 %v6716_v1 }
  0xd4   :  { %5643 = vmatpush1.bf16.msra.mxu1 %v6995_v11  ;;  %727 = vmatprep.mubr.f32.mxu1 %v6716_v1 }
  0xd5   :  { %5645 = vmatprep.subr.bf16.mxu1 %v7009_v16 }
  0xd8   :  { %5647 = vmatpush1.bf16.msra.mxu1 %v7018_v19 }
  0xd9   :  { %5649 = vmatprep.subr.bf16.mxu1 %v7028_v22 }
  0xdc   :  { %5651 = vmatpush1.bf16.msra.mxu1 %v7050_v31 }
  0xdd   :  { %5653 = vmatprep.subr.bf16.mxu1 %v7054_v32 }
  0xe0   :  { %5655 = vmatpush1.bf16.msra.mxu1 %v7064_v35 }
  0xe1   :  { %5673 = vmatprep.subr.bf16.mxu1 %v6984_v7 }
 0x133   :  { %v205_v36 = vpop.permute.xlu1 %204 }
 0x135   :  { %v194_v37 = vpop.permute.xlu0 %193 }
 0x136   :  { %v217_v39 = vsel %vm216_vm0, %v6972_v2, %v194_v37 }
 0x137   :  { %v202_v38 = vpop.permute.xlu1 %201 }
 0x139   :  { %v198_v40 = vpop.permute.xlu0 %197 }
 0x13a   :  { %v219_v41 = vsel %vm218_vm1, %v217_v39, %v198_v40 }
 0x13b   :  { %v221_v42 = vsel %vm220_vm2, %v219_v41, %v202_v38  ;;  %v211_v45 = vpop.permute.xlu1 %210 }
 0x13c   :  { %5221 = vmatmul.mubr.msk.f32.vlgmr.msra.gmra.mrb[0].mxu0 %vm258_vm3, %v221_v42 }
 0x13d   :  { %v208_v43 = vpop.permute.xlu0 %207  ;;  %335 = vmatprep.mubr.f32.mxu0 %v6716_v1  ;;  %5627 = vmatpush1.bf16.msra.mxu0 %v6995_v11 }
 0x13e   :  { %v222_v44 = vsel %vm216_vm0, %v205_v36, %v208_v43  ;;  %5629 = vmatprep.subr.bf16.mxu0 %v7009_v16 }
 0x13f   :  { %v223_v46 = vsel %vm218_vm1, %v222_v44, %v211_v45 }
 0x141   :  { %v214_v47 = vpop.permute.xlu0 %213  ;;  %5631 = vmatpush1.bf16.msra.mxu0 %v7018_v19 }
 0x142   :  { %v224_v48 = vsel %vm220_vm2, %v223_v46, %v214_v47  ;;  %5633 = vmatprep.subr.bf16.mxu0 %v7028_v22 }
 0x143   :  { %5222 = vmatmul.mubr.msk.f32.gmra.mrb[2].mxu0 %vm258_vm3, %v224_v48 }
 0x144   :  { %569 = vmatprep.mubr.f32.mxu0 %v6716_v1 }
 0x145   :  { %5635 = vmatpush1.bf16.msra.mxu0 %v7050_v31 }
 0x146   :  { %5637 = vmatprep.subr.bf16.mxu0 %v7054_v32 }
 0x149   :  { %5639 = vmatpush1.bf16.msra.mxu0 %v7064_v35 }
 0x14a   :  { %5657 = vmatprep.subr.bf16.mxu0 %v6984_v7 }
 0x1a6   :  { %v423_v56 = vpop.f32.mrb[0].mxu1 }
 0x1a7   :  { %v424_v57 = vadd.f32 %v423_v56, %v7110_v54  ;;  %v425_v58 = vpop.f32.mrb[1].mxu1 }
 0x1a8   :  { %v426_v59 = vadd.f32 %v425_v58, %v7113_v55 }
 0x1a9   :  { %436 = vrot.lane.b32.xlu0 %v424_v57, %s6717_s0  ;;  %v454_v9 = vrot.slane %v424_v57, 2 }
 0x1aa   :  { %v464_v60 = vrot.slane %v426_v59, 2 }
 0x1ac   :  { %473 = vrot.lane.b32.xlu1 %v464_v60, %s6717_s0 }
 0x20f   :  { %v331_v0 = vpop.f32.mrb[0].mxu0 }
 0x210   :  { %v7124_v2 = vadd.f32 %v331_v0, %v251_v62  ;;  %v333_v3 = vpop.f32.mrb[1].mxu0 }
 0x211   :  { %v7126_v4 = vadd.f32 %v333_v3, %v255_v63 }
 0x212   :  { %v428_v5 = vadd.f32 %v424_v57, %v7124_v2 }
 0x214   :  { %v5223_v6 = vmul.f32 -1.442695, %v428_v5 }
 0x216   :  { %v337_v8 = vpop.f32.mrb[2].mxu0  ;;  %6150 = vpow2.f32 %v5223_v6 }
 0x217   :  { %v7129_v10 = vadd.f32 %v337_v8, %v251_v62  ;;  %v339_v12 = vpop.f32.mrb[3].mxu0 }
 0x218   :  { %v7135_v30 = vadd.f32 %v339_v12, %v255_v63 }
 0x219   :  { %v456_v13 = vadd.f32 %v454_v9, %v7129_v10 }
 0x21a   :  { %v466_v38 = vadd.f32 %v464_v60, %v7135_v30 }
 0x21b   :  { %v5224_v14 = vmul.f32 -1.442695, %v456_v13  ;;  %v437_v21 = vpop.permute.xlu0 %436 }
 0x21c   :  { %v5225_v39 = vmul.f32 -1.442695, %v466_v38 }
 0x21d   :  { %6152 = vpow2.f32 %v5224_v14 }
 0x21e   :  { %v474_v25 = vpop.permute.xlu1 %473 }
 0x220   :  { %v6151_v15 = vpop.eup %6150 }
 0x221   :  { %v432_v17 = vadd.f32 1.0, %v6151_v15 }
 0x223   :  { %6154 = vrcp.f32 %v432_v17 }
 0x227   :  { %v6153_v18 = vpop.eup %6152 }
 0x228   :  { %v460_v20 = vadd.f32 1.0, %v6153_v18 }
 0x22a   :  { %6156 = vrcp.f32 %v460_v20 }
 0x22d   :  { %v6155_v23 = vpop.eup %6154 }
 0x22e   :  { %v439_v24 = vmul.f32 %v6155_v23, %v437_v21  ;;  %v446_v42 = vsub.f32 1.0, %v6155_v23  ;;  %v452_v44 = vmul.f32 0.0, %v6155_v23 }
 0x230   :  { %441 = vrot.lane.b32.xlu0 %v439_v24, %s6717_s0 }
 0x234   :  { %v6157_v26 = vpop.eup %6156 }
 0x235   :  { %v476_v27 = vmul.f32 %v6157_v26, %v474_v25 }
 0x237   :  { %478 = vrot.lane.b32.xlu1 %v476_v27, %s6717_s0 }
 0x2a2   :  { %v442_v28 = vpop.permute.xlu0 %441 }
 0x2a3   :  { %v444_v29 = vadd.f32 %v442_v28, %v7124_v2 }
 0x2a5   :  { %6158 = vtanh.f32 %v444_v29 }
 0x2a9   :  { %v479_v33 = vpop.permute.xlu1 %478 }
 0x2aa   :  { %v481_v34 = vadd.f32 %v479_v33, %v7135_v30 }
 0x2ac   :  { %6160 = vtanh.f32 %v481_v34 }
 0x2ad   :  { %6162 = vpow2.f32 %v5225_v39 }
 0x2af   :  { %v6159_v36 = vpop.eup %6158 }
 0x2b0   :  { %448 = vrot.lane.b32.xlu0 %v6159_v36, %s6720_s21 }
 0x2b6   :  { %v6161_v37 = vpop.eup %6160 }
 0x2b7   :  { %485 = vrot.lane.b32.xlu1 %v6161_v37, %s6720_s21  ;;  %v6163_v40 = vpop.eup %6162 }
 0x2b8   :  { %v470_v41 = vadd.f32 1.0, %v6163_v40 }
 0x2ba   :  { %6164 = vrcp.f32 %v470_v41 }
 0x2c4   :  { %v6165_v46 = vpop.eup %6164 }
 0x2c5   :  { %v483_v48 = vsub.f32 1.0, %v6165_v46  ;;  %v489_v56 = vmul.f32 0.0, %v6165_v46 }
 0x322   :  { %v449_v43 = vpop.permute.xlu0 %448 }
 0x323   :  { %v451_v45 = vmul.f32 %v449_v43, %v446_v42 }
 0x325   :  { %v453_v47 = vadd.f32 %v452_v44, %v451_v45 }
 0x327   :  { %492 = vrot.lane.b32.xlu1 %v453_v47, %s6720_s21 }
 0x329   :  { %v486_v52 = vpop.permute.xlu1 %485 }
 0x32a   :  { %v488_v57 = vmul.f32 %v486_v52, %v483_v48 }
 0x32c   :  { %v7142_v58 = vadd.f32 %v489_v56, %v488_v57 }
 0x32e   :  { %v496_v59 = vrot.slane %v7142_v58, 6 }
 0x330   :  { %497 = vrot.lane.b32.xlu0 %v496_v59, %s6721_s25 }
 0x399   :  { %v7146_v60 = vpop.permute.xlu1 %492 }
 0x3a2   :  { %v498_v61 = vpop.permute.xlu0 %497 }
 0x3a3   :  { %v501_v62 = vsel %vm500_vm4, %v7146_v60, %v498_v61 }
 0x3a4   :  { %5226 = vmatmul.mubr.msk.f32.vlgmr.msra.gmra.mrb[4].mxu0 %vm353_vm5, %v501_v62  ;;  %v643_v29 = vrot.slane %v501_v62, 4  ;;  %v602_v33 = vrot.slane %v501_v62, 6 }
 0x3a5   :  { %5659 = vmatpush1.bf16.msra.mxu0 %v6995_v11  ;;  %884 = vmatprep.mubr.f32.mxu0 %v6716_v1 }
 0x3a6   :  { %5661 = vmatprep.subr.bf16.mxu0 %v7009_v16 }
 0x3a9   :  { %5663 = vmatpush1.bf16.msra.mxu0 %v7018_v19 }
 0x3aa   :  { %5665 = vmatprep.subr.bf16.mxu0 %v7028_v22 }
 0x3ad   :  { %5667 = vmatpush1.bf16.msra.mxu0 %v7050_v31 }
 0x3ae   :  { %5669 = vmatprep.subr.bf16.mxu0 %v7054_v32 }
 0x3b1   :  { %5671 = vmatpush1.bf16.msra.mxu0 %v7064_v35 }
 0x3b2   :  { %5689 = vmatprep.subr.bf16.mxu0 %v6984_v7 }
 0x477   :  { %v571_v63 = vpop.f32.mrb[4].mxu0 }
 0x478   :  { %v572_v0 = vadd.f32 %v571_v63, %v7110_v54  ;;  %v573_v3 = vpop.f32.mrb[5].mxu0 }
 0x479   :  { %v574_v5 = vadd.f32 %v573_v3, %v7113_v55 }
 0x47a   :  { %v577_v6 = vrot.slane %v572_v0, 6  ;;  %v608_v9 = vrot.slane %v572_v0, 4 }
 0x47b   :  { %v618_v8 = vrot.slane %v574_v5, 4 }
 0x47c   :  { %586 = vrot.lane.b32.xlu0 %v577_v6, %s6717_s0  ;;  %v579_v12 = vadd.f32 %v577_v6, %v7124_v2  ;;  %v610_v13 = vadd.f32 %v608_v9, %v7129_v10 }
 0x47d   :  { %627 = vrot.lane.b32.xlu1 %v618_v8, %s6717_s0  ;;  %v620_v41 = vadd.f32 %v618_v8, %v7135_v30 }
 0x47e   :  { %v5227_v14 = vmul.f32 -1.442695, %v579_v12  ;;  %v5228_v15 = vmul.f32 -1.442695, %v610_v13 }
 0x47f   :  { %v5229_v42 = vmul.f32 -1.442695, %v620_v41 }
 0x480   :  { %6166 = vpow2.f32 %v5227_v14 }
 0x481   :  { %6168 = vpow2.f32 %v5228_v15 }
 0x48a   :  { %v6167_v17 = vpop.eup %6166 }
 0x48b   :  { %v6169_v18 = vpop.eup %6168  ;;  %v583_v20 = vadd.f32 1.0, %v6167_v17 }
 0x48c   :  { %v614_v21 = vadd.f32 1.0, %v6169_v18 }
 0x48d   :  { %6170 = vrcp.f32 %v583_v20 }
 0x48e   :  { %6172 = vrcp.f32 %v614_v21 }
 0x497   :  { %v6171_v23 = vpop.eup %6170 }
 0x498   :  { %v6173_v25 = vpop.eup %6172  ;;  %v596_v61 = vsub.f32 1.0, %v6171_v23 }
 0x4ee   :  { %v587_v24 = vpop.permute.xlu0 %586 }
 0x4ef   :  { %v589_v26 = vmul.f32 %v6171_v23, %v587_v24  ;;  %v628_v27 = vpop.permute.xlu1 %627 }
 0x4f0   :  { %v630_v28 = vmul.f32 %v6173_v25, %v628_v27 }
 0x4f1   :  { %591 = vrot.lane.b32.xlu0 %v589_v26, %s6717_s0 }
 0x4f2   :  { %632 = vrot.lane.b32.xlu1 %v630_v28, %s6717_s0 }
 0x4f5   :  { %644 = vrot.lane.b32.xlu0 %v643_v29, %s6720_s21 }
 0x4f9   :  { %603 = vrot.lane.b32.xlu0 %v602_v33, %s6721_s25 }
 0x563   :  { %v592_v34 = vpop.permute.xlu0 %591 }
 0x564   :  { %v633_v36 = vpop.permute.xlu1 %632  ;;  %v594_v38 = vadd.f32 %v592_v34, %v7124_v2 }
 0x565   :  { %v635_v37 = vadd.f32 %v633_v36, %v7135_v30 }
 0x567   :  { %6174 = vtanh.f32 %v635_v37  ;;  %v645_v46 = vpop.permute.xlu0 %644 }
 0x568   :  { %6176 = vtanh.f32 %v594_v38 }
 0x569   :  { %6178 = vpow2.f32 %v5229_v42 }
 0x56b   :  { %v604_v57 = vpop.permute.xlu0 %603 }
 0x56c   :  { %v606_v63 = vmul.f32 %v6171_v23, %v604_v57 }
 0x571   :  { %v6175_v39 = vpop.eup %6174 }
 0x572   :  { %639 = vrot.lane.b32.xlu1 %v6175_v39, %s6720_s21  ;;  %v6177_v40 = vpop.eup %6176 }
 0x573   :  { %v6179_v43 = vpop.eup %6178 }
 0x574   :  { %v624_v44 = vadd.f32 1.0, %v6179_v43 }
 0x576   :  { %598 = vrot.lane.b32.xlu1 %v6177_v40, %s6720_s21  ;;  %6180 = vrcp.f32 %v624_v44 }
 0x580   :  { %v6181_v45 = vpop.eup %6180 }
 0x581   :  { %v637_v47 = vsub.f32 1.0, %v6181_v45  ;;  %v647_v52 = vmul.f32 %v6181_v45, %v645_v46 }
 0x5e4   :  { %v640_v48 = vpop.permute.xlu1 %639 }
 0x5e5   :  { %v642_v56 = vmul.f32 %v640_v48, %v637_v47 }
 0x5e7   :  { %v7175_v59 = vadd.f32 %v647_v52, %v642_v56 }
 0x5e8   :  { %v599_v62 = vpop.permute.xlu1 %598 }
 0x5e9   :  { %v601_v0 = vmul.f32 %v599_v62, %v596_v61  ;;  %v654_v3 = vrot.slane %v7175_v59, 2 }
 0x5eb   :  { %v607_v5 = vadd.f32 %v606_v63, %v601_v0  ;;  %655 = vrot.lane.b32.xlu0 %v654_v3, %s6721_s25 }
 0x5ed   :  { %650 = vrot.lane.b32.xlu1 %v607_v5, %s6720_s21 }
 0x65d   :  { %v656_v6 = vpop.permute.xlu0 %655 }
 0x65f   :  { %v7180_v8 = vpop.permute.xlu1 %650 }
 0x660   :  { %v658_v9 = vsel %vm500_vm4, %v7180_v8, %v656_v6 }
 0x661   :  { %v660_v12 = vrot.slane %v658_v9, 2  ;;  %v760_v41 = vrot.slane %v658_v9, 6 }
 0x663   :  { %5230 = vmatmul.mubr.msk.f32.vlgmr.msra.gmra.mrb[2].mxu1 %vm353_vm5, %v660_v12 }
 0x664   :  { %5675 = vmatpush1.bf16.msra.mxu1 %v6995_v11  ;;  %1037 = vmatprep.mubr.f32.mxu1 %v6716_v1 }
 0x665   :  { %5677 = vmatprep.subr.bf16.mxu1 %v7009_v16 }
 0x668   :  { %5679 = vmatpush1.bf16.msra.mxu1 %v7018_v19 }
 0x669   :  { %5681 = vmatprep.subr.bf16.mxu1 %v7028_v22 }
 0x66c   :  { %5683 = vmatpush1.bf16.msra.mxu1 %v7050_v31 }
 0x66d   :  { %5685 = vmatprep.subr.bf16.mxu1 %v7054_v32 }
 0x670   :  { %5687 = vmatpush1.bf16.msra.mxu1 %v7064_v35 }
 0x671   :  { %5705 = vmatprep.subr.bf16.mxu1 %v6984_v7 }
 0x736   :  { %v729_v13 = vpop.f32.mrb[2].mxu1 }
 0x737   :  { %v730_v14 = vadd.f32 %v729_v13, %v7110_v54  ;;  %v731_v15 = vpop.f32.mrb[3].mxu1 }
 0x738   :  { %v732_v17 = vadd.f32 %v731_v15, %v7113_v55 }
 0x739   :  { %v735_v18 = vrot.slane %v730_v14, 4  ;;  %v766_v21 = vrot.slane %v730_v14, 6 }
 0x73a   :  { %v776_v20 = vrot.slane %v732_v17, 6 }
 0x73b   :  { %744 = vrot.lane.b32.xlu0 %v735_v18, %s6717_s0  ;;  %v737_v23 = vadd.f32 %v735_v18, %v7124_v2  ;;  %v768_v24 = vadd.f32 %v766_v21, %v7129_v10 }
 0x73c   :  { %785 = vrot.lane.b32.xlu1 %v776_v20, %s6717_s0  ;;  %v778_v48 = vadd.f32 %v776_v20, %v7135_v30 }
 0x73d   :  { %v5231_v25 = vmul.f32 -1.442695, %v737_v23  ;;  %v5232_v26 = vmul.f32 -1.442695, %v768_v24 }
 0x73e   :  { %v5233_v52 = vmul.f32 -1.442695, %v778_v48 }
 0x73f   :  { %6182 = vpow2.f32 %v5231_v25 }
 0x740   :  { %6184 = vpow2.f32 %v5232_v26 }
 0x749   :  { %v6183_v27 = vpop.eup %6182 }
 0x74a   :  { %v6185_v28 = vpop.eup %6184  ;;  %v741_v29 = vadd.f32 1.0, %v6183_v27 }
 0x74b   :  { %v772_v33 = vadd.f32 1.0, %v6185_v28 }
 0x74c   :  { %6186 = vrcp.f32 %v741_v29 }
 0x74d   :  { %6188 = vrcp.f32 %v772_v33 }
 0x756   :  { %v6187_v34 = vpop.eup %6186 }
 0x757   :  { %v6189_v37 = vpop.eup %6188  ;;  %v754_v12 = vsub.f32 1.0, %v6187_v34 }
 0x7ad   :  { %v745_v36 = vpop.permute.xlu0 %744 }
 0x7ae   :  { %v747_v38 = vmul.f32 %v6187_v34, %v745_v36  ;;  %v786_v39 = vpop.permute.xlu1 %785 }
 0x7af   :  { %v788_v40 = vmul.f32 %v6189_v37, %v786_v39 }
 0x7b0   :  { %749 = vrot.lane.b32.xlu0 %v747_v38, %s6717_s0 }
 0x7b1   :  { %790 = vrot.lane.b32.xlu1 %v788_v40, %s6717_s0 }
 0x7b4   :  { %801 = vrot.lane.b32.xlu0 %v658_v9, %s6720_s21 }
 0x7b8   :  { %761 = vrot.lane.b32.xlu0 %v760_v41, %s6721_s25 }
 0x822   :  { %v750_v42 = vpop.permute.xlu0 %749 }
 0x823   :  { %v791_v43 = vpop.permute.xlu1 %790  ;;  %v752_v45 = vadd.f32 %v750_v42, %v7124_v2 }
 0x824   :  { %v793_v44 = vadd.f32 %v791_v43, %v7135_v30 }
 0x826   :  { %6190 = vtanh.f32 %v793_v44  ;;  %v802_v62 = vpop.permute.xlu0 %801 }
 0x827   :  { %6192 = vtanh.f32 %v752_v45 }
 0x828   :  { %6194 = vpow2.f32 %v5233_v52 }
 0x82a   :  { %v762_v6 = vpop.permute.xlu0 %761 }
 0x82b   :  { %v764_v14 = vmul.f32 %v6187_v34, %v762_v6 }
 0x830   :  { %v6191_v46 = vpop.eup %6190 }
 0x831   :  { %797 = vrot.lane.b32.xlu1 %v6191_v46, %s6720_s21  ;;  %v6193_v47 = vpop.eup %6192 }
 0x832   :  { %v6195_v56 = vpop.eup %6194 }
 0x833   :  { %v782_v57 = vadd.f32 1.0, %v6195_v56 }
 0x835   :  { %756 = vrot.lane.b32.xlu1 %v6193_v47, %s6720_s21  ;;  %6196 = vrcp.f32 %v782_v57 }
 0x83f   :  { %v6197_v61 = vpop.eup %6196 }
 0x840   :  { %v795_v63 = vsub.f32 1.0, %v6197_v61  ;;  %v804_v3 = vmul.f32 %v6197_v61, %v802_v62 }
 0x8a3   :  { %v798_v0 = vpop.permute.xlu1 %797 }
 0x8a4   :  { %v800_v5 = vmul.f32 %v798_v0, %v795_v63 }
 0x8a6   :  { %v7209_v9 = vadd.f32 %v804_v3, %v800_v5 }
 0x8a7   :  { %v757_v13 = vpop.permute.xlu1 %756 }
 0x8a8   :  { %v759_v15 = vmul.f32 %v757_v13, %v754_v12  ;;  %v811_v17 = vrot.slane %v7209_v9, 6 }
 0x8aa   :  { %v765_v18 = vadd.f32 %v764_v14, %v759_v15  ;;  %812 = vrot.lane.b32.xlu0 %v811_v17, %s6721_s25 }
 0x8ac   :  { %807 = vrot.lane.b32.xlu1 %v765_v18, %s6720_s21 }
 0x91c   :  { %v813_v20 = vpop.permute.xlu0 %812 }
 0x91e   :  { %v7214_v21 = vpop.permute.xlu1 %807 }
 0x91f   :  { %v815_v23 = vsel %vm500_vm4, %v7214_v21, %v813_v20 }
 0x920   :  { %v817_v24 = vrot.slane %v815_v23, 4  ;;  %v917_v47 = vrot.slane %v815_v23, 6 }
 0x922   :  { %5234 = vmatmul.mubr.msk.f32.vlgmr.msra.gmra.mrb[6].mxu0 %vm353_vm5, %v817_v24 }
 0x923   :  { %5691 = vmatpush1.bf16.msra.mxu0 %v6995_v11  ;;  %1190 = vmatprep.mubr.f32.mxu0 %v6716_v1 }
 0x924   :  { %5693 = vmatprep.subr.bf16.mxu0 %v7009_v16 }
 0x927   :  { %5695 = vmatpush1.bf16.msra.mxu0 %v7018_v19 }
 0x928   :  { %5697 = vmatprep.subr.bf16.mxu0 %v7028_v22 }
 0x92b   :  { %5699 = vmatpush1.bf16.msra.mxu0 %v7050_v31 }
 0x92c   :  { %5701 = vmatprep.subr.bf16.mxu0 %v7054_v32 }
 0x92f   :  { %5703 = vmatpush1.bf16.msra.mxu0 %v7064_v35 }
 0x930   :  { %5721 = vmatprep.subr.bf16.mxu0 %v6984_v7 }
 0x9f5   :  { %v886_v25 = vpop.f32.mrb[6].mxu0 }
 0x9f6   :  { %v887_v26 = vadd.f32 %v886_v25, %v7110_v54  ;;  %v888_v27 = vpop.f32.mrb[7].mxu0 }
 0x9f7   :  { %v889_v28 = vadd.f32 %v888_v27, %v7113_v55 }
 0x9f8   :  { %v892_v29 = vrot.slane %v887_v26, 2  ;;  %v923_v33 = vadd.f32 %v887_v26, %v7129_v10 }
 0x9f9   :  { %938 = vrot.lane.b32.xlu1 %v889_v28, %s6717_s0  ;;  %v930_v63 = vadd.f32 %v889_v28, %v7135_v30 }
 0x9fa   :  { %901 = vrot.lane.b32.xlu0 %v892_v29, %s6717_s0  ;;  %v894_v34 = vadd.f32 %v892_v29, %v7124_v2  ;;  %v5236_v36 = vmul.f32 -1.442695, %v923_v33 }
 0x9fb   :  { %v5237_v0 = vmul.f32 -1.442695, %v930_v63 }
 0x9fc   :  { %v5235_v37 = vmul.f32 -1.442695, %v894_v34  ;;  %6198 = vpow2.f32 %v5236_v36 }
 0x9fe   :  { %6200 = vpow2.f32 %v5235_v37 }
 0xa06   :  { %v6199_v7 = vpop.eup %6198 }
 0xa07   :  { %v927_v39 = vadd.f32 1.0, %v6199_v7 }
 0xa08   :  { %v6201_v38 = vpop.eup %6200 }
 0xa09   :  { %v898_v40 = vadd.f32 1.0, %v6201_v38  ;;  %6202 = vrcp.f32 %v927_v39 }
 0xa0b   :  { %6204 = vrcp.f32 %v898_v40 }
 0xa13   :  { %v6203_v41 = vpop.eup %6202 }
 0xa15   :  { %v6205_v43 = vpop.eup %6204 }
 0xa16   :  { %v911_v23 = vsub.f32 1.0, %v6205_v43 }
 0xa6b   :  { %v939_v42 = vpop.permute.xlu1 %938 }
 0xa6c   :  { %v941_v44 = vmul.f32 %v6203_v41, %v939_v42  ;;  %v902_v45 = vpop.permute.xlu0 %901 }
 0xa6d   :  { %v904_v46 = vmul.f32 %v6205_v43, %v902_v45 }
 0xa6e   :  { %943 = vrot.lane.b32.xlu1 %v941_v44, %s6717_s0 }
 0xa6f   :  { %906 = vrot.lane.b32.xlu0 %v904_v46, %s6717_s0 }
 0xa73   :  { %954 = vrot.lane.b32.xlu0 %v817_v24, %s6720_s21 }
 0xa77   :  { %918 = vrot.lane.b32.xlu0 %v917_v47, %s6721_s25 }
 0xae0   :  { %v944_v48 = vpop.permute.xlu1 %943 }
 0xae1   :  { %v946_v52 = vadd.f32 %v944_v48, %v7135_v30  ;;  %v907_v56 = vpop.permute.xlu0 %906 }
 0xae2   :  { %v909_v57 = vadd.f32 %v907_v56, %v7124_v2 }
 0xae3   :  { %6206 = vtanh.f32 %v946_v52 }
 0xae4   :  { %6208 = vtanh.f32 %v909_v57 }
 0xae5   :  { %6210 = vpow2.f32 %v5237_v0  ;;  %v955_v12 = vpop.permute.xlu0 %954 }
 0xae9   :  { %v919_v18 = vpop.permute.xlu0 %918 }
 0xaea   :  { %v921_v25 = vmul.f32 %v6205_v43, %v919_v18 }
 0xaed   :  { %v6207_v61 = vpop.eup %6206 }
 0xaee   :  { %950 = vrot.lane.b32.xlu1 %v6207_v61, %s6720_s21  ;;  %v6209_v62 = vpop.eup %6208 }
 0xaef   :  { %v6211_v3 = vpop.eup %6210 }
 0xaf0   :  { %v934_v5 = vadd.f32 1.0, %v6211_v3 }
 0xaf2   :  { %913 = vrot.lane.b32.xlu1 %v6209_v62, %s6720_s21  ;;  %6212 = vrcp.f32 %v934_v5 }
 0xafc   :  { %v6213_v6 = vpop.eup %6212 }
 0xafd   :  { %v948_v13 = vsub.f32 1.0, %v6213_v6  ;;  %v957_v15 = vmul.f32 %v6213_v6, %v955_v12 }
 0xb60   :  { %v951_v14 = vpop.permute.xlu1 %950 }
 0xb61   :  { %v953_v17 = vmul.f32 %v951_v14, %v948_v13 }
 0xb63   :  { %v7243_v20 = vadd.f32 %v957_v15, %v953_v17 }
 0xb64   :  { %v914_v24 = vpop.permute.xlu1 %913 }
 0xb65   :  { %v916_v26 = vmul.f32 %v914_v24, %v911_v23  ;;  %v964_v30 = vrot.slane %v7243_v20, 2 }
 0xb67   :  { %v922_v27 = vadd.f32 %v921_v25, %v916_v26  ;;  %965 = vrot.lane.b32.xlu0 %v964_v30, %s6721_s25 }
 0xb69   :  { %960 = vrot.lane.b32.xlu1 %v922_v27, %s6720_s21 }
 0xbd9   :  { %v966_v28 = vpop.permute.xlu0 %965 }
 0xbdb   :  { %v7248_v29 = vpop.permute.xlu1 %960 }
 0xbdc   :  { %v968_v33 = vsel %vm500_vm4, %v7248_v29, %v966_v28 }
 0xbdd   :  { %v970_v34 = vrot.slane %v968_v33, 6 }
 0xbdf   :  { %5238 = vmatmul.mubr.msk.f32.vlgmr.msra.gmra.mrb[4].mxu1 %vm353_vm5, %v970_v34 }
 0xbe0   :  { %5707 = vmatpush1.bf16.msra.mxu1 %v6995_v11  ;;  %1348 = vmatprep.mubr.f32.mxu1 %v6716_v1 }
 0xbe1   :  { %5709 = vmatprep.subr.bf16.mxu1 %v7009_v16 }
 0xbe4   :  { %5711 = vmatpush1.bf16.msra.mxu1 %v7018_v19 }
 0xbe5   :  { %5713 = vmatprep.subr.bf16.mxu1 %v7028_v22 }
 0xbe8   :  { %5715 = vmatpush1.bf16.msra.mxu1 %v7050_v31 }
 0xbe9   :  { %5717 = vmatprep.subr.bf16.mxu1 %v7054_v32 }
 0xbec   :  { %5719 = vmatpush1.bf16.msra.mxu1 %v7064_v35 }
 0xcb2   :  { %v1039_v36 = vpop.f32.mrb[4].mxu1 }
 0xcb3   :  { %v1040_v37 = vadd.f32 %v1039_v36, %v7110_v54  ;;  %v1041_v7 = vpop.f32.mrb[5].mxu1 }
 0xcb4   :  { %v1042_v38 = vadd.f32 %v1041_v7, %v7113_v55 }
 0xcb5   :  { %1052 = vrot.lane.b32.xlu0 %v1040_v37, %s6717_s0  ;;  %v1073_v40 = vrot.slane %v1040_v37, 2  ;;  %v1044_v41 = vadd.f32 %v1040_v37, %v7129_v10 }
 0xcb6   :  { %v1083_v39 = vrot.slane %v1042_v38, 2 }
 0xcb7   :  { %v1075_v42 = vadd.f32 %v1073_v40, %v7124_v2  ;;  %v5239_v43 = vmul.f32 -1.442695, %v1044_v41 }
 0xcb8   :  { %1092 = vrot.lane.b32.xlu1 %v1083_v39, %s6717_s0  ;;  %v1085_v14 = vadd.f32 %v1083_v39, %v7126_v4 }
 0xcb9   :  { %v5240_v44 = vmul.f32 -1.442695, %v1075_v42  ;;  %6214 = vpow2.f32 %v5239_v43 }
 0xcba   :  { %v5241_v15 = vmul.f32 -1.442695, %v1085_v14 }
 0xcbb   :  { %6216 = vpow2.f32 %v5240_v44 }
 0xcc3   :  { %v6215_v45 = vpop.eup %6214 }
 0xcc4   :  { %v1048_v47 = vadd.f32 1.0, %v6215_v45 }
 0xcc5   :  { %v6217_v46 = vpop.eup %6216 }
 0xcc6   :  { %v1079_v48 = vadd.f32 1.0, %v6217_v46  ;;  %6218 = vrcp.f32 %v1048_v47 }
 0xcc8   :  { %6220 = vrcp.f32 %v1079_v48 }
 0xcd0   :  { %v6219_v52 = vpop.eup %6218 }
 0xcd2   :  { %v6221_v61 = vpop.eup %6220 }
 0xd27   :  { %v1053_v56 = vpop.permute.xlu0 %1052 }
 0xd28   :  { %v1055_v57 = vmul.f32 %v6219_v52, %v1053_v56 }
 0xd2a   :  { %v1093_v62 = vpop.permute.xlu1 %1092  ;;  %1057 = vrot.lane.b32.xlu0 %v1055_v57, %s6717_s0 }
 0xd2b   :  { %v1095_v63 = vmul.f32 %v6221_v61, %v1093_v62 }
 0xd2d   :  { %1097 = vrot.lane.b32.xlu1 %v1095_v63, %s6717_s0 }
 0xd2e   :  { %1108 = vrot.lane.b32.xlu0 %v968_v33, %s6720_s21 }
 0xd32   :  { %1068 = vrot.lane.b32.xlu0 %v970_v34, %s6721_s25  ;;  %v1062_v34 = vsub.f32 1.0, %v6219_v52 }
 0xd9c   :  { %v1058_v0 = vpop.permute.xlu0 %1057 }
 0xd9d   :  { %v1060_v6 = vadd.f32 %v1058_v0, %v7129_v10 }
 0xd9f   :  { %v1098_v3 = vpop.permute.xlu1 %1097 }
 0xda0   :  { %v1100_v5 = vadd.f32 %v1098_v3, %v7126_v4  ;;  %v1109_v24 = vpop.permute.xlu0 %1108 }
 0xda2   :  { %6222 = vtanh.f32 %v1100_v5 }
 0xda3   :  { %6224 = vtanh.f32 %v1060_v6 }
 0xda4   :  { %6226 = vpow2.f32 %v5241_v15  ;;  %v1069_v28 = vpop.permute.xlu0 %1068 }
 0xda5   :  { %v1071_v37 = vmul.f32 %v6219_v52, %v1069_v28 }
 0xdac   :  { %v6223_v12 = vpop.eup %6222 }
 0xdad   :  { %1104 = vrot.lane.b32.xlu1 %v6223_v12, %s6720_s21  ;;  %v6225_v13 = vpop.eup %6224 }
 0xdae   :  { %v6227_v17 = vpop.eup %6226 }
 0xdaf   :  { %v1089_v18 = vadd.f32 1.0, %v6227_v17 }
 0xdb1   :  { %1064 = vrot.lane.b32.xlu1 %v6225_v13, %s6720_s21  ;;  %6228 = vrcp.f32 %v1089_v18 }
 0xdbb   :  { %v6229_v23 = vpop.eup %6228 }
 0xdbc   :  { %v1102_v25 = vsub.f32 1.0, %v6229_v23  ;;  %v1111_v30 = vmul.f32 %v6229_v23, %v1109_v24 }
 0xe1f   :  { %v1105_v26 = vpop.permute.xlu1 %1104 }
 0xe20   :  { %v1107_v27 = vmul.f32 %v1105_v26, %v1102_v25 }
 0xe22   :  { %v7276_v33 = vadd.f32 %v1111_v30, %v1107_v27 }
 0xe23   :  { %v1065_v36 = vpop.permute.xlu1 %1064 }
 0xe24   :  { %v1067_v7 = vmul.f32 %v1065_v36, %v1062_v34  ;;  %v1118_v38 = vrot.slane %v7276_v33, 6 }
 0xe26   :  { %v1072_v39 = vadd.f32 %v1071_v37, %v1067_v7  ;;  %1119 = vrot.lane.b32.xlu0 %v1118_v38, %s6721_s25 }
 0xe28   :  { %1114 = vrot.lane.b32.xlu1 %v1072_v39, %s6720_s21 }
 0xe98   :  { %v1120_v40 = vpop.permute.xlu0 %1119 }
 0xe9a   :  { %v7281_v41 = vpop.permute.xlu1 %1114 }
 0xe9b   :  { %v1122_v42 = vsel %vm500_vm4, %v7281_v41, %v1120_v40 }
 0xe9c   :  { %5242 = vmatmul.mubr.msk.f32.vlgmr.msra.gmra.mrb[8].mxu0 %vm353_vm5, %v1122_v42  ;;  %v1264_v5 = vrot.slane %v1122_v42, 4  ;;  %v1223_v6 = vrot.slane %v1122_v42, 6 }
 0xe9d   :  { %5723 = vmatpush1.bf16.msra.mxu0 %v6995_v11  ;;  %1505 = vmatprep.mubr.f32.mxu0 %v6716_v1 }
 0xe9e   :  { %5725 = vmatprep.subr.bf16.mxu0 %v7009_v16 }
 0xea1   :  { %5727 = vmatpush1.bf16.msra.mxu0 %v7018_v19 }
 0xea2   :  { %5729 = vmatprep.subr.bf16.mxu0 %v7028_v22 }
 0xea5   :  { %5731 = vmatpush1.bf16.msra.mxu0 %v7050_v31 }
 0xea6   :  { %5733 = vmatprep.subr.bf16.mxu0 %v7054_v32 }
 0xea9   :  { %5735 = vmatpush1.bf16.msra.mxu0 %v7064_v35 }
 0xf6f   :  { %v1192_v43 = vpop.f32.mrb[8].mxu0 }
 0xf70   :  { %v1193_v44 = vadd.f32 %v1192_v43, %v7110_v54  ;;  %v1194_v45 = vpop.f32.mrb[9].mxu0 }
 0xf71   :  { %v1195_v11 = vadd.f32 %v1194_v45, %v7113_v55 }
 0xf72   :  { %v1198_v46 = vrot.slane %v1193_v44, 6  ;;  %v1229_v16 = vrot.slane %v1193_v44, 4 }
 0xf73   :  { %v1239_v47 = vrot.slane %v1195_v11, 4 }
 0xf74   :  { %1207 = vrot.lane.b32.xlu0 %v1198_v46, %s6717_s0  ;;  %v1200_v19 = vadd.f32 %v1198_v46, %v7129_v10  ;;  %v1231_v22 = vadd.f32 %v1229_v16, %v7124_v2 }
 0xf75   :  { %1248 = vrot.lane.b32.xlu1 %v1239_v47, %s6717_s0  ;;  %v1241_v23 = vadd.f32 %v1239_v47, %v7126_v4 }
 0xf76   :  { %v5243_v31 = vmul.f32 -1.442695, %v1200_v19  ;;  %v5244_v32 = vmul.f32 -1.442695, %v1231_v22 }
 0xf77   :  { %v5245_v24 = vmul.f32 -1.442695, %v1241_v23 }
 0xf78   :  { %6230 = vpow2.f32 %v5243_v31 }
 0xf79   :  { %6232 = vpow2.f32 %v5244_v32 }
 0xf82   :  { %v6231_v35 = vpop.eup %6230 }
 0xf83   :  { %v6233_v48 = vpop.eup %6232  ;;  %v1204_v52 = vadd.f32 1.0, %v6231_v35 }
 0xf84   :  { %v1235_v56 = vadd.f32 1.0, %v6233_v48 }
 0xf85   :  { %6234 = vrcp.f32 %v1204_v52 }
 0xf86   :  { %6236 = vrcp.f32 %v1235_v56 }
 0xf8f   :  { %v6235_v57 = vpop.eup %6234 }
 0xf90   :  { %v6237_v62 = vpop.eup %6236  ;;  %v1217_v39 = vsub.f32 1.0, %v6235_v57 }
 0xfe6   :  { %v1208_v61 = vpop.permute.xlu0 %1207 }
 0xfe7   :  { %v1210_v63 = vmul.f32 %v6235_v57, %v1208_v61  ;;  %v1249_v0 = vpop.permute.xlu1 %1248 }
 0xfe8   :  { %v1251_v3 = vmul.f32 %v6237_v62, %v1249_v0 }
 0xfe9   :  { %1212 = vrot.lane.b32.xlu0 %v1210_v63, %s6717_s0 }
 0xfea   :  { %1253 = vrot.lane.b32.xlu1 %v1251_v3, %s6717_s0 }
 0xfed   :  { %1265 = vrot.lane.b32.xlu0 %v1264_v5, %s6720_s21 }
 0xff1   :  { %1224 = vrot.lane.b32.xlu0 %v1223_v6, %s6721_s25 }
0x105b   :  { %v1213_v12 = vpop.permute.xlu0 %1212 }
0x105c   :  { %v1254_v13 = vpop.permute.xlu1 %1253  ;;  %v1215_v15 = vadd.f32 %v1213_v12, %v7129_v10 }
0x105d   :  { %v1256_v14 = vadd.f32 %v1254_v13, %v7126_v4 }
0x105f   :  { %6238 = vtanh.f32 %v1256_v14  ;;  %v1266_v27 = vpop.permute.xlu0 %1265 }
0x1060   :  { %6240 = vtanh.f32 %v1215_v15 }
0x1061   :  { %6242 = vpow2.f32 %v5245_v24 }
0x1063   :  { %v1225_v7 = vpop.permute.xlu0 %1224 }
0x1064   :  { %v1227_v42 = vmul.f32 %v6235_v57, %v1225_v7 }
0x1069   :  { %v6239_v17 = vpop.eup %6238 }
0x106a   :  { %1260 = vrot.lane.b32.xlu1 %v6239_v17, %s6720_s21  ;;  %v6241_v18 = vpop.eup %6240 }
0x106b   :  { %v6243_v25 = vpop.eup %6242 }
0x106c   :  { %v1245_v26 = vadd.f32 1.0, %v6243_v25 }
0x106e   :  { %1219 = vrot.lane.b32.xlu1 %v6241_v18, %s6720_s21  ;;  %6244 = vrcp.f32 %v1245_v26 }
0x1078   :  { %v6245_v30 = vpop.eup %6244 }
0x1079   :  { %v1258_v28 = vsub.f32 1.0, %v6245_v30  ;;  %v1268_v36 = vmul.f32 %v6245_v30, %v1266_v27 }
0x10dc   :  { %v1261_v34 = vpop.permute.xlu1 %1260 }
0x10dd   :  { %v1263_v37 = vmul.f32 %v1261_v34, %v1258_v28 }
0x10df   :  { %v7309_v38 = vadd.f32 %v1268_v36, %v1263_v37 }
0x10e0   :  { %v1220_v40 = vpop.permute.xlu1 %1219 }
0x10e1   :  { %v1222_v43 = vmul.f32 %v1220_v40, %v1217_v39  ;;  %v1275_v44 = vrot.slane %v7309_v38, 2 }
0x10e3   :  { %v1228_v45 = vadd.f32 %v1227_v42, %v1222_v43  ;;  %1276 = vrot.lane.b32.xlu0 %v1275_v44, %s6721_s25 }
0x10e5   :  { %1271 = vrot.lane.b32.xlu1 %v1228_v45, %s6720_s21 }
0x1155   :  { %v1277_v11 = vpop.permute.xlu0 %1276 }
0x1157   :  { %v7314_v46 = vpop.permute.xlu1 %1271 }
0x1158   :  { %v1279_v47 = vsel %vm500_vm4, %v7314_v46, %v1277_v11 }
0x1159   :  { %v1281_v16 = vrot.slane %v1279_v47, 2  ;;  %v1381_v18 = vrot.slane %v1279_v47, 6 }
0x115b   :  { %5246 = vmatmul.mubr.msk.f32.vlgmr.msra.gmra.mrb[6].mxu1 %vm353_vm5, %v1281_v16 }
0x115c   :  { %1738 = vmatprep.mubr.f32.mxu1 %v6716_v1 }
0x122e   :  { %v1350_v19 = vpop.f32.mrb[6].mxu1 }
0x122f   :  { %v1351_v22 = vadd.f32 %v1350_v19, %v7110_v54  ;;  %v1352_v31 = vpop.f32.mrb[7].mxu1 }
0x1230   :  { %v1353_v32 = vadd.f32 %v1352_v31, %v7113_v55 }
0x1231   :  { %v1356_v35 = vrot.slane %v1351_v22, 4  ;;  %v1387_v52 = vrot.slane %v1351_v22, 6 }
0x1232   :  { %v1397_v48 = vrot.slane %v1353_v32, 6 }
0x1233   :  { %1365 = vrot.lane.b32.xlu0 %v1356_v35, %s6717_s0  ;;  %v1358_v56 = vadd.f32 %v1356_v35, %v7129_v10  ;;  %v1389_v57 = vadd.f32 %v1387_v52, %v7124_v2 }
0x1234   :  { %1406 = vrot.lane.b32.xlu1 %v1397_v48, %s6717_s0  ;;  %v1399_v28 = vadd.f32 %v1397_v48, %v7126_v4 }
0x1235   :  { %v5247_v61 = vmul.f32 -1.442695, %v1358_v56  ;;  %v5248_v62 = vmul.f32 -1.442695, %v1389_v57 }
0x1236   :  { %v5249_v34 = vmul.f32 -1.442695, %v1399_v28 }
0x1237   :  { %6246 = vpow2.f32 %v5247_v61 }
0x1238   :  { %6248 = vpow2.f32 %v5248_v62 }
0x1241   :  { %v6247_v63 = vpop.eup %6246 }
0x1242   :  { %v6249_v0 = vpop.eup %6248  ;;  %v1362_v3 = vadd.f32 1.0, %v6247_v63 }
0x1243   :  { %v1393_v5 = vadd.f32 1.0, %v6249_v0 }
0x1244   :  { %6250 = vrcp.f32 %v1362_v3 }
0x1245   :  { %6252 = vrcp.f32 %v1393_v5 }
0x124e   :  { %v6251_v6 = vpop.eup %6250 }
0x124f   :  { %v6253_v13 = vpop.eup %6252 }
0x12a5   :  { %v1366_v12 = vpop.permute.xlu0 %1365 }
0x12a6   :  { %v1368_v14 = vmul.f32 %v6251_v6, %v1366_v12  ;;  %v1407_v15 = vpop.permute.xlu1 %1406 }
0x12a7   :  { %v1409_v17 = vmul.f32 %v6253_v13, %v1407_v15 }
0x12a8   :  { %1370 = vrot.lane.b32.xlu0 %v1368_v14, %s6717_s0 }
0x12a9   :  { %1411 = vrot.lane.b32.xlu1 %v1409_v17, %s6717_s0 }
0x12ac   :  { %1422 = vrot.lane.b32.xlu0 %v1279_v47, %s6720_s21  ;;  %v1375_v47 = vsub.f32 1.0, %v6251_v6 }
0x12b0   :  { %1382 = vrot.lane.b32.xlu0 %v1381_v18, %s6721_s25 }
0x131a   :  { %v1371_v23 = vpop.permute.xlu0 %1370 }
0x131b   :  { %v1412_v24 = vpop.permute.xlu1 %1411  ;;  %v1373_v26 = vadd.f32 %v1371_v23, %v7129_v10 }
0x131c   :  { %v1414_v25 = vadd.f32 %v1412_v24, %v7126_v4 }
0x131e   :  { %6254 = vtanh.f32 %v1414_v25  ;;  %v1423_v39 = vpop.permute.xlu0 %1422 }
0x131f   :  { %6256 = vtanh.f32 %v1373_v26 }
0x1320   :  { %6258 = vpow2.f32 %v5249_v34 }
0x1322   :  { %v1383_v45 = vpop.permute.xlu0 %1382 }
0x1323   :  { %v1385_v19 = vmul.f32 %v6251_v6, %v1383_v45  ;;  %v1645_v45 = vld [vmem:[#allocation7 + $0x30] sm:$0xff] }
0x1328   :  { %v6255_v30 = vpop.eup %6254 }
0x1329   :  { %1418 = vrot.lane.b32.xlu1 %v6255_v30, %s6720_s21  ;;  %v6257_v27 = vpop.eup %6256 }
0x132a   :  { %v6259_v36 = vpop.eup %6258 }
0x132b   :  { %v1403_v37 = vadd.f32 1.0, %v6259_v36  ;;  %v1640_v36 = vld [vmem:[#allocation7 + $0x8] sm:$0xff] }
0x132d   :  { %1377 = vrot.lane.b32.xlu1 %v6257_v27, %s6720_s21  ;;  %6260 = vrcp.f32 %v1403_v37  ;;  %v1642_v37 = vld [vmem:[#allocation7 + $0x18] sm:$0xff] }
0x1337   :  { %v6261_v7 = vpop.eup %6260 }
0x1338   :  { %v1416_v40 = vsub.f32 1.0, %v6261_v7  ;;  %v1425_v43 = vmul.f32 %v6261_v7, %v1423_v39  ;;  %v1639_v7 = vld [vmem:[#allocation7] sm:$0xff]  ;;  %v7367_v39 = vpack.c.bf16 %v1642_v37, %v1640_v36  ;;  %v1636_v36 = vld [vmem:[#allocation5 + $0x68] sm:$0xff]  ;;  %v1638_v37 = vld [vmem:[#allocation5 + $0x78] sm:$0xff] }
0x133a   :  { %5753 = vmatprep.subr.bf16.mxu0 %v7367_v39 }
0x139b   :  { %v1419_v42 = vpop.permute.xlu1 %1418 }
0x139c   :  { %v1421_v44 = vmul.f32 %v1419_v42, %v1416_v40  ;;  %v1644_v40 = vld [vmem:[#allocation7 + $0x28] sm:$0xff]  ;;  %v1646_v42 = vld [vmem:[#allocation7 + $0x38] sm:$0xff] }
0x139e   :  { %v1426_v11 = vadd.f32 %v1425_v43, %v1421_v44  ;;  %v7371_v43 = vpack.c.bf16 %v1646_v42, %v1644_v40  ;;  %v1643_v44 = vld [vmem:[#allocation7 + $0x20] sm:$0xff]  ;;  %v1637_v40 = vld [vmem:[#allocation5 + $0x70] sm:$0xff] }
0x139f   :  { %v1378_v16 = vpop.permute.xlu1 %1377 }
0x13a0   :  { %v1380_v22 = vmul.f32 %v1378_v16, %v1375_v47  ;;  %v1432_v31 = vrot.slane %v1426_v11, 6  ;;  %v1650_v47 = vld [vmem:[#allocation7 + $0x58] sm:$0xff]  ;;  %v7376_v16 = vpack.c.bf16 %v1645_v45, %v1643_v44 }
0x13a2   :  { %v1386_v32 = vadd.f32 %v1385_v19, %v1380_v22  ;;  %1433 = vrot.lane.b32.xlu0 %v1432_v31, %s6721_s25  ;;  %v1647_v19 = vld [vmem:[#allocation7 + $0x40] sm:$0xff]  ;;  %v1649_v22 = vld [vmem:[#allocation7 + $0x50] sm:$0xff]  ;;  %v1652_v31 = vld [vmem:[#allocation7 + $0x68] sm:$0xff] }
0x13a4   :  { %1428 = vrot.lane.b32.xlu1 %v1386_v32, %s6720_s21 }
0x1414   :  { %v1434_v35 = vpop.permute.xlu0 %1433 }
0x1416   :  { %v7337_v48 = vpop.permute.xlu1 %1428 }
0x1417   :  { %v1436_v52 = vsel %vm500_vm4, %v7337_v48, %v1434_v35  ;;  %v1654_v35 = vld [vmem:[#allocation7 + $0x78] sm:$0xff] }
0x1418   :  { %v1438_v56 = vrot.slane %v1436_v52, 4  ;;  %v1538_v25 = vrot.slane %v1436_v52, 6  ;;  %v1624_v52 = vld [vmem:[#allocation5 + $0x8] sm:$0xff] }
0x141a   :  { %5250 = vmatmul.mubr.msk.f32.vlgmr.msra.gmra.mrb[10].mxu0 %vm353_vm5, %v1438_v56 }
0x141b   :  { %1826 = vmatprep.mubr.f32.mxu0 %v6716_v1 }
0x14ed   :  { %v1507_v57 = vpop.f32.mrb[10].mxu0 }
0x14ee   :  { %v1508_v61 = vadd.f32 %v1507_v57, %v7110_v54  ;;  %v1509_v62 = vpop.f32.mrb[11].mxu0 }
0x14ef   :  { %v7345_v63 = vadd.f32 %v1509_v62, %v7113_v55  ;;  %v1625_v62 = vld [vmem:[#allocation5 + $0x10] sm:$0xff] }
0x14f0   :  { %v1513_v0 = vrot.slane %v1508_v61, 2  ;;  %v1544_v3 = vadd.f32 %v1508_v61, %v7124_v2  ;;  %v1623_v61 = vld [vmem:[#allocation5] sm:$0xff] }
0x14f1   :  { %1559 = vrot.lane.b32.xlu1 %v7345_v63, %s6717_s0 }
0x14f2   :  { %1522 = vrot.lane.b32.xlu0 %v1513_v0, %s6717_s0  ;;  %v1515_v5 = vadd.f32 %v1513_v0, %v7129_v10  ;;  %v5252_v6 = vmul.f32 -1.442695, %v1544_v3  ;;  %v1628_v0 = vld [vmem:[#allocation5 + $0x28] sm:$0xff]  ;;  %v5738_v3 = vpack.c.bf16 %v1625_v62, %v1623_v61  ;;  %v1656_v61 = vld [vmem:[%s8086_s8] sm:$0x3] }
0x14f4   :  { %v5251_v12 = vmul.f32 -1.442695, %v1515_v5  ;;  %6262 = vpow2.f32 %v5252_v6  ;;  %v1630_v5 = vld [vmem:[#allocation5 + $0x38] sm:$0xff]  ;;  %v1627_v6 = vld [vmem:[#allocation5 + $0x20] sm:$0xff] }
0x14f6   :  { %6264 = vpow2.f32 %v5251_v12  ;;  %v1629_v12 = vld [vmem:[#allocation5 + $0x30] sm:$0xff] }
0x14fe   :  { %v6263_v13 = vpop.eup %6262 }
0x14ff   :  { %v1548_v14 = vadd.f32 1.0, %v6263_v13  ;;  %v7384_v13 = vpack.c.bf16 %v1649_v22, %v1647_v19 }
0x1500   :  { %v6265_v54 = vpop.eup %6264 }
0x1501   :  { %v1519_v15 = vadd.f32 1.0, %v6265_v54  ;;  %6266 = vrcp.f32 %v1548_v14  ;;  %v5740_v54 = vpack.c.bf16 %v1630_v5, %v1628_v0  ;;  %v1632_v14 = vld [vmem:[#allocation5 + $0x48] sm:$0xff]  ;;  %v7425_v0 = vrot.slane %v1656_v61, %v7107_v53 }
0x1503   :  { %6268 = vrcp.f32 %v1519_v15  ;;  %v1634_v15 = vld [vmem:[#allocation5 + $0x58] sm:$0xff] }
0x150b   :  { %v6267_v55 = vpop.eup %6266 }
0x150d   :  { %v7352_v18 = vpop.eup %6268 }
0x150e   :  { %v1532_v22 = vsub.f32 1.0, %v7352_v18 }
0x1563   :  { %v1560_v17 = vpop.permute.xlu1 %1559 }
0x1564   :  { %v1562_v23 = vmul.f32 %v6267_v55, %v1560_v17  ;;  %v1523_v24 = vpop.permute.xlu0 %1522  ;;  %v7387_v55 = vpack.c.bf16 %v1654_v35, %v1652_v31  ;;  %v1651_v17 = vld [vmem:[#allocation7 + $0x60] sm:$0xff] }
0x1565   :  { %v1525_v2 = vmul.f32 %v7352_v18, %v1523_v24  ;;  %v5742_v24 = vpack.c.bf16 %v1629_v12, %v1627_v6 }
0x1566   :  { %1564 = vrot.lane.b32.xlu1 %v1562_v23, %s6717_s0  ;;  %v1653_v23 = vld [vmem:[#allocation7 + $0x70] sm:$0xff] }
0x1567   :  { %1527 = vrot.lane.b32.xlu0 %v1525_v2, %s6717_s0  ;;  %v5744_v2 = vpack.c.bf16 %v1634_v15, %v1632_v14 }
0x156b   :  { %1575 = vrot.lane.b32.xlu0 %v1438_v56, %s6720_s21  ;;  %v1626_v56 = vld [vmem:[#allocation5 + $0x18] sm:$0xff] }
0x156c   :  { %v5736_v57 = vpack.c.bf16 %v1626_v56, %v1624_v52 }
0x156e   :  { %5737 = vmatprep.subr.bf16.mxu1 %v5736_v57 }
0x156f   :  { %1539 = vrot.lane.b32.xlu0 %v1538_v25, %s6721_s25  ;;  %5739 = vmatpush1.bf16.msra.mxu1 %v5738_v3  ;;  %v1631_v25 = vld [vmem:[#allocation5 + $0x40] sm:$0xff] }
0x1570   :  { %5741 = vmatprep.subr.bf16.mxu1 %v5740_v54 }
0x1573   :  { %1585 = vrot.lane.b32.xlu0 %v1426_v11, %s6721_s25  ;;  %v1648_v11 = vld [vmem:[#allocation7 + $0x48] sm:$0xff]  ;;  %5743 = vmatpush1.bf16.msra.mxu1 %v5742_v24 }
0x1574   :  { %v7379_v32 = vpack.c.bf16 %v1650_v47, %v1648_v11  ;;  %5745 = vmatprep.subr.bf16.mxu1 %v5744_v2 }
0x1577   :  { %1593 = vrot.lane.b32.xlu0 %v7276_v33, %s6721_s25  ;;  %v1641_v33 = vld [vmem:[#allocation7 + $0x10] sm:$0xff] }
0x157b   :  { %1601 = vrot.lane.b32.xlu0 %v7209_v9, %s6721_s25  ;;  %v7369_v9 = vpack.c.bf16 %v1641_v33, %v1639_v7  ;;  %v5748_v7 = vpack.c.bf16 %v1638_v37, %v1636_v36  ;;  %v1635_v33 = vld [vmem:[#allocation5 + $0x60] sm:$0xff] }
0x157c   :  { %v5750_v42 = vpack.c.bf16 %v1637_v40, %v1635_v33 }
0x157d   :  { %5755 = vmatpush1.bf16.msra.mxu0 %v7369_v9 }
0x157e   :  { %5757 = vmatprep.subr.bf16.mxu0 %v7371_v43 }
0x1581   :  { %5759 = vmatpush1.bf16.msra.mxu0 %v7376_v16 }
0x1582   :  { %5761 = vmatprep.subr.bf16.mxu0 %v7379_v32 }
0x1585   :  { %5763 = vmatpush1.bf16.msra.mxu0 %v7384_v13 }
0x1586   :  { %5765 = vmatprep.subr.bf16.mxu0 %v7387_v55 }
0x15d8   :  { %v1565_v26 = vpop.permute.xlu1 %1564 }
0x15d9   :  { %v1567_v30 = vadd.f32 %v1565_v26, %v7126_v4  ;;  %v1528_v27 = vpop.permute.xlu0 %1527  ;;  %v7392_v26 = vpack.c.bf16 %v1653_v23, %v1651_v17 }
0x15da   :  { %v1530_v28 = vadd.f32 %v1528_v27, %v7129_v10 }
0x15db   :  { %6270 = vtanh.f32 %v1567_v30  ;;  %5767 = vmatpush1.bf16.msra.mxu0 %v7392_v26 }
0x15dc   :  { %6272 = vtanh.f32 %v1530_v28  ;;  %5785 = vmatprep.subr.bf16.mxu0 %v7367_v39 }
0x15dd   :  { %v1576_v45 = vpop.permute.xlu0 %1575 }
0x15de   :  { %1827 = vmatmul.mubr.f32.vlgmr.msra.gmra.mrb[12].mxu0 %v6716_v1 }
0x15df   :  { %5787 = vmatpush1.bf16.msra.mxu0 %v7369_v9  ;;  %2131 = vmatprep.mubr.f32.mxu0 %v6716_v1 }
0x15e0   :  { %5789 = vmatprep.subr.bf16.mxu0 %v7371_v43 }
0x15e1   :  { %v1540_v47 = vpop.permute.xlu0 %1539 }
0x15e2   :  { %v1542_v35 = vmul.f32 %v7352_v18, %v1540_v47  ;;  %v7422_v18 = vrot.slane %v1656_v61, %v7104_v51 }
0x15e3   :  { %5791 = vmatpush1.bf16.msra.mxu0 %v7376_v16 }
0x15e4   :  { %5793 = vmatprep.subr.bf16.mxu0 %v7379_v32 }
0x15e5   :  { %v6271_v34 = vpop.eup %6270  ;;  %v1586_v62 = vpop.permute.xlu0 %1585 }
0x15e6   :  { %1571 = vrot.lane.b32.xlu1 %v6271_v34, %s6720_s21  ;;  %v6273_v10 = vpop.eup %6272  ;;  %v1588_v14 = vsel %vm500_vm4, %v7180_v8, %v1586_v62 }
0x15e7   :  { %5795 = vmatpush1.bf16.msra.mxu0 %v7384_v13 }
0x15e8   :  { %5797 = vmatprep.subr.bf16.mxu0 %v7387_v55 }
0x15ea   :  { %1534 = vrot.lane.b32.xlu1 %v6273_v10, %s6720_s21 }
0x15eb   :  { %5799 = vmatpush1.bf16.msra.mxu0 %v7392_v26 }
0x15ec   :  { %5817 = vmatprep.subr.bf16.mxu0 %v7367_v39 }
0x15ee   :  { %1589 = vrot.lane.b32.xlu1 %v7309_v38, %s6721_s25  ;;  %v1633_v38 = vld [vmem:[#allocation5 + $0x50] sm:$0xff] }
0x15ef   :  { %v5746_v30 = vpack.c.bf16 %v1633_v38, %v1631_v25 }
0x15f1   :  { %5747 = vmatpush1.bf16.msra.mxu1 %v5746_v30 }
0x15f2   :  { %1597 = vrot.lane.b32.xlu1 %v7243_v20, %s6721_s25  ;;  %v1551_v20 = vadd.f32 %v7345_v63, %v7126_v4  ;;  %5749 = vmatprep.subr.bf16.mxu1 %v5748_v7 }
0x15f4   :  { %v5253_v27 = vmul.f32 -1.442695, %v1551_v20 }
0x15f5   :  { %5751 = vmatpush1.bf16.msra.mxu1 %v5750_v42 }
0x15f6   :  { %6274 = vpow2.f32 %v5253_v27  ;;  %5769 = vmatprep.subr.bf16.mxu1 %v7367_v39 }
0x1600   :  { %v6275_v28 = vpop.eup %6274 }
0x1601   :  { %v1555_v34 = vadd.f32 1.0, %v6275_v28 }
0x1603   :  { %6276 = vrcp.f32 %v1555_v34 }
0x160d   :  { %v6277_v44 = vpop.eup %6276 }
0x160e   :  { %v1569_v11 = vsub.f32 1.0, %v6277_v44  ;;  %v1578_v4 = vmul.f32 %v6277_v44, %v1576_v45 }
0x1658   :  { %v1572_v10 = vpop.permute.xlu1 %1571 }
0x1659   :  { %v1574_v63 = vmul.f32 %v1572_v10, %v1569_v11 }
0x165b   :  { %v1579_v19 = vadd.f32 %v1578_v4, %v1574_v63 }
0x165c   :  { %v1535_v31 = vpop.permute.xlu1 %1534 }
0x165d   :  { %v1537_v52 = vmul.f32 %v1535_v31, %v1532_v22  ;;  %1581 = vrot.lane.b32.xlu1 %v1579_v19, %s6721_s25 }
0x165f   :  { %v1543_v56 = vadd.f32 %v1542_v35, %v1537_v52 }
0x1660   :  { %v1590_v57 = vpop.permute.xlu1 %1589 }
0x1661   :  { %1605 = vrot.lane.b32.xlu1 %v7175_v59, %s6721_s25  ;;  %1610 = vrot.lane.b32.xlu0 %v1543_v56, %s6720_s21  ;;  %v1594_v59 = vpop.permute.xlu0 %1593  ;;  %v1592_v23 = vsel %vm500_vm4, %v7214_v21, %v1590_v57 }
0x1662   :  { %v1596_v2 = vsel %vm500_vm4, %v7248_v29, %v1594_v59 }
0x1664   :  { %v1598_v3 = vpop.permute.xlu1 %1597 }
0x1665   :  { %1613 = vrot.lane.b32.xlu1 %v7142_v58, %s6721_s25  ;;  %v1602_v8 = vpop.permute.xlu0 %1601  ;;  %v1600_v30 = vsel %vm500_vm4, %v7281_v41, %v1598_v3 }
0x1666   :  { %v1604_v29 = vsel %vm500_vm4, %v7314_v46, %v1602_v8  ;;  %v1655_v46 = vld [vmem:[%s8085_s7] sm:$0x3]  ;;  %s6723_s7 = smov 56  }
0x1667   :  { %v1620_v20 = vsel %vm216_vm0, %v1600_v30, %v1604_v29  ;;  %v1665_v37 = vrot.slane %v1655_v46, %v7107_v53 }
0x16b1   :  { %v1828_v5 = vpop.f32.mrb[12].mxu0 }
0x16b2   :  { %v1829_v6 = vadd.f32 %v1828_v5, %v7422_v18  ;;  %v1830_v12 = vpop.f32.mrb[13].mxu0 }
0x16b3   :  { %v7429_v58 = vadd.f32 %v1830_v12, %v7425_v0 }
0x16b4   :  { %1841 = vrot.lane.b32.xlu1 %v1829_v6, %s6717_s0  ;;  %v1859_v10 = vrot.slane %v1829_v6, 2 }
0x16b5   :  { %v1869_v17 = vrot.slane %v7429_v58, 2 }
0x16b7   :  { %1878 = vrot.lane.b32.xlu0 %v1869_v17, %s6717_s0 }
0x16cf   :  { %v1582_v54 = vpop.permute.xlu1 %1581 }
0x16d0   :  { %v1584_v15 = vsel %vm500_vm4, %v7146_v60, %v1582_v54 }
0x16d1   :  { %v1617_v24 = vsel %vm216_vm0, %v1584_v15, %v1588_v14 }
0x16d2   :  { %v1618_v25 = vsel %vm218_vm1, %v1617_v24, %v1592_v23 }
0x16d3   :  { %v1606_v38 = vpop.permute.xlu1 %1605  ;;  %v1619_v60 = vsel %vm220_vm2, %v1618_v25, %v1596_v2  ;;  %v1611_v27 = vpop.permute.xlu0 %1610 }
0x16d4   :  { %5254 = vmatmul.mubr.msk.f32.vlgmr.msra.gmra.mrb[8].mxu1 %vm353_vm5, %v1619_v60  ;;  %v1608_v21 = vsel %vm500_vm4, %v7337_v48, %v1606_v38  ;;  %v1661_v48 = vrot.slane %v1655_v46, %v7104_v51 }
0x16d5   :  { %1744 = vmatprep.mubr.f32.mxu1 %v6716_v1  ;;  %5771 = vmatpush1.bf16.msra.mxu1 %v7369_v9  ;;  %v1621_v41 = vsel %vm218_vm1, %v1620_v20, %v1608_v21 }
0x16d6   :  { %5773 = vmatprep.subr.bf16.mxu1 %v7371_v43 }
0x16d7   :  { %v1614_v28 = vpop.permute.xlu1 %1613 }
0x16d8   :  { %v1616_v34 = vsel %vm500_vm4, %v1611_v27, %v1614_v28 }
0x16d9   :  { %v1622_v36 = vsel %vm220_vm2, %v1621_v41, %v1616_v34  ;;  %5775 = vmatpush1.bf16.msra.mxu1 %v7376_v16 }
0x16da   :  { %5255 = vmatmul.mubr.msk.f32.gmra.mrb[10].mxu1 %vm353_vm5, %v1622_v36  ;;  %5777 = vmatprep.subr.bf16.mxu1 %v7379_v32 }
0x16db   :  { %1973 = vmatprep.mubr.f32.mxu1 %v6716_v1 }
0x16dd   :  { %5779 = vmatpush1.bf16.msra.mxu1 %v7384_v13 }
0x16de   :  { %5781 = vmatprep.subr.bf16.mxu1 %v7387_v55 }
0x16e1   :  { %5783 = vmatpush1.bf16.msra.mxu1 %v7392_v26 }
0x16e2   :  { %5801 = vmatprep.subr.bf16.mxu1 %v7367_v39 }
0x1726   :  { %v1842_v56 = vpop.permute.xlu1 %1841 }
0x1729   :  { %v1879_v62 = vpop.permute.xlu0 %1878 }
0x17a7   :  { %v1740_v7 = vpop.f32.mrb[8].mxu1 }
0x17a8   :  { %v7474_v33 = vadd.f32 %v1740_v7, %v1661_v48  ;;  %v1742_v40 = vpop.f32.mrb[9].mxu1 }
0x17a9   :  { %v7476_v42 = vadd.f32 %v1742_v40, %v1665_v37 }
0x17aa   :  { %v1833_v44 = vadd.f32 %v1829_v6, %v7474_v33 }
0x17ac   :  { %v5256_v45 = vmul.f32 -1.442695, %v1833_v44 }
0x17ad   :  { %v1746_v11 = vpop.f32.mrb[10].mxu1 }
0x17ae   :  { %v7479_v4 = vadd.f32 %v1746_v11, %v1661_v48  ;;  %v1748_v63 = vpop.f32.mrb[11].mxu1  ;;  %6278 = vpow2.f32 %v5256_v45 }
0x17af   :  { %v7485_v12 = vadd.f32 %v1748_v63, %v1665_v37 }
0x17b0   :  { %v1861_v47 = vadd.f32 %v1859_v10, %v7479_v4 }
0x17b1   :  { %v1871_v24 = vadd.f32 %v1869_v17, %v7485_v12 }
0x17b2   :  { %v5257_v19 = vmul.f32 -1.442695, %v1861_v47 }
0x17b3   :  { %v5258_v2 = vmul.f32 -1.442695, %v1871_v24 }
0x17b4   :  { %6280 = vpow2.f32 %v5257_v19 }
0x17b8   :  { %v6279_v22 = vpop.eup %6278 }
0x17b9   :  { %v1837_v31 = vadd.f32 1.0, %v6279_v22 }
0x17bb   :  { %6282 = vrcp.f32 %v1837_v31 }
0x17be   :  { %v6281_v35 = vpop.eup %6280 }
0x17bf   :  { %v1865_v52 = vadd.f32 1.0, %v6281_v35 }
0x17c1   :  { %6284 = vrcp.f32 %v1865_v52 }
0x17c5   :  { %v6283_v57 = vpop.eup %6282 }
0x17c6   :  { %v1844_v61 = vmul.f32 %v6283_v57, %v1842_v56  ;;  %v1851_v38 = vsub.f32 1.0, %v6283_v57  ;;  %v1857_v30 = vmul.f32 0.0, %v6283_v57 }
0x17c8   :  { %1846 = vrot.lane.b32.xlu1 %v1844_v61, %s6717_s0 }
0x17cb   :  { %v6285_v3 = vpop.eup %6284 }
0x17cc   :  { %v1881_v5 = vmul.f32 %v6285_v3, %v1879_v62 }
0x17ce   :  { %1883 = vrot.lane.b32.xlu0 %v1881_v5, %s6717_s0 }
0x183a   :  { %v1847_v59 = vpop.permute.xlu1 %1846 }
0x183b   :  { %v1849_v6 = vadd.f32 %v1847_v59, %v7474_v33 }
0x183d   :  { %6286 = vtanh.f32 %v1849_v6 }
0x1840   :  { %v1884_v54 = vpop.permute.xlu0 %1883 }
0x1841   :  { %v1886_v14 = vadd.f32 %v1884_v54, %v7485_v12 }
0x1843   :  { %6288 = vtanh.f32 %v1886_v14 }
0x1844   :  { %6290 = vpow2.f32 %v5258_v2 }
0x1847   :  { %v6287_v15 = vpop.eup %6286 }
0x1848   :  { %1853 = vrot.lane.b32.xlu1 %v6287_v15, %s6720_s21 }
0x184d   :  { %v6289_v23 = vpop.eup %6288 }
0x184e   :  { %1890 = vrot.lane.b32.xlu0 %v6289_v23, %s6720_s21  ;;  %v6291_v25 = vpop.eup %6290 }
0x184f   :  { %v1875_v8 = vadd.f32 1.0, %v6291_v25 }
0x1851   :  { %6292 = vrcp.f32 %v1875_v8 }
0x185b   :  { %v6293_v29 = vpop.eup %6292 }
0x185c   :  { %v1888_v27 = vsub.f32 1.0, %v6293_v29  ;;  %v1894_v41 = vmul.f32 0.0, %v6293_v29 }
0x18ba   :  { %v1854_v60 = vpop.permute.xlu1 %1853 }
0x18bb   :  { %v1856_v21 = vmul.f32 %v1854_v60, %v1851_v38 }
0x18bd   :  { %v1858_v20 = vadd.f32 %v1857_v30, %v1856_v21 }
0x18bf   :  { %1897 = vrot.lane.b32.xlu0 %v1858_v20, %s6720_s21 }
0x18c0   :  { %v1891_v28 = vpop.permute.xlu0 %1890 }
0x18c1   :  { %v1893_v34 = vmul.f32 %v1891_v28, %v1888_v27 }
0x18c3   :  { %v7494_v36 = vadd.f32 %v1894_v41, %v1893_v34 }
0x18c5   :  { %v1901_v58 = vrot.slane %v7494_v36, 6 }
0x18c7   :  { %1902 = vrot.lane.b32.xlu1 %v1901_v58, %s6721_s25 }
0x1931   :  { %v7498_v17 = vpop.permute.xlu0 %1897 }
0x1939   :  { %v1903_v46 = vpop.permute.xlu1 %1902 }
0x193a   :  { %v1905_v48 = vsel %vm500_vm4, %v7498_v17, %v1903_v46 }
0x193b   :  { %5259 = vmatmul.mubr.msk.f32.vlgmr.msra.gmra.mrb[12].mxu1 %vm353_vm5, %v1905_v48  ;;  %v2047_v6 = vrot.slane %v1905_v48, 4  ;;  %v2006_v54 = vrot.slane %v1905_v48, 6 }
0x193c   :  { %5803 = vmatpush1.bf16.msra.mxu1 %v7369_v9  ;;  %2288 = vmatprep.mubr.f32.mxu1 %v6716_v1 }
0x193d   :  { %5805 = vmatprep.subr.bf16.mxu1 %v7371_v43 }
0x1940   :  { %5807 = vmatpush1.bf16.msra.mxu1 %v7376_v16 }
0x1941   :  { %5809 = vmatprep.subr.bf16.mxu1 %v7379_v32 }
0x1944   :  { %5811 = vmatpush1.bf16.msra.mxu1 %v7384_v13 }
0x1945   :  { %5813 = vmatprep.subr.bf16.mxu1 %v7387_v55 }
0x1948   :  { %5815 = vmatpush1.bf16.msra.mxu1 %v7392_v26 }
0x1949   :  { %5833 = vmatprep.subr.bf16.mxu1 %v7367_v39 }
0x1a0e   :  { %v1975_v37 = vpop.f32.mrb[12].mxu1 }
0x1a0f   :  { %v1976_v7 = vadd.f32 %v1975_v37, %v7422_v18  ;;  %v1977_v40 = vpop.f32.mrb[13].mxu1 }
0x1a10   :  { %v1978_v44 = vadd.f32 %v1977_v40, %v7425_v0 }
0x1a11   :  { %v1981_v45 = vrot.slane %v1976_v7, 6  ;;  %v2012_v10 = vrot.slane %v1976_v7, 4 }
0x1a12   :  { %v2022_v11 = vrot.slane %v1978_v44, 4 }
0x1a13   :  { %1990 = vrot.lane.b32.xlu1 %v1981_v45, %s6717_s0  ;;  %v1983_v63 = vadd.f32 %v1981_v45, %v7474_v33  ;;  %v2014_v47 = vadd.f32 %v2012_v10, %v7479_v4 }
0x1a14   :  { %2031 = vrot.lane.b32.xlu0 %v2022_v11, %s6717_s0  ;;  %v2024_v8 = vadd.f32 %v2022_v11, %v7485_v12 }
0x1a15   :  { %v5260_v19 = vmul.f32 -1.442695, %v1983_v63  ;;  %v5261_v22 = vmul.f32 -1.442695, %v2014_v47 }
0x1a16   :  { %v5262_v38 = vmul.f32 -1.442695, %v2024_v8 }
0x1a17   :  { %6294 = vpow2.f32 %v5260_v19 }
0x1a18   :  { %6296 = vpow2.f32 %v5261_v22 }
0x1a21   :  { %v6295_v31 = vpop.eup %6294 }
0x1a22   :  { %v6297_v35 = vpop.eup %6296  ;;  %v1987_v52 = vadd.f32 1.0, %v6295_v31 }
0x1a23   :  { %v2018_v56 = vadd.f32 1.0, %v6297_v35 }
0x1a24   :  { %6298 = vrcp.f32 %v1987_v52 }
0x1a25   :  { %6300 = vrcp.f32 %v2018_v56 }
0x1a2e   :  { %v6299_v57 = vpop.eup %6298 }
0x1a2f   :  { %v6301_v62 = vpop.eup %6300  ;;  %v2000_v46 = vsub.f32 1.0, %v6299_v57 }
0x1a85   :  { %v1991_v61 = vpop.permute.xlu1 %1990 }
0x1a86   :  { %v1993_v3 = vmul.f32 %v6299_v57, %v1991_v61  ;;  %v2032_v5 = vpop.permute.xlu0 %2031 }
0x1a87   :  { %v2034_v59 = vmul.f32 %v6301_v62, %v2032_v5 }
0x1a88   :  { %1995 = vrot.lane.b32.xlu1 %v1993_v3, %s6717_s0 }
0x1a89   :  { %2036 = vrot.lane.b32.xlu0 %v2034_v59, %s6717_s0 }
0x1a8c   :  { %2048 = vrot.lane.b32.xlu1 %v2047_v6, %s6720_s21 }
0x1a90   :  { %2007 = vrot.lane.b32.xlu1 %v2006_v54, %s6721_s25 }
0x1afa   :  { %v1996_v14 = vpop.permute.xlu1 %1995 }
0x1afb   :  { %v2037_v15 = vpop.permute.xlu0 %2036  ;;  %v1998_v24 = vadd.f32 %v1996_v14, %v7474_v33 }
0x1afc   :  { %v2039_v23 = vadd.f32 %v2037_v15, %v7485_v12 }
0x1afe   :  { %6302 = vtanh.f32 %v2039_v23  ;;  %v2049_v29 = vpop.permute.xlu1 %2048 }
0x1aff   :  { %6304 = vtanh.f32 %v1998_v24 }
0x1b00   :  { %6306 = vpow2.f32 %v5262_v38 }
0x1b02   :  { %v2008_v34 = vpop.permute.xlu1 %2007 }
0x1b03   :  { %v2010_v37 = vmul.f32 %v6299_v57, %v2008_v34 }
0x1b08   :  { %v6303_v2 = vpop.eup %6302 }
0x1b09   :  { %2043 = vrot.lane.b32.xlu0 %v6303_v2, %s6720_s21  ;;  %v6305_v25 = vpop.eup %6304 }
0x1b0a   :  { %v6307_v60 = vpop.eup %6306 }
0x1b0b   :  { %v2028_v30 = vadd.f32 1.0, %v6307_v60 }
0x1b0d   :  { %2002 = vrot.lane.b32.xlu0 %v6305_v25, %s6720_s21  ;;  %6308 = vrcp.f32 %v2028_v30 }
0x1b17   :  { %v6309_v21 = vpop.eup %6308 }
0x1b18   :  { %v2041_v20 = vsub.f32 1.0, %v6309_v21  ;;  %v2051_v28 = vmul.f32 %v6309_v21, %v2049_v29 }
0x1b7b   :  { %v2044_v27 = vpop.permute.xlu0 %2043 }
0x1b7c   :  { %v2046_v41 = vmul.f32 %v2044_v27, %v2041_v20 }
0x1b7e   :  { %v7527_v58 = vadd.f32 %v2051_v28, %v2046_v41 }
0x1b7f   :  { %v2003_v48 = vpop.permute.xlu0 %2002 }
0x1b80   :  { %v2058_v7 = vrot.slane %v7527_v58, 2  ;;  %v2005_v40 = vmul.f32 %v2003_v48, %v2000_v46 }
0x1b82   :  { %v2011_v44 = vadd.f32 %v2010_v37, %v2005_v40  ;;  %2059 = vrot.lane.b32.xlu1 %v2058_v7, %s6721_s25 }
0x1b84   :  { %2054 = vrot.lane.b32.xlu0 %v2011_v44, %s6720_s21 }
0x1bf4   :  { %v2060_v45 = vpop.permute.xlu1 %2059 }
0x1bf6   :  { %v7532_v11 = vpop.permute.xlu0 %2054 }
0x1bf7   :  { %v2062_v10 = vsel %vm500_vm4, %v7532_v11, %v2060_v45 }
0x1bf8   :  { %v2064_v63 = vrot.slane %v2062_v10, 2  ;;  %v2164_v8 = vrot.slane %v2062_v10, 6 }
0x1bfa   :  { %5263 = vmatmul.mubr.msk.f32.vlgmr.msra.gmra.mrb[14].mxu0 %vm353_vm5, %v2064_v63 }
0x1bfb   :  { %5819 = vmatpush1.bf16.msra.mxu0 %v7369_v9  ;;  %2441 = vmatprep.mubr.f32.mxu0 %v6716_v1 }
0x1bfc   :  { %5821 = vmatprep.subr.bf16.mxu0 %v7371_v43 }
0x1bff   :  { %5823 = vmatpush1.bf16.msra.mxu0 %v7376_v16 }
0x1c00   :  { %5825 = vmatprep.subr.bf16.mxu0 %v7379_v32 }
0x1c03   :  { %5827 = vmatpush1.bf16.msra.mxu0 %v7384_v13 }
0x1c04   :  { %5829 = vmatprep.subr.bf16.mxu0 %v7387_v55 }
0x1c07   :  { %5831 = vmatpush1.bf16.msra.mxu0 %v7392_v26 }
0x1c08   :  { %5849 = vmatprep.subr.bf16.mxu0 %v7367_v39 }
0x1ccd   :  { %v2133_v47 = vpop.f32.mrb[14].mxu0 }
0x1cce   :  { %v2134_v19 = vadd.f32 %v2133_v47, %v7422_v18  ;;  %v2135_v22 = vpop.f32.mrb[15].mxu0 }
0x1ccf   :  { %v2136_v31 = vadd.f32 %v2135_v22, %v7425_v0 }
0x1cd0   :  { %v2139_v35 = vrot.slane %v2134_v19, 4  ;;  %v2170_v56 = vrot.slane %v2134_v19, 6 }
0x1cd1   :  { %v2180_v52 = vrot.slane %v2136_v31, 6 }
0x1cd2   :  { %2148 = vrot.lane.b32.xlu1 %v2139_v35, %s6717_s0  ;;  %v2141_v57 = vadd.f32 %v2139_v35, %v7474_v33  ;;  %v2172_v61 = vadd.f32 %v2170_v56, %v7479_v4 }
0x1cd3   :  { %2189 = vrot.lane.b32.xlu0 %v2180_v52, %s6717_s0  ;;  %v2182_v27 = vadd.f32 %v2180_v52, %v7485_v12 }
0x1cd4   :  { %v5264_v62 = vmul.f32 -1.442695, %v2141_v57  ;;  %v5265_v3 = vmul.f32 -1.442695, %v2172_v61 }
0x1cd5   :  { %v5266_v28 = vmul.f32 -1.442695, %v2182_v27 }
0x1cd6   :  { %6310 = vpow2.f32 %v5264_v62 }
0x1cd7   :  { %6312 = vpow2.f32 %v5265_v3 }
0x1ce0   :  { %v6311_v5 = vpop.eup %6310 }
0x1ce1   :  { %v6313_v59 = vpop.eup %6312  ;;  %v2145_v6 = vadd.f32 1.0, %v6311_v5 }
0x1ce2   :  { %v2176_v54 = vadd.f32 1.0, %v6313_v59 }
0x1ce3   :  { %6314 = vrcp.f32 %v2145_v6 }
0x1ce4   :  { %6316 = vrcp.f32 %v2176_v54 }
0x1ced   :  { %v6315_v14 = vpop.eup %6314 }
0x1cee   :  { %v6317_v23 = vpop.eup %6316  ;;  %v2158_v63 = vsub.f32 1.0, %v6315_v14 }
0x1d44   :  { %v2149_v15 = vpop.permute.xlu1 %2148 }
0x1d45   :  { %v2151_v24 = vmul.f32 %v6315_v14, %v2149_v15  ;;  %v2190_v2 = vpop.permute.xlu0 %2189 }
0x1d46   :  { %v2192_v25 = vmul.f32 %v6317_v23, %v2190_v2 }
0x1d47   :  { %2153 = vrot.lane.b32.xlu1 %v2151_v24, %s6717_s0 }
0x1d48   :  { %2194 = vrot.lane.b32.xlu0 %v2192_v25, %s6717_s0 }
0x1d4b   :  { %2205 = vrot.lane.b32.xlu1 %v2062_v10, %s6720_s21 }
0x1d4f   :  { %2165 = vrot.lane.b32.xlu1 %v2164_v8, %s6721_s25 }
0x1db9   :  { %v2154_v38 = vpop.permute.xlu1 %2153 }
0x1dba   :  { %v2195_v60 = vpop.permute.xlu0 %2194  ;;  %v2156_v21 = vadd.f32 %v2154_v38, %v7474_v33 }
0x1dbb   :  { %v2197_v30 = vadd.f32 %v2195_v60, %v7485_v12 }
0x1dbd   :  { %6318 = vtanh.f32 %v2197_v30  ;;  %v2206_v48 = vpop.permute.xlu1 %2205 }
0x1dbe   :  { %6320 = vtanh.f32 %v2156_v21 }
0x1dbf   :  { %6322 = vpow2.f32 %v5266_v28 }
0x1dc1   :  { %v2166_v45 = vpop.permute.xlu1 %2165 }
0x1dc2   :  { %v2168_v19 = vmul.f32 %v6315_v14, %v2166_v45 }
0x1dc7   :  { %v6319_v29 = vpop.eup %6318 }
0x1dc8   :  { %2201 = vrot.lane.b32.xlu0 %v6319_v29, %s6720_s21  ;;  %v6321_v20 = vpop.eup %6320 }
0x1dc9   :  { %v6323_v41 = vpop.eup %6322 }
0x1dca   :  { %v2186_v34 = vadd.f32 1.0, %v6323_v41 }
0x1dcc   :  { %2160 = vrot.lane.b32.xlu0 %v6321_v20, %s6720_s21  ;;  %6324 = vrcp.f32 %v2186_v34 }
0x1dd6   :  { %v6325_v46 = vpop.eup %6324 }
0x1dd7   :  { %v2199_v37 = vsub.f32 1.0, %v6325_v46  ;;  %v2208_v40 = vmul.f32 %v6325_v46, %v2206_v48 }
0x1e3a   :  { %v2202_v7 = vpop.permute.xlu0 %2201 }
0x1e3b   :  { %v2204_v44 = vmul.f32 %v2202_v7, %v2199_v37 }
0x1e3d   :  { %v7561_v10 = vadd.f32 %v2208_v40, %v2204_v44 }
0x1e3e   :  { %v2161_v47 = vpop.permute.xlu0 %2160 }
0x1e3f   :  { %v2215_v22 = vrot.slane %v7561_v10, 6  ;;  %v2163_v31 = vmul.f32 %v2161_v47, %v2158_v63 }
0x1e41   :  { %v2169_v35 = vadd.f32 %v2168_v19, %v2163_v31  ;;  %2216 = vrot.lane.b32.xlu1 %v2215_v22, %s6721_s25 }
0x1e43   :  { %2211 = vrot.lane.b32.xlu0 %v2169_v35, %s6720_s21 }
0x1eb3   :  { %v2217_v52 = vpop.permute.xlu1 %2216 }
0x1eb5   :  { %v7566_v56 = vpop.permute.xlu0 %2211 }
0x1eb6   :  { %v2219_v57 = vsel %vm500_vm4, %v7566_v56, %v2217_v52 }
0x1eb7   :  { %v2221_v61 = vrot.slane %v2219_v57, 4  ;;  %v2321_v20 = vrot.slane %v2219_v57, 6 }
0x1eb9   :  { %5267 = vmatmul.mubr.msk.f32.vlgmr.msra.gmra.mrb[14].mxu1 %vm353_vm5, %v2221_v61 }
0x1eba   :  { %5835 = vmatpush1.bf16.msra.mxu1 %v7369_v9  ;;  %2594 = vmatprep.mubr.f32.mxu1 %v6716_v1 }
0x1ebb   :  { %5837 = vmatprep.subr.bf16.mxu1 %v7371_v43 }
0x1ebe   :  { %5839 = vmatpush1.bf16.msra.mxu1 %v7376_v16 }
0x1ebf   :  { %5841 = vmatprep.subr.bf16.mxu1 %v7379_v32 }
0x1ec2   :  { %5843 = vmatpush1.bf16.msra.mxu1 %v7384_v13 }
0x1ec3   :  { %5845 = vmatprep.subr.bf16.mxu1 %v7387_v55 }
0x1ec6   :  { %5847 = vmatpush1.bf16.msra.mxu1 %v7392_v26 }
0x1ec7   :  { %5865 = vmatprep.subr.bf16.mxu1 %v7367_v39 }
0x1f8c   :  { %v2290_v62 = vpop.f32.mrb[14].mxu1 }
0x1f8d   :  { %v2291_v3 = vadd.f32 %v2290_v62, %v7422_v18  ;;  %v2292_v5 = vpop.f32.mrb[15].mxu1 }
0x1f8e   :  { %v2293_v59 = vadd.f32 %v2292_v5, %v7425_v0 }
0x1f8f   :  { %v2296_v6 = vrot.slane %v2291_v3, 2  ;;  %v2327_v54 = vadd.f32 %v2291_v3, %v7479_v4 }
0x1f90   :  { %2342 = vrot.lane.b32.xlu0 %v2293_v59, %s6717_s0  ;;  %v2334_v37 = vadd.f32 %v2293_v59, %v7485_v12 }
0x1f91   :  { %2305 = vrot.lane.b32.xlu1 %v2296_v6, %s6717_s0  ;;  %v2298_v14 = vadd.f32 %v2296_v6, %v7474_v33  ;;  %v5269_v15 = vmul.f32 -1.442695, %v2327_v54 }
0x1f92   :  { %v5270_v7 = vmul.f32 -1.442695, %v2334_v37 }
0x1f93   :  { %v5268_v23 = vmul.f32 -1.442695, %v2298_v14  ;;  %6326 = vpow2.f32 %v5269_v15 }
0x1f95   :  { %6328 = vpow2.f32 %v5268_v23 }
0x1f9d   :  { %v6327_v39 = vpop.eup %6326 }
0x1f9e   :  { %v2331_v2 = vadd.f32 1.0, %v6327_v39 }
0x1f9f   :  { %v6329_v24 = vpop.eup %6328 }
0x1fa0   :  { %v2302_v25 = vadd.f32 1.0, %v6329_v24  ;;  %6330 = vrcp.f32 %v2331_v2 }
0x1fa2   :  { %6332 = vrcp.f32 %v2302_v25 }
0x1faa   :  { %v6331_v8 = vpop.eup %6330 }
0x1fac   :  { %v6333_v60 = vpop.eup %6332 }
0x1fad   :  { %v2315_v57 = vsub.f32 1.0, %v6333_v60 }
0x2002   :  { %v2343_v38 = vpop.permute.xlu0 %2342 }
0x2003   :  { %v2345_v30 = vmul.f32 %v6331_v8, %v2343_v38  ;;  %v2306_v21 = vpop.permute.xlu1 %2305 }
0x2004   :  { %v2308_v29 = vmul.f32 %v6333_v60, %v2306_v21 }
0x2005   :  { %2347 = vrot.lane.b32.xlu0 %v2345_v30, %s6717_s0 }
0x2006   :  { %2310 = vrot.lane.b32.xlu1 %v2308_v29, %s6717_s0 }
0x200a   :  { %2358 = vrot.lane.b32.xlu1 %v2221_v61, %s6720_s21 }
0x200e   :  { %2322 = vrot.lane.b32.xlu1 %v2321_v20, %s6721_s25 }
0x2077   :  { %v2348_v27 = vpop.permute.xlu0 %2347 }
0x2078   :  { %v2350_v28 = vadd.f32 %v2348_v27, %v7485_v12  ;;  %v2311_v41 = vpop.permute.xlu1 %2310 }
0x2079   :  { %v2313_v34 = vadd.f32 %v2311_v41, %v7474_v33 }
0x207a   :  { %6334 = vtanh.f32 %v2350_v28 }
0x207b   :  { %6336 = vtanh.f32 %v2313_v34 }
0x207c   :  { %6338 = vpow2.f32 %v5270_v7  ;;  %v2359_v63 = vpop.permute.xlu1 %2358 }
0x2080   :  { %v2323_v35 = vpop.permute.xlu1 %2322 }
0x2081   :  { %v2325_v62 = vmul.f32 %v6333_v60, %v2323_v35 }
0x2084   :  { %v6335_v46 = vpop.eup %6334 }
0x2085   :  { %2354 = vrot.lane.b32.xlu0 %v6335_v46, %s6720_s21  ;;  %v6337_v48 = vpop.eup %6336 }
0x2086   :  { %v6339_v40 = vpop.eup %6338 }
0x2087   :  { %v2338_v44 = vadd.f32 1.0, %v6339_v40 }
0x2089   :  { %2317 = vrot.lane.b32.xlu0 %v6337_v48, %s6720_s21  ;;  %6340 = vrcp.f32 %v2338_v44 }
0x2093   :  { %v6341_v45 = vpop.eup %6340 }
0x2094   :  { %v2352_v47 = vsub.f32 1.0, %v6341_v45  ;;  %v2361_v22 = vmul.f32 %v6341_v45, %v2359_v63 }
0x20f7   :  { %v2355_v19 = vpop.permute.xlu0 %2354 }
0x20f8   :  { %v2357_v31 = vmul.f32 %v2355_v19, %v2352_v47 }
0x20fa   :  { %v7595_v52 = vadd.f32 %v2361_v22, %v2357_v31 }
0x20fb   :  { %v2318_v61 = vpop.permute.xlu0 %2317 }
0x20fc   :  { %v2368_v3 = vrot.slane %v7595_v52, 2  ;;  %v2320_v12 = vmul.f32 %v2318_v61, %v2315_v57 }
0x20fe   :  { %v2326_v5 = vadd.f32 %v2325_v62, %v2320_v12  ;;  %2369 = vrot.lane.b32.xlu1 %v2368_v3, %s6721_s25 }
0x2100   :  { %2364 = vrot.lane.b32.xlu0 %v2326_v5, %s6720_s21 }
0x2170   :  { %v2370_v59 = vpop.permute.xlu1 %2369 }
0x2172   :  { %v7600_v6 = vpop.permute.xlu0 %2364 }
0x2173   :  { %v2372_v54 = vsel %vm500_vm4, %v7600_v6, %v2370_v59 }
0x2174   :  { %v2374_v14 = vrot.slane %v2372_v54, 6 }
0x2176   :  { %5271 = vmatmul.mubr.msk.f32.vlgmr.msra.gmra.mrb[16].mxu0 %vm353_vm5, %v2374_v14 }
0x2177   :  { %5851 = vmatpush1.bf16.msra.mxu0 %v7369_v9  ;;  %2752 = vmatprep.mubr.f32.mxu0 %v6716_v1 }
0x2178   :  { %5853 = vmatprep.subr.bf16.mxu0 %v7371_v43 }
0x217b   :  { %5855 = vmatpush1.bf16.msra.mxu0 %v7376_v16 }
0x217c   :  { %5857 = vmatprep.subr.bf16.mxu0 %v7379_v32 }
0x217f   :  { %5859 = vmatpush1.bf16.msra.mxu0 %v7384_v13 }
0x2180   :  { %5861 = vmatprep.subr.bf16.mxu0 %v7387_v55 }
0x2183   :  { %5863 = vmatpush1.bf16.msra.mxu0 %v7392_v26 }
0x2249   :  { %v2443_v15 = vpop.f32.mrb[16].mxu0 }
0x224a   :  { %v2444_v23 = vadd.f32 %v2443_v15, %v7422_v18  ;;  %v2445_v39 = vpop.f32.mrb[17].mxu0 }
0x224b   :  { %v2446_v24 = vadd.f32 %v2445_v39, %v7425_v0 }
0x224c   :  { %2456 = vrot.lane.b32.xlu1 %v2444_v23, %s6717_s0  ;;  %v2477_v25 = vrot.slane %v2444_v23, 2  ;;  %v2448_v8 = vadd.f32 %v2444_v23, %v7479_v4 }
0x224d   :  { %v2487_v2 = vrot.slane %v2446_v24, 2 }
0x224e   :  { %v2479_v38 = vadd.f32 %v2477_v25, %v7474_v33  ;;  %v5272_v60 = vmul.f32 -1.442695, %v2448_v8 }
0x224f   :  { %2496 = vrot.lane.b32.xlu0 %v2487_v2, %s6717_s0  ;;  %v2489_v19 = vadd.f32 %v2487_v2, %v7476_v42 }
0x2250   :  { %v5273_v30 = vmul.f32 -1.442695, %v2479_v38  ;;  %6342 = vpow2.f32 %v5272_v60 }
0x2251   :  { %v5274_v22 = vmul.f32 -1.442695, %v2489_v19 }
0x2252   :  { %6344 = vpow2.f32 %v5273_v30 }
0x225a   :  { %v6343_v21 = vpop.eup %6342 }
0x225b   :  { %v2452_v20 = vadd.f32 1.0, %v6343_v21 }
0x225c   :  { %v6345_v29 = vpop.eup %6344 }
0x225d   :  { %v2483_v27 = vadd.f32 1.0, %v6345_v29  ;;  %6346 = vrcp.f32 %v2452_v20 }
0x225f   :  { %6348 = vrcp.f32 %v2483_v27 }
0x2267   :  { %v6347_v28 = vpop.eup %6346 }
0x2269   :  { %v6349_v46 = vpop.eup %6348 }
0x22be   :  { %v2457_v41 = vpop.permute.xlu1 %2456 }
0x22bf   :  { %v2459_v34 = vmul.f32 %v6347_v28, %v2457_v41 }
0x22c1   :  { %v2497_v48 = vpop.permute.xlu0 %2496  ;;  %2461 = vrot.lane.b32.xlu1 %v2459_v34, %s6717_s0 }
0x22c2   :  { %v2499_v37 = vmul.f32 %v6349_v46, %v2497_v48 }
0x22c4   :  { %2501 = vrot.lane.b32.xlu0 %v2499_v37, %s6717_s0 }
0x22c5   :  { %2512 = vrot.lane.b32.xlu1 %v2372_v54, %s6720_s21 }
0x22c9   :  { %2472 = vrot.lane.b32.xlu1 %v2374_v14, %s6721_s25  ;;  %v2466_v14 = vsub.f32 1.0, %v6347_v28 }
0x2333   :  { %v2462_v7 = vpop.permute.xlu1 %2461 }
0x2334   :  { %v2464_v45 = vadd.f32 %v2462_v7, %v7479_v4 }
0x2336   :  { %v2502_v40 = vpop.permute.xlu0 %2501 }
0x2337   :  { %v2504_v44 = vadd.f32 %v2502_v40, %v7476_v42  ;;  %v2513_v61 = vpop.permute.xlu1 %2512 }
0x2339   :  { %6350 = vtanh.f32 %v2504_v44 }
0x233a   :  { %6352 = vtanh.f32 %v2464_v45 }
0x233b   :  { %6354 = vpow2.f32 %v5274_v22  ;;  %v2473_v59 = vpop.permute.xlu1 %2472 }
0x233c   :  { %v2475_v23 = vmul.f32 %v6347_v28, %v2473_v59 }
0x2343   :  { %v6351_v63 = vpop.eup %6350 }
0x2344   :  { %2508 = vrot.lane.b32.xlu0 %v6351_v63, %s6720_s21  ;;  %v6353_v47 = vpop.eup %6352 }
0x2345   :  { %v6355_v31 = vpop.eup %6354 }
0x2346   :  { %v2493_v35 = vadd.f32 1.0, %v6355_v31 }
0x2348   :  { %2468 = vrot.lane.b32.xlu0 %v6353_v47, %s6720_s21  ;;  %6356 = vrcp.f32 %v2493_v35 }
0x2352   :  { %v6357_v57 = vpop.eup %6356 }
0x2353   :  { %v2506_v62 = vsub.f32 1.0, %v6357_v57  ;;  %v2515_v12 = vmul.f32 %v6357_v57, %v2513_v61 }
0x23b6   :  { %v2509_v3 = vpop.permute.xlu0 %2508 }
0x23b7   :  { %v2511_v5 = vmul.f32 %v2509_v3, %v2506_v62 }
0x23b9   :  { %v7628_v54 = vadd.f32 %v2515_v12, %v2511_v5 }
0x23ba   :  { %v2469_v15 = vpop.permute.xlu0 %2468 }
0x23bb   :  { %v2522_v39 = vrot.slane %v7628_v54, 6  ;;  %v2471_v24 = vmul.f32 %v2469_v15, %v2466_v14 }
0x23bd   :  { %v2476_v2 = vadd.f32 %v2475_v23, %v2471_v24  ;;  %2523 = vrot.lane.b32.xlu1 %v2522_v39, %s6721_s25 }
0x23bf   :  { %2518 = vrot.lane.b32.xlu0 %v2476_v2, %s6720_s21 }
0x242f   :  { %v2524_v25 = vpop.permute.xlu1 %2523 }
0x2431   :  { %v7633_v8 = vpop.permute.xlu0 %2518 }
0x2432   :  { %v2526_v38 = vsel %vm500_vm4, %v7633_v8, %v2524_v25 }
0x2433   :  { %5275 = vmatmul.mubr.msk.f32.vlgmr.msra.gmra.mrb[16].mxu1 %vm353_vm5, %v2526_v38  ;;  %v2668_v44 = vrot.slane %v2526_v38, 4  ;;  %v2627_v45 = vrot.slane %v2526_v38, 6 }
0x2434   :  { %5867 = vmatpush1.bf16.msra.mxu1 %v7369_v9  ;;  %2909 = vmatprep.mubr.f32.mxu1 %v6716_v1 }
0x2435   :  { %5869 = vmatprep.subr.bf16.mxu1 %v7371_v43 }
0x2438   :  { %5871 = vmatpush1.bf16.msra.mxu1 %v7376_v16 }
0x2439   :  { %5873 = vmatprep.subr.bf16.mxu1 %v7379_v32 }
0x243c   :  { %5875 = vmatpush1.bf16.msra.mxu1 %v7384_v13 }
0x243d   :  { %5877 = vmatprep.subr.bf16.mxu1 %v7387_v55 }
0x2440   :  { %5879 = vmatpush1.bf16.msra.mxu1 %v7392_v26 }
0x2506   :  { %v2596_v60 = vpop.f32.mrb[16].mxu1 }
0x2507   :  { %v2597_v30 = vadd.f32 %v2596_v60, %v7422_v18  ;;  %v2598_v21 = vpop.f32.mrb[17].mxu1 }
0x2508   :  { %v2599_v9 = vadd.f32 %v2598_v21, %v7425_v0 }
0x2509   :  { %v2602_v29 = vrot.slane %v2597_v30, 6  ;;  %v2633_v43 = vrot.slane %v2597_v30, 4 }
0x250a   :  { %v2643_v20 = vrot.slane %v2599_v9, 4 }
0x250b   :  { %2611 = vrot.lane.b32.xlu1 %v2602_v29, %s6717_s0  ;;  %v2604_v16 = vadd.f32 %v2602_v29, %v7479_v4  ;;  %v2635_v32 = vadd.f32 %v2633_v43, %v7474_v33 }
0x250c   :  { %2652 = vrot.lane.b32.xlu0 %v2643_v20, %s6717_s0  ;;  %v2645_v57 = vadd.f32 %v2643_v20, %v7476_v42 }
0x250d   :  { %v5276_v13 = vmul.f32 -1.442695, %v2604_v16  ;;  %v5277_v55 = vmul.f32 -1.442695, %v2635_v32 }
0x250e   :  { %v5278_v61 = vmul.f32 -1.442695, %v2645_v57 }
0x250f   :  { %6358 = vpow2.f32 %v5276_v13 }
0x2510   :  { %6360 = vpow2.f32 %v5277_v55 }
0x2519   :  { %v6359_v26 = vpop.eup %6358 }
0x251a   :  { %v6361_v27 = vpop.eup %6360  ;;  %v2608_v28 = vadd.f32 1.0, %v6359_v26 }
0x251b   :  { %v2639_v41 = vadd.f32 1.0, %v6361_v27 }
0x251c   :  { %6362 = vrcp.f32 %v2608_v28 }
0x251d   :  { %6364 = vrcp.f32 %v2639_v41 }
0x2526   :  { %v6363_v34 = vpop.eup %6362 }
0x2527   :  { %v6365_v48 = vpop.eup %6364  ;;  %v2621_v2 = vsub.f32 1.0, %v6363_v34 }
0x257d   :  { %v2612_v46 = vpop.permute.xlu1 %2611 }
0x257e   :  { %v2614_v37 = vmul.f32 %v6363_v34, %v2612_v46  ;;  %v2653_v7 = vpop.permute.xlu0 %2652 }
0x257f   :  { %v2655_v40 = vmul.f32 %v6365_v48, %v2653_v7 }
0x2580   :  { %2616 = vrot.lane.b32.xlu1 %v2614_v37, %s6717_s0 }
0x2581   :  { %2657 = vrot.lane.b32.xlu0 %v2655_v40, %s6717_s0 }
0x2584   :  { %2669 = vrot.lane.b32.xlu1 %v2668_v44, %s6720_s21 }
0x2588   :  { %2628 = vrot.lane.b32.xlu1 %v2627_v45, %s6721_s25 }
0x25f2   :  { %v2617_v63 = vpop.permute.xlu1 %2616 }
0x25f3   :  { %v2658_v47 = vpop.permute.xlu0 %2657  ;;  %v2619_v22 = vadd.f32 %v2617_v63, %v7479_v4 }
0x25f4   :  { %v2660_v19 = vadd.f32 %v2658_v47, %v7476_v42 }
0x25f6   :  { %6366 = vtanh.f32 %v2660_v19  ;;  %v2670_v5 = vpop.permute.xlu1 %2669 }
0x25f7   :  { %6368 = vtanh.f32 %v2619_v22 }
0x25f8   :  { %6370 = vpow2.f32 %v5278_v61 }
0x25fa   :  { %v2629_v39 = vpop.permute.xlu1 %2628 }
0x25fb   :  { %v2631_v38 = vmul.f32 %v6363_v34, %v2629_v39 }
0x2600   :  { %v6367_v31 = vpop.eup %6366 }
0x2601   :  { %2664 = vrot.lane.b32.xlu0 %v6367_v31, %s6720_s21  ;;  %v6369_v35 = vpop.eup %6368 }
0x2602   :  { %v6371_v62 = vpop.eup %6370 }
0x2603   :  { %v2649_v3 = vadd.f32 1.0, %v6371_v62 }
0x2605   :  { %2623 = vrot.lane.b32.xlu0 %v6369_v35, %s6720_s21  ;;  %6372 = vrcp.f32 %v2649_v3 }
0x260f   :  { %v6373_v12 = vpop.eup %6372 }
0x2610   :  { %v2662_v59 = vsub.f32 1.0, %v6373_v12  ;;  %v2672_v15 = vmul.f32 %v6373_v12, %v2670_v5 }
0x2673   :  { %v2665_v14 = vpop.permute.xlu0 %2664 }
0x2674   :  { %v2667_v23 = vmul.f32 %v2665_v14, %v2662_v59 }
0x2676   :  { %v7661_v24 = vadd.f32 %v2672_v15, %v2667_v23 }
0x2677   :  { %v2624_v25 = vpop.permute.xlu0 %2623 }
0x2678   :  { %v2679_v60 = vrot.slane %v7661_v24, 2  ;;  %v2626_v30 = vmul.f32 %v2624_v25, %v2621_v2 }
0x267a   :  { %v2632_v21 = vadd.f32 %v2631_v38, %v2626_v30  ;;  %2680 = vrot.lane.b32.xlu1 %v2679_v60, %s6721_s25 }
0x267c   :  { %2675 = vrot.lane.b32.xlu0 %v2632_v21, %s6720_s21 }
0x26ec   :  { %v2681_v9 = vpop.permute.xlu1 %2680 }
0x26ee   :  { %v7666_v29 = vpop.permute.xlu0 %2675 }
0x26ef   :  { %v2683_v20 = vsel %vm500_vm4, %v7666_v29, %v2681_v9 }
0x26f0   :  { %v2685_v43 = vrot.slane %v2683_v20, 2  ;;  %v2785_v35 = vrot.slane %v2683_v20, 6 }
0x26f2   :  { %5279 = vmatmul.mubr.msk.f32.vlgmr.msra.gmra.mrb[18].mxu0 %vm353_vm5, %v2685_v43 }
0x26f3   :  { %3125 = vmatprep.mubr.f32.mxu0 %v6716_v1 }
0x27c5   :  { %v2754_v16 = vpop.f32.mrb[18].mxu0 }
0x27c6   :  { %v2755_v32 = vadd.f32 %v2754_v16, %v7422_v18  ;;  %v2756_v13 = vpop.f32.mrb[19].mxu0 }
0x27c7   :  { %v2757_v55 = vadd.f32 %v2756_v13, %v7425_v0 }
0x27c8   :  { %v2760_v26 = vrot.slane %v2755_v32, 4  ;;  %v2791_v28 = vrot.slane %v2755_v32, 6 }
0x27c9   :  { %v2801_v27 = vrot.slane %v2757_v55, 6 }
0x27ca   :  { %2769 = vrot.lane.b32.xlu1 %v2760_v26, %s6717_s0  ;;  %v2762_v41 = vadd.f32 %v2760_v26, %v7479_v4  ;;  %v2793_v34 = vadd.f32 %v2791_v28, %v7474_v33 }
0x27cb   :  { %2810 = vrot.lane.b32.xlu0 %v2801_v27, %s6717_s0  ;;  %v2803_v59 = vadd.f32 %v2801_v27, %v7476_v42 }
0x27cc   :  { %v5280_v46 = vmul.f32 -1.442695, %v2762_v41  ;;  %v5281_v48 = vmul.f32 -1.442695, %v2793_v34 }
0x27cd   :  { %v5282_v14 = vmul.f32 -1.442695, %v2803_v59 }
0x27ce   :  { %6374 = vpow2.f32 %v5280_v46 }
0x27cf   :  { %6376 = vpow2.f32 %v5281_v48 }
0x27d8   :  { %v6375_v37 = vpop.eup %6374 }
0x27d9   :  { %v6377_v7 = vpop.eup %6376  ;;  %v2766_v40 = vadd.f32 1.0, %v6375_v37 }
0x27da   :  { %v2797_v44 = vadd.f32 1.0, %v6377_v7 }
0x27db   :  { %6378 = vrcp.f32 %v2766_v40 }
0x27dc   :  { %6380 = vrcp.f32 %v2797_v44 }
0x27e5   :  { %v6379_v45 = vpop.eup %6378 }
0x27e6   :  { %v6381_v47 = vpop.eup %6380 }
0x283c   :  { %v2770_v63 = vpop.permute.xlu1 %2769 }
0x283d   :  { %v2772_v19 = vmul.f32 %v6379_v45, %v2770_v63  ;;  %v2811_v22 = vpop.permute.xlu0 %2810 }
0x283e   :  { %v2813_v31 = vmul.f32 %v6381_v47, %v2811_v22 }
0x283f   :  { %2774 = vrot.lane.b32.xlu1 %v2772_v19, %s6717_s0 }
0x2840   :  { %2815 = vrot.lane.b32.xlu0 %v2813_v31, %s6717_s0 }
0x2843   :  { %2826 = vrot.lane.b32.xlu1 %v2683_v20, %s6720_s21  ;;  %v2779_v20 = vsub.f32 1.0, %v6379_v45 }
0x2847   :  { %2786 = vrot.lane.b32.xlu1 %v2785_v35, %s6721_s25 }
0x28b1   :  { %v2775_v57 = vpop.permute.xlu1 %2774 }
0x28b2   :  { %v2816_v61 = vpop.permute.xlu0 %2815  ;;  %v2777_v3 = vadd.f32 %v2775_v57, %v7479_v4 }
0x28b3   :  { %v2818_v62 = vadd.f32 %v2816_v61, %v7476_v42 }
0x28b5   :  { %6382 = vtanh.f32 %v2818_v62  ;;  %v2827_v2 = vpop.permute.xlu1 %2826 }
0x28b6   :  { %6384 = vtanh.f32 %v2777_v3 }
0x28b7   :  { %6386 = vpow2.f32 %v5282_v14 }
0x28b9   :  { %v2787_v21 = vpop.permute.xlu1 %2786 }
0x28ba   :  { %v2789_v16 = vmul.f32 %v6379_v45, %v2787_v21  ;;  %v3033_v21 = vld [vmem:[#allocation8 + $0x30] sm:$0xff] }
0x28bf   :  { %v6383_v12 = vpop.eup %6382 }
0x28c0   :  { %2822 = vrot.lane.b32.xlu0 %v6383_v12, %s6720_s21  ;;  %v6385_v5 = vpop.eup %6384 }
0x28c1   :  { %v6387_v15 = vpop.eup %6386 }
0x28c2   :  { %v2807_v23 = vadd.f32 1.0, %v6387_v15  ;;  %v3028_v15 = vld [vmem:[#allocation8 + $0x8] sm:$0xff] }
0x28c4   :  { %2781 = vrot.lane.b32.xlu0 %v6385_v5, %s6720_s21  ;;  %6388 = vrcp.f32 %v2807_v23  ;;  %v3030_v23 = vld [vmem:[#allocation8 + $0x18] sm:$0xff] }
0x28ce   :  { %v6389_v39 = vpop.eup %6388 }
0x28cf   :  { %v2820_v25 = vsub.f32 1.0, %v6389_v39  ;;  %v2829_v60 = vmul.f32 %v6389_v39, %v2827_v2  ;;  %v3027_v39 = vld [vmem:[#allocation8] sm:$0xff]  ;;  %v5880_v2 = vpack.c.bf16 %v3030_v23, %v3028_v15 }
0x28d1   :  { %5881 = vmatprep.subr.bf16.mxu0 %v5880_v2 }
0x2932   :  { %v2823_v38 = vpop.permute.xlu0 %2822 }
0x2933   :  { %v2825_v30 = vmul.f32 %v2823_v38, %v2820_v25  ;;  %v3029_v25 = vld [vmem:[#allocation8 + $0x10] sm:$0xff]  ;;  %v3034_v38 = vld [vmem:[#allocation8 + $0x38] sm:$0xff] }
0x2935   :  { %v2830_v9 = vadd.f32 %v2829_v60, %v2825_v30  ;;  %v5882_v60 = vpack.c.bf16 %v3029_v25, %v3027_v39  ;;  %v3031_v30 = vld [vmem:[#allocation8 + $0x20] sm:$0xff] }
0x2936   :  { %v2782_v43 = vpop.permute.xlu0 %2781 }
0x2937   :  { %v2836_v32 = vrot.slane %v2830_v9, 6  ;;  %v2784_v13 = vmul.f32 %v2782_v43, %v2779_v20  ;;  %v3038_v43 = vld [vmem:[#allocation8 + $0x58] sm:$0xff]  ;;  %5883 = vmatpush1.bf16.msra.mxu0 %v5882_v60 }
0x2939   :  { %v2790_v55 = vadd.f32 %v2789_v16, %v2784_v13  ;;  %2837 = vrot.lane.b32.xlu1 %v2836_v32, %s6721_s25  ;;  %v3035_v32 = vld [vmem:[#allocation8 + $0x40] sm:$0xff]  ;;  %v3037_v13 = vld [vmem:[#allocation8 + $0x50] sm:$0xff] }
0x293b   :  { %2832 = vrot.lane.b32.xlu0 %v2790_v55, %s6720_s21  ;;  %v5890_v55 = vpack.c.bf16 %v3037_v13, %v3035_v32 }
0x29ab   :  { %v2838_v26 = vpop.permute.xlu1 %2837 }
0x29ad   :  { %v7689_v27 = vpop.permute.xlu0 %2832 }
0x29ae   :  { %v2840_v28 = vsel %vm500_vm4, %v7689_v27, %v2838_v26 }
0x29af   :  { %v2842_v41 = vrot.slane %v2840_v28, 4  ;;  %v2942_v62 = vrot.slane %v2840_v28, 6 }
0x29b1   :  { %5283 = vmatmul.mubr.msk.f32.vlgmr.msra.gmra.mrb[18].mxu1 %vm353_vm5, %v2842_v41 }
0x2a84   :  { %v2911_v34 = vpop.f32.mrb[18].mxu1 }
0x2a85   :  { %v2912_v46 = vadd.f32 %v2911_v34, %v7422_v18  ;;  %v2913_v48 = vpop.f32.mrb[19].mxu1 }
0x2a86   :  { %v7696_v37 = vadd.f32 %v2913_v48, %v7425_v0  ;;  %v3042_v48 = vld [vmem:[#allocation8 + $0x78] sm:$0xff] }
0x2a87   :  { %v2917_v7 = vrot.slane %v2912_v46, 2  ;;  %v2948_v40 = vadd.f32 %v2912_v46, %v7474_v33  ;;  %v3040_v46 = vld [vmem:[#allocation8 + $0x68] sm:$0xff] }
0x2a88   :  { %2963 = vrot.lane.b32.xlu0 %v7696_v37, %s6717_s0  ;;  %v2955_v26 = vadd.f32 %v7696_v37, %v7476_v42 }
0x2a89   :  { %2926 = vrot.lane.b32.xlu1 %v2917_v7, %s6717_s0  ;;  %v2919_v44 = vadd.f32 %v2917_v7, %v7479_v4  ;;  %v5285_v45 = vmul.f32 -1.442695, %v2948_v40  ;;  %v5892_v7 = vpack.c.bf16 %v3042_v48, %v3040_v46  ;;  %v3039_v40 = vld [vmem:[#allocation8 + $0x60] sm:$0xff] }
0x2a8a   :  { %v5286_v28 = vmul.f32 -1.442695, %v2955_v26 }
0x2a8b   :  { %v5284_v63 = vmul.f32 -1.442695, %v2919_v44  ;;  %6390 = vpow2.f32 %v5285_v45 }
0x2a8d   :  { %6392 = vpow2.f32 %v5284_v63 }
0x2a95   :  { %v6391_v47 = vpop.eup %6390 }
0x2a96   :  { %v2952_v19 = vadd.f32 1.0, %v6391_v47 }
0x2a97   :  { %v6393_v18 = vpop.eup %6392 }
0x2a98   :  { %v2923_v22 = vadd.f32 1.0, %v6393_v18  ;;  %6394 = vrcp.f32 %v2952_v19 }
0x2a9a   :  { %6396 = vrcp.f32 %v2923_v22 }
0x2aa2   :  { %v6395_v0 = vpop.eup %6394 }
0x2aa4   :  { %v7703_v35 = vpop.eup %6396 }
0x2aa5   :  { %v2936_v22 = vsub.f32 1.0, %v7703_v35 }
0x2afa   :  { %v2964_v31 = vpop.permute.xlu0 %2963 }
0x2afb   :  { %v2966_v57 = vmul.f32 %v6395_v0, %v2964_v31  ;;  %v2927_v61 = vpop.permute.xlu1 %2926 }
0x2afc   :  { %v2929_v33 = vmul.f32 %v7703_v35, %v2927_v61 }
0x2afd   :  { %2968 = vrot.lane.b32.xlu0 %v2966_v57, %s6717_s0 }
0x2afe   :  { %2931 = vrot.lane.b32.xlu1 %v2929_v33, %s6717_s0 }
0x2b02   :  { %2979 = vrot.lane.b32.xlu1 %v2842_v41, %s6720_s21 }
0x2b06   :  { %2943 = vrot.lane.b32.xlu1 %v2942_v62, %s6721_s25 }
0x2b0a   :  { %2989 = vrot.lane.b32.xlu1 %v2830_v9, %s6721_s25  ;;  %v3036_v9 = vld [vmem:[#allocation8 + $0x48] sm:$0xff] }
0x2b0b   :  { %v5888_v16 = vpack.c.bf16 %v3038_v43, %v3036_v9 }
0x2b0e   :  { %2997 = vrot.lane.b32.xlu1 %v7628_v54, %s6721_s25  ;;  %v3032_v54 = vld [vmem:[#allocation8 + $0x28] sm:$0xff] }
0x2b12   :  { %3005 = vrot.lane.b32.xlu1 %v7561_v10, %s6721_s25  ;;  %v5884_v10 = vpack.c.bf16 %v3034_v38, %v3032_v54 }
0x2b14   :  { %5885 = vmatprep.subr.bf16.mxu0 %v5884_v10  ;;  %v3043_v10 = vld [vmem:[#allocation10] sm:$0x3] }
0x2b15   :  { %v3052_v9 = vrot.slane %v3043_v10, %v7107_v53 }
0x2b6f   :  { %v2969_v3 = vpop.permute.xlu0 %2968 }
0x2b70   :  { %v2971_v12 = vadd.f32 %v2969_v3, %v7476_v42  ;;  %v2932_v5 = vpop.permute.xlu1 %2931 }
0x2b71   :  { %v2934_v59 = vadd.f32 %v2932_v5, %v7479_v4  ;;  %v5886_v4 = vpack.c.bf16 %v3033_v21, %v3031_v30 }
0x2b72   :  { %6398 = vtanh.f32 %v2971_v12 }
0x2b73   :  { %6400 = vtanh.f32 %v2934_v59  ;;  %5887 = vmatpush1.bf16.msra.mxu0 %v5886_v4 }
0x2b74   :  { %5889 = vmatprep.subr.bf16.mxu0 %v5888_v16  ;;  %6402 = vpow2.f32 %v5286_v28  ;;  %v2980_v63 = vpop.permute.xlu1 %2979 }
0x2b77   :  { %5891 = vmatpush1.bf16.msra.mxu0 %v5890_v55 }
0x2b78   :  { %5893 = vmatprep.subr.bf16.mxu0 %v5892_v7  ;;  %v2944_v42 = vpop.permute.xlu1 %2943 }
0x2b79   :  { %v2946_v31 = vmul.f32 %v7703_v35, %v2944_v42 }
0x2b7c   :  { %v6399_v14 = vpop.eup %6398  ;;  %v2990_v62 = vpop.permute.xlu1 %2989 }
0x2b7d   :  { %2975 = vrot.lane.b32.xlu0 %v6399_v14, %s6720_s21  ;;  %v6401_v20 = vpop.eup %6400  ;;  %v2992_v35 = vsel %vm500_vm4, %v7532_v11, %v2990_v62 }
0x2b7e   :  { %v6403_v41 = vpop.eup %6402 }
0x2b7f   :  { %v2959_v34 = vadd.f32 1.0, %v6403_v41 }
0x2b80   :  { %v2998_v12 = vpop.permute.xlu1 %2997 }
0x2b81   :  { %2938 = vrot.lane.b32.xlu0 %v6401_v20, %s6720_s21  ;;  %6404 = vrcp.f32 %v2959_v34  ;;  %v3000_v15 = vsel %vm500_vm4, %v7600_v6, %v2998_v12 }
0x2b84   :  { %v3006_v23 = vpop.permute.xlu1 %3005 }
0x2b85   :  { %2993 = vrot.lane.b32.xlu0 %v7661_v24, %s6721_s25  ;;  %v3041_v24 = vld [vmem:[#allocation8 + $0x70] sm:$0xff] }
0x2b86   :  { %v5894_v44 = vpack.c.bf16 %v3041_v24, %v3039_v40 }
0x2b88   :  { %5895 = vmatpush1.bf16.msra.mxu0 %v5894_v44 }
0x2b89   :  { %3001 = vrot.lane.b32.xlu0 %v7595_v52, %s6721_s25 }
0x2b8b   :  { %v6405_v45 = vpop.eup %6404 }
0x2b8c   :  { %v2973_v52 = vsub.f32 1.0, %v6405_v45  ;;  %v2982_v18 = vmul.f32 %v6405_v45, %v2980_v63  ;;  %v3140_v45 = vadd.s32 8, %v7101_v50  ;;  %v3142_v63 = vand.u32 127, %v248_v49 }
0x2bef   :  { %v2976_v47 = vpop.permute.xlu0 %2975 }
0x2bf0   :  { %v2978_v19 = vmul.f32 %v2976_v47, %v2973_v52  ;;  %v3154_v52 = vand.u32 1, %v3140_v45  ;;  %v7799_v47 = vand.u32 1, %v3142_v63 }
0x2bf2   :  { %v2983_v37 = vadd.f32 %v2982_v18, %v2978_v19  ;;  %v3147_v18 = vand.u32 1, %v7101_v50  ;;  %vm3180_vm8 = vcmp.eq.s32.totalorder %v3154_v52, %v7799_v47  ;;  %v6725_v19 = vmov -1e+30  }
0x2bf3   :  { %v2939_v0 = vpop.permute.xlu0 %2938  ;;  %v7804_v42 = vsel %vm3180_vm8, 0.0, %v6725_v19  ;;  %vm4852_vm15 = vcmp.eq.s32.totalorder %v7101_v50, %v7799_v47  ;;  %v5017_v50 = vld [vmem:[%s8091_s13 + $0x10] sm:$0xff] }
0x2bf4   :  { %v2941_v57 = vmul.f32 %v2939_v0, %v2936_v22  ;;  %2985 = vrot.lane.b32.xlu0 %v2983_v37, %s6721_s25  ;;  %vm3179_vm9 = vcmp.eq.s32.totalorder %v3147_v18, %v7799_v47 }
0x2bf5   :  { %v7806_v37 = vsel %vm3179_vm9, 0.0, %v6725_v19 }
0x2bf6   :  { %v2947_v61 = vadd.f32 %v2946_v31, %v2941_v57 }
0x2bf7   :  { %v2994_v33 = vpop.permute.xlu0 %2993 }
0x2bf8   :  { %3009 = vrot.lane.b32.xlu0 %v7527_v58, %s6721_s25  ;;  %3014 = vrot.lane.b32.xlu1 %v2947_v61, %s6720_s21  ;;  %v2996_v14 = vsel %vm500_vm4, %v7566_v56, %v2994_v33  ;;  %v3008_v56 = vsel %vm500_vm4, %v7666_v29, %v3006_v23 }
0x2bfb   :  { %v3002_v3 = vpop.permute.xlu0 %3001 }
0x2bfc   :  { %3017 = vrot.lane.b32.xlu0 %v7494_v36, %s6721_s25  ;;  %v3004_v11 = vsel %vm500_vm4, %v7633_v8, %v3002_v3 }
0x2bfd   :  { %v3024_v6 = vsel %vm216_vm0, %v3004_v11, %v3008_v56 }
0x2c66   :  { %v2986_v5 = vpop.permute.xlu0 %2985 }
0x2c67   :  { %v2988_v59 = vsel %vm500_vm4, %v7498_v17, %v2986_v5 }
0x2c68   :  { %v3021_v58 = vsel %vm216_vm0, %v2988_v59, %v2992_v35  ;;  %vm5197_vm0 = vcmask 254976  }
0x2c69   :  { %v3022_v36 = vsel %vm218_vm1, %v3021_v58, %v2996_v14 }
0x2c6a   :  { %v3010_v39 = vpop.permute.xlu0 %3009  ;;  %v3023_v2 = vsel %vm220_vm2, %v3022_v36, %v3000_v15  ;;  %v3015_v25 = vpop.permute.xlu1 %3014 }
0x2c6b   :  { %5287 = vmatmul.mubr.msk.f32.vlgmr.msra.gmra.mrb[20].mxu0 %vm353_vm5, %v3023_v2  ;;  %v3012_v17 = vsel %vm500_vm4, %v7689_v27, %v3010_v39  ;;  %v3048_v27 = vrot.slane %v3043_v10, %v7104_v51 }
0x2c6c   :  { %3131 = vmatprep.mubr.f32.mxu0 %v6716_v1  ;;  %v3025_v38 = vsel %vm218_vm1, %v3024_v6, %v3012_v17  ;;  %vm5209_vm1 = vcmask 1024  }
0x2c6e   :  { %v3018_v54 = vpop.permute.xlu0 %3017 }
0x2c6f   :  { %v3020_v60 = vsel %vm500_vm4, %v3015_v25, %v3018_v54 }
0x2c70   :  { %v3026_v8 = vsel %vm220_vm2, %v3025_v38, %v3020_v60 }
0x2c71   :  { %5288 = vmatmul.mubr.msk.f32.gmra.mrb[22].mxu0 %vm353_vm5, %v3026_v8 }
0x2d3e   :  { %v3127_v30 = vpop.f32.mrb[20].mxu0 }
0x2d3f   :  { %v7758_v21 = vadd.f32 %v3127_v30, %v3048_v27  ;;  %v3129_v29 = vpop.f32.mrb[21].mxu0 }
0x2d40   :  { %v3130_v16 = vadd.f32 %v3129_v29, %v3052_v9 }
0x2d41   :  { %5440 = vmatprep.mubr.msk.f32.mxu1 %vm3189_vm6, %v7758_v21 }
0x2d44   :  { %v3133_v20 = vpop.f32.mrb[22].mxu0 }
0x2d45   :  { %v7763_v43 = vadd.f32 %v3133_v20, %v3048_v27  ;;  %v3135_v4 = vpop.f32.mrb[23].mxu0 }
0x2d46   :  { %v3136_v32 = vadd.f32 %v3135_v4, %v3052_v9 }
0x2d47   :  { %v7767_v13 = vpack.i.bf16 %v7763_v43, %v7758_v21 }
0x2d48   :  { %v5902_v51 = vpack.c.bf16 %v3136_v32, %v3130_v16  ;;  %v7769_v55 = vpack.i.bf16 %v3136_v32, %v3130_v16 }
0x2d49   :  { %6046 = vrot.lane.b32.xlu0 %v7767_v13, %s6723_s7  ;;  %6041 = vrot.lane.b32.xlu1 %v7767_v13, %s6717_s0  ;;  %s6726_s0 = smov 40  }
0x2d4a   :  { %5903 = vmatprep.subr.bf16.mxu0 %v5902_v51 }
0x2d4b   :  { %5905 = vmatpush3.bf16.msra.mxu0 %v5902_v51 }
0x2d4d   :  { %3378 = vrot.lane.b32.xlu0 %v7763_v43, %s6724_s22  ;;  %3376 = vrot.lane.b32.xlu1 %v7758_v21, %s6724_s22 }
0x2dbb   :  { %v6047_v53 = vpop.permute.xlu0 %6046  ;;  %v6042_v26 = vpop.permute.xlu1 %6041 }
0x2dbc   :  { %v6049_v28 = vunpack.i.h.bf16 %v6047_v53  ;;  %v6048_v41 = vunpack.i.l.bf16 %v6047_v53  ;;  %v6044_v34 = vunpack.i.h.bf16 %v6042_v26  ;;  %v6043_v46 = vunpack.i.l.bf16 %v6042_v26 }
0x2dbe   :  { %v5896_v7 = vpack.c.bf16 %v6044_v34, %v6043_v46  ;;  %v5906_v40 = vpack.c.bf16 %v6049_v28, %v6048_v41 }
0x2dbf   :  { %v3377_v24 = vpop.permute.xlu1 %3376  ;;  %v3379_v44 = vpop.permute.xlu0 %3378 }
0x2dc0   :  { %5898 = vmatprep.subr.msk.bf16.mxu1 %vm7781_vm7, %v5896_v7 }
0x2dc1   :  { %5901 = vmatpush3.bf16.xpose.msk.msra.mxu1 %vm7781_vm7, %v5896_v7 }
0x2dc2   :  { %5908 = vmatprep.subr.msk.bf16.mxu1 %vm7781_vm7, %v5906_v40 }
0x2dc8   :  { %5441 = vmatmul.mubr.msk.f32.vlgmr.msra.gmra.mrb[20].mxu1 %vm3189_vm6, %v7763_v43 }
0x2dc9   :  { %5911 = vmatpush3.bf16.xpose.msk.msra.mxu1 %vm7781_vm7, %v5906_v40  ;;  %5454 = vmatprep.mubr.msk.f32.mxu1 %vm3189_vm6, %v3377_v24 }
0x2dd0   :  { %5455 = vmatmul.mubr.msk.f32.vlgmr.msra.gmra.mrb[22].mxu1 %vm3189_vm6, %v3379_v44 }
0x2e9b   :  { %v5442_v22 = vpop.f32.mrb[20].mxu1 }
0x2e9c   :  { %v3270_v0 = vadd.f32 %v5442_v22, %v7804_v42  ;;  %v3264_v31 = vpop.f32.mrb[21].mxu1 }
0x2e9d   :  { %v3265_v49 = vadd.f32 %v3264_v31, %v7806_v37 }
0x2e9e   :  { %v3276_v57 = vsel %vm258_vm3, %v3270_v0, -inf }
0x2e9f   :  { %3277 = vmax.xlane.f32.xlu0 %v3276_v57  ;;  %v3273_v61 = vsel %vm258_vm3, %v3265_v49, -inf }
0x2ea0   :  { %3274 = vmax.xlane.f32.xlu1 %v3273_v61 }
0x2ea3   :  { %v5456_v33 = vpop.f32.mrb[22].mxu1 }
0x2ea4   :  { %v3464_v62 = vadd.f32 %v5456_v33, %v7804_v42  ;;  %v3458_v3 = vpop.f32.mrb[23].mxu1 }
0x2ea5   :  { %v3459_v12 = vadd.f32 %v3458_v3, %v7806_v37 }
0x2ea6   :  { %v3470_v5 = vsel %vm258_vm3, %v3464_v62, -inf }
0x2ea7   :  { %3471 = vmax.xlane.f32.xlu1 %v3470_v5  ;;  %v3467_v35 = vsel %vm258_vm3, %v3459_v12, -inf }
0x2ea8   :  { %3468 = vmax.xlane.f32.xlu0 %v3467_v35 }
0x2f2c   :  { %v3278_v59 = vpop.xlane.xlu0 %3277 }
0x2f2d   :  { %v3280_v14 = vsub.f32 %v3270_v0, %v3278_v59  ;;  %v3275_v58 = vpop.xlane.xlu1 %3274 }
0x2f2e   :  { %v3279_v15 = vsub.f32 %v3265_v49, %v3275_v58 }
0x2f2f   :  { %v3283_v36 = vmul.f32 1.442695, %v3280_v14 }
0x2f30   :  { %v3281_v23 = vmul.f32 1.442695, %v3279_v15 }
0x2f31   :  { %6406 = vpow2.f32 %v3283_v36 }
0x2f32   :  { %6408 = vpow2.f32 %v3281_v23 }
0x2f34   :  { %v3472_v39 = vpop.xlane.xlu1 %3471 }
0x2f35   :  { %v3474_v2 = vsub.f32 %v3464_v62, %v3472_v39  ;;  %v3469_v11 = vpop.xlane.xlu0 %3468 }
0x2f36   :  { %v3473_v17 = vsub.f32 %v3459_v12, %v3469_v11 }
0x2f37   :  { %v3477_v56 = vmul.f32 1.442695, %v3474_v2 }
0x2f38   :  { %v3475_v6 = vmul.f32 1.442695, %v3473_v17 }
0x2f39   :  { %6410 = vpow2.f32 %v3477_v56 }
0x2f3a   :  { %6412 = vpow2.f32 %v3475_v6 }
0x2f3b   :  { %v6407_v25 = vpop.eup %6406 }
0x2f3c   :  { %v6409_v54 = vpop.eup %6408  ;;  %v3288_v38 = vsel %vm258_vm3, %v6407_v25, 0.0 }
0x2f3d   :  { %3289 = vadd.xlane.f32.xlu1 %v3288_v38  ;;  %v3285_v60 = vsel %vm258_vm3, %v6409_v54, 0.0 }
0x2f3e   :  { %3286 = vadd.xlane.f32.xlu0 %v3285_v60 }
0x2f43   :  { %v6411_v8 = vpop.eup %6410 }
0x2f44   :  { %v6413_v10 = vpop.eup %6412  ;;  %v3482_v27 = vsel %vm258_vm3, %v6411_v8, 0.0 }
0x2f45   :  { %3483 = vadd.xlane.f32.xlu1 %v3482_v27  ;;  %v3479_v30 = vsel %vm258_vm3, %v6413_v10, 0.0 }
0x2f46   :  { %3480 = vadd.xlane.f32.xlu0 %v3479_v30 }
0x2f56   :  { %6056 = vrot.lane.b32.xlu1 %v7767_v13, %s6722_s24 }
0x2f5a   :  { %3578 = vrot.lane.b32.xlu1 %v7758_v21, %s6718_s16 }
0x2f5c   :  { %6051 = vrot.lane.b32.xlu0 %v7769_v55, %s6724_s22 }
0x2f60   :  { %3580 = vrot.lane.b32.xlu0 %v7763_v43, %s6718_s16 }
0x2fca   :  { %v3290_v29 = vpop.xlane.xlu1 %3289 }
0x2fcb   :  { %6414 = vrcp.f32 %v3290_v29  ;;  %v3287_v9 = vpop.xlane.xlu0 %3286 }
0x2fcc   :  { %6416 = vrcp.f32 %v3287_v9 }
0x2fd2   :  { %v3484_v20 = vpop.xlane.xlu1 %3483 }
0x2fd3   :  { %6418 = vrcp.f32 %v3484_v20  ;;  %v3481_v4 = vpop.xlane.xlu0 %3480 }
0x2fd4   :  { %6420 = vrcp.f32 %v3481_v4 }
0x2fd5   :  { %v6415_v16 = vpop.eup %6414 }
0x2fd6   :  { %v6417_v32 = vpop.eup %6416  ;;  %v6057_v51 = vpop.permute.xlu1 %6056  ;;  %v3294_v53 = vmul.f32 %v6415_v16, %v6407_v25 }
0x2fd7   :  { %v6052_v26 = vpop.permute.xlu0 %6051  ;;  %v3293_v28 = vmul.f32 %v6417_v32, %v6409_v54  ;;  %v6059_v41 = vunpack.i.h.bf16 %v6057_v51  ;;  %v6058_v34 = vunpack.i.l.bf16 %v6057_v51 }
0x2fd8   :  { %v6054_v46 = vunpack.i.h.bf16 %v6052_v26  ;;  %v6053_v7 = vunpack.i.l.bf16 %v6052_v26 }
0x2fd9   :  { %5447 = vmatprep.mubr.msk.f32.mxu0 %vm258_vm3, %v3293_v28  ;;  %v5916_v24 = vpack.c.bf16 %v6059_v41, %v6058_v34 }
0x2fda   :  { %v5912_v40 = vpack.c.bf16 %v6054_v46, %v6053_v7  ;;  %5448 = vmatmul.mubr.msk.f32.vlgmr.msra.gmra.mrb[24].mxu0 %vm258_vm3, %v3294_v53  ;;  %v3579_v18 = vpop.permute.xlu1 %3578 }
0x2fdb   :  { %v3581_v19 = vpop.permute.xlu0 %3580 }
0x2fdc   :  { %5913 = vmatprep.subr.bf16.mxu0 %v5912_v40 }
0x2fdd   :  { %v6419_v44 = vpop.eup %6418  ;;  %5915 = vmatpush3.bf16.msra.mxu0 %v5912_v40 }
0x2fde   :  { %v6421_v45 = vpop.eup %6420  ;;  %5918 = vmatprep.subr.msk.bf16.mxu0 %vm7781_vm7, %v5916_v24  ;;  %v3488_v52 = vmul.f32 %v6419_v44, %v6411_v8 }
0x2fdf   :  { %v3487_v63 = vmul.f32 %v6421_v45, %v6413_v10 }
0x2fe1   :  { %5461 = vmatprep.mubr.msk.f32.mxu0 %vm258_vm3, %v3487_v63 }
0x2fe2   :  { %5462 = vmatmul.mubr.msk.f32.vlgmr.msra.gmra.mrb[26].mxu0 %vm258_vm3, %v3488_v52 }
0x2fe3   :  { %5468 = vmatprep.mubr.msk.f32.mxu0 %vm3189_vm6, %v3579_v18 }
0x2fe6   :  { %5921 = vmatpush3.bf16.xpose.msk.msra.mxu0 %vm7781_vm7, %v5916_v24 }
0x2fed   :  { %5469 = vmatmul.mubr.msk.f32.vlgmr.msra.gmra.mrb[28].mxu0 %vm3189_vm6, %v3581_v19 }
0x30ad   :  { %v7838_v22 = vpop.f32.mrb[24].mxu0 }
0x30ae   :  { %v7840_v0 = vpop.f32.mrb[25].mxu0 }
0x30b5   :  { %v7842_v31 = vpop.f32.mrb[26].mxu0 }
0x30b6   :  { %v7844_v49 = vpop.f32.mrb[27].mxu0 }
0x30b7   :  { %v6115_v57 = vpack.i.bf16 %v7842_v31, %v7844_v49 }
0x30c0   :  { %v5470_v61 = vpop.f32.mrb[28].mxu0 }
0x30c1   :  { %v3666_v33 = vadd.f32 %v5470_v61, %v7804_v42  ;;  %v3660_v62 = vpop.f32.mrb[29].mxu0 }
0x30c2   :  { %v3661_v3 = vadd.f32 %v3660_v62, %v7806_v37 }
0x30c3   :  { %v3672_v12 = vsel %vm258_vm3, %v3666_v33, -inf }
0x30c4   :  { %3673 = vmax.xlane.f32.xlu0 %v3672_v12  ;;  %v3669_v5 = vsel %vm258_vm3, %v3661_v3, -inf }
0x30c5   :  { %3670 = vmax.xlane.f32.xlu1 %v3669_v5 }
0x3151   :  { %v3674_v35 = vpop.xlane.xlu0 %3673 }
0x3152   :  { %v3676_v59 = vsub.f32 %v3666_v33, %v3674_v35  ;;  %v3671_v14 = vpop.xlane.xlu1 %3670 }
0x3153   :  { %v3675_v58 = vsub.f32 %v3661_v3, %v3671_v14 }
0x3154   :  { %v3679_v15 = vmul.f32 1.442695, %v3676_v59 }
0x3155   :  { %v3677_v36 = vmul.f32 1.442695, %v3675_v58 }
0x3156   :  { %6422 = vpow2.f32 %v3679_v15 }
0x3157   :  { %6424 = vpow2.f32 %v3677_v36 }
0x3160   :  { %v6423_v23 = vpop.eup %6422 }
0x3161   :  { %v6425_v39 = vpop.eup %6424  ;;  %v3684_v2 = vsel %vm258_vm3, %v6423_v23, 0.0 }
0x3162   :  { %3685 = vadd.xlane.f32.xlu1 %v3684_v2  ;;  %v3681_v11 = vsel %vm258_vm3, %v6425_v39, 0.0 }
0x3163   :  { %3682 = vadd.xlane.f32.xlu0 %v3681_v11 }
0x3173   :  { %6066 = vrot.lane.b32.xlu1 %v7767_v13, %s6726_s0 }
0x3177   :  { %3778 = vrot.lane.b32.xlu1 %v7758_v21, %s6727_s2 }
0x3179   :  { %6061 = vrot.lane.b32.xlu0 %v7769_v55, %s6718_s16  ;;  %s6728_s16 = smov 24  }
0x317d   :  { %3780 = vrot.lane.b32.xlu0 %v7763_v43, %s6727_s2 }
0x31ef   :  { %v3686_v17 = vpop.xlane.xlu1 %3685 }
0x31f0   :  { %6426 = vrcp.f32 %v3686_v17  ;;  %v3683_v56 = vpop.xlane.xlu0 %3682 }
0x31f1   :  { %6428 = vrcp.f32 %v3683_v56 }
0x31f3   :  { %v6067_v6 = vpop.permute.xlu1 %6066 }
0x31f4   :  { %v6062_v25 = vpop.permute.xlu0 %6061  ;;  %v6069_v54 = vunpack.i.h.bf16 %v6067_v6  ;;  %v6068_v38 = vunpack.i.l.bf16 %v6067_v6 }
0x31f5   :  { %v6064_v60 = vunpack.i.h.bf16 %v6062_v25  ;;  %v6063_v8 = vunpack.i.l.bf16 %v6062_v25 }
0x31f6   :  { %v5926_v27 = vpack.c.bf16 %v6069_v54, %v6068_v38 }
0x31f7   :  { %v5922_v10 = vpack.c.bf16 %v6064_v60, %v6063_v8  ;;  %v3779_v4 = vpop.permute.xlu1 %3778 }
0x31f8   :  { %v3781_v16 = vpop.permute.xlu0 %3780 }
0x31f9   :  { %5923 = vmatprep.subr.bf16.mxu1 %v5922_v10 }
0x31fa   :  { %v6427_v30 = vpop.eup %6426  ;;  %5925 = vmatpush3.bf16.msra.mxu1 %v5922_v10 }
0x31fb   :  { %v6429_v29 = vpop.eup %6428  ;;  %5928 = vmatprep.subr.msk.bf16.mxu1 %vm7781_vm7, %v5926_v27  ;;  %v3690_v20 = vmul.f32 %v6427_v30, %v6423_v23 }
0x31fc   :  { %v3689_v9 = vmul.f32 %v6429_v29, %v6425_v39 }
0x31fe   :  { %5475 = vmatprep.mubr.msk.f32.mxu1 %vm258_vm3, %v3689_v9 }
0x31ff   :  { %5476 = vmatmul.mubr.msk.f32.vlgmr.msra.gmra.mrb[24].mxu1 %vm258_vm3, %v3690_v20 }
0x3200   :  { %5482 = vmatprep.mubr.msk.f32.mxu1 %vm3189_vm6, %v3779_v4 }
0x3203   :  { %5931 = vmatpush3.bf16.xpose.msk.msra.mxu1 %vm7781_vm7, %v5926_v27 }
0x320a   :  { %5483 = vmatmul.mubr.msk.f32.vlgmr.msra.gmra.mrb[26].mxu1 %vm3189_vm6, %v3781_v16 }
0x32d2   :  { %v7870_v32 = vpop.f32.mrb[24].mxu1 }
0x32d3   :  { %v7872_v51 = vpop.f32.mrb[25].mxu1 }
0x32d4   :  { %v6120_v53 = vpack.i.bf16 %v7870_v32, %v7872_v51 }
0x32dd   :  { %v5484_v26 = vpop.f32.mrb[26].mxu1 }
0x32de   :  { %v3866_v28 = vadd.f32 %v5484_v26, %v7804_v42  ;;  %v3860_v41 = vpop.f32.mrb[27].mxu1 }
0x32df   :  { %v3861_v34 = vadd.f32 %v3860_v41, %v7806_v37 }
0x32e0   :  { %v3872_v46 = vsel %vm258_vm3, %v3866_v28, -inf }
0x32e1   :  { %3873 = vmax.xlane.f32.xlu0 %v3872_v46  ;;  %v3869_v7 = vsel %vm258_vm3, %v3861_v34, -inf }
0x32e2   :  { %3870 = vmax.xlane.f32.xlu1 %v3869_v7 }
0x336e   :  { %v3874_v40 = vpop.xlane.xlu0 %3873 }
0x336f   :  { %v3876_v24 = vsub.f32 %v3866_v28, %v3874_v40  ;;  %v3871_v44 = vpop.xlane.xlu1 %3870 }
0x3370   :  { %v3875_v45 = vsub.f32 %v3861_v34, %v3871_v44 }
0x3371   :  { %v3879_v63 = vmul.f32 1.442695, %v3876_v24 }
0x3372   :  { %v3877_v52 = vmul.f32 1.442695, %v3875_v45 }
0x3373   :  { %6430 = vpow2.f32 %v3879_v63 }
0x3374   :  { %6432 = vpow2.f32 %v3877_v52 }
0x337d   :  { %v6431_v18 = vpop.eup %6430 }
0x337e   :  { %v6433_v19 = vpop.eup %6432  ;;  %v3884_v61 = vsel %vm258_vm3, %v6431_v18, 0.0 }
0x337f   :  { %3885 = vadd.xlane.f32.xlu1 %v3884_v61  ;;  %v3881_v33 = vsel %vm258_vm3, %v6433_v19, 0.0 }
0x3380   :  { %3882 = vadd.xlane.f32.xlu0 %v3881_v33 }
0x3390   :  { %6076 = vrot.lane.b32.xlu1 %v7767_v13, %s6721_s25 }
0x3394   :  { %3978 = vrot.lane.b32.xlu1 %v7758_v21, %s6720_s21 }
0x3396   :  { %6071 = vrot.lane.b32.xlu0 %v7769_v55, %s6727_s2 }
0x339a   :  { %3980 = vrot.lane.b32.xlu0 %v7763_v43, %s6720_s21 }
0x340c   :  { %v3886_v62 = vpop.xlane.xlu1 %3885 }
0x340d   :  { %6434 = vrcp.f32 %v3886_v62  ;;  %v3883_v3 = vpop.xlane.xlu0 %3882 }
0x340e   :  { %6436 = vrcp.f32 %v3883_v3 }
0x3410   :  { %v6077_v12 = vpop.permute.xlu1 %6076 }
0x3411   :  { %v6072_v5 = vpop.permute.xlu0 %6071  ;;  %v6079_v35 = vunpack.i.h.bf16 %v6077_v12  ;;  %v6078_v59 = vunpack.i.l.bf16 %v6077_v12 }
0x3412   :  { %v6074_v14 = vunpack.i.h.bf16 %v6072_v5  ;;  %v6073_v58 = vunpack.i.l.bf16 %v6072_v5 }
0x3413   :  { %v5936_v36 = vpack.c.bf16 %v6079_v35, %v6078_v59 }
0x3414   :  { %v5932_v15 = vpack.c.bf16 %v6074_v14, %v6073_v58  ;;  %v3979_v17 = vpop.permute.xlu1 %3978 }
0x3415   :  { %v3981_v56 = vpop.permute.xlu0 %3980 }
0x3416   :  { %5933 = vmatprep.subr.bf16.mxu0 %v5932_v15 }
0x3417   :  { %v6435_v23 = vpop.eup %6434  ;;  %5935 = vmatpush3.bf16.msra.mxu0 %v5932_v15 }
0x3418   :  { %v6437_v39 = vpop.eup %6436  ;;  %5938 = vmatprep.subr.msk.bf16.mxu0 %vm7781_vm7, %v5936_v36  ;;  %v3890_v11 = vmul.f32 %v6435_v23, %v6431_v18 }
0x3419   :  { %v3889_v2 = vmul.f32 %v6437_v39, %v6433_v19 }
0x341b   :  { %5489 = vmatprep.mubr.msk.f32.mxu0 %vm258_vm3, %v3889_v2 }
0x341c   :  { %5490 = vmatmul.mubr.msk.f32.vlgmr.msra.gmra.mrb[30].mxu0 %vm258_vm3, %v3890_v11 }
0x341d   :  { %5496 = vmatprep.mubr.msk.f32.mxu0 %vm3189_vm6, %v3979_v17 }
0x3420   :  { %5941 = vmatpush3.bf16.xpose.msk.msra.mxu0 %vm7781_vm7, %v5936_v36 }
0x3427   :  { %5497 = vmatmul.mubr.msk.f32.vlgmr.msra.gmra.mrb[32].mxu0 %vm3189_vm6, %v3981_v56 }
0x34ef   :  { %v7898_v6 = vpop.f32.mrb[30].mxu0 }
0x34f0   :  { %v7900_v25 = vpop.f32.mrb[31].mxu0 }
0x34f1   :  { %v6125_v54 = vpack.i.bf16 %v7898_v6, %v7900_v25 }
0x34fa   :  { %v5498_v38 = vpop.f32.mrb[32].mxu0 }
0x34fb   :  { %v4066_v60 = vadd.f32 %v5498_v38, %v7804_v42  ;;  %v4060_v8 = vpop.f32.mrb[33].mxu0 }
0x34fc   :  { %v4061_v10 = vadd.f32 %v4060_v8, %v7806_v37 }
0x34fd   :  { %v4072_v27 = vsel %vm258_vm3, %v4066_v60, -inf }
0x34fe   :  { %4073 = vmax.xlane.f32.xlu0 %v4072_v27  ;;  %v4069_v30 = vsel %vm258_vm3, %v4061_v10, -inf }
0x34ff   :  { %4070 = vmax.xlane.f32.xlu1 %v4069_v30 }
0x358b   :  { %v4074_v29 = vpop.xlane.xlu0 %4073 }
0x358c   :  { %v4076_v9 = vsub.f32 %v4066_v60, %v4074_v29  ;;  %v4071_v20 = vpop.xlane.xlu1 %4070 }
0x358d   :  { %v4075_v4 = vsub.f32 %v4061_v10, %v4071_v20 }
0x358e   :  { %v4079_v16 = vmul.f32 1.442695, %v4076_v9 }
0x358f   :  { %v4077_v26 = vmul.f32 1.442695, %v4075_v4 }
0x3590   :  { %6438 = vpow2.f32 %v4079_v16 }
0x3591   :  { %6440 = vpow2.f32 %v4077_v26 }
0x359a   :  { %v6439_v28 = vpop.eup %6438 }
0x359b   :  { %v6441_v41 = vpop.eup %6440  ;;  %v4084_v34 = vsel %vm258_vm3, %v6439_v28, 0.0 }
0x359c   :  { %4085 = vadd.xlane.f32.xlu1 %v4084_v34  ;;  %v4081_v46 = vsel %vm258_vm3, %v6441_v41, 0.0 }
0x359d   :  { %4082 = vadd.xlane.f32.xlu0 %v4081_v46 }
0x35ad   :  { %6086 = vrot.lane.b32.xlu1 %v7767_v13, %s6728_s16 }
0x35b1   :  { %4178 = vrot.lane.b32.xlu1 %v7758_v21, %s6729_s23 }
0x35b3   :  { %6081 = vrot.lane.b32.xlu0 %v7769_v55, %s6720_s21 }
0x35b7   :  { %4180 = vrot.lane.b32.xlu0 %v7763_v43, %s6729_s23 }
0x3629   :  { %v4086_v7 = vpop.xlane.xlu1 %4085 }
0x362a   :  { %6442 = vrcp.f32 %v4086_v7  ;;  %v4083_v40 = vpop.xlane.xlu0 %4082 }
0x362b   :  { %6444 = vrcp.f32 %v4083_v40 }
0x362d   :  { %v6087_v24 = vpop.permute.xlu1 %6086 }
0x362e   :  { %v6082_v44 = vpop.permute.xlu0 %6081  ;;  %v6089_v45 = vunpack.i.h.bf16 %v6087_v24  ;;  %v6088_v63 = vunpack.i.l.bf16 %v6087_v24 }
0x362f   :  { %v6084_v52 = vunpack.i.h.bf16 %v6082_v44  ;;  %v6083_v18 = vunpack.i.l.bf16 %v6082_v44 }
0x3630   :  { %v5946_v61 = vpack.c.bf16 %v6089_v45, %v6088_v63 }
0x3631   :  { %v5942_v19 = vpack.c.bf16 %v6084_v52, %v6083_v18  ;;  %v4179_v5 = vpop.permute.xlu1 %4178 }
0x3632   :  { %v4181_v35 = vpop.permute.xlu0 %4180 }
0x3633   :  { %5943 = vmatprep.subr.bf16.mxu1 %v5942_v19 }
0x3634   :  { %v6443_v33 = vpop.eup %6442  ;;  %5945 = vmatpush3.bf16.msra.mxu1 %v5942_v19 }
0x3635   :  { %v6445_v62 = vpop.eup %6444  ;;  %5948 = vmatprep.subr.msk.bf16.mxu1 %vm7781_vm7, %v5946_v61  ;;  %v4090_v12 = vmul.f32 %v6443_v33, %v6439_v28 }
0x3636   :  { %v4089_v3 = vmul.f32 %v6445_v62, %v6441_v41 }
0x3638   :  { %5503 = vmatprep.mubr.msk.f32.mxu1 %vm258_vm3, %v4089_v3 }
0x3639   :  { %5504 = vmatmul.mubr.msk.f32.vlgmr.msra.gmra.mrb[28].mxu1 %vm258_vm3, %v4090_v12 }
0x363a   :  { %5510 = vmatprep.mubr.msk.f32.mxu1 %vm3189_vm6, %v4179_v5 }
0x363d   :  { %5951 = vmatpush3.bf16.xpose.msk.msra.mxu1 %vm7781_vm7, %v5946_v61 }
0x3644   :  { %5511 = vmatmul.mubr.msk.f32.vlgmr.msra.gmra.mrb[30].mxu1 %vm3189_vm6, %v4181_v35 }
0x370c   :  { %v7926_v59 = vpop.f32.mrb[28].mxu1 }
0x370d   :  { %v7928_v14 = vpop.f32.mrb[29].mxu1 }
0x370e   :  { %v6130_v58 = vpack.i.bf16 %v7926_v59, %v7928_v14  ;;  %v6731_v59 = vmov 0.0|0.0   ;;  %v4927_v14 = vld [vmem:[#allocation11] sm:$0xff] }
0x3717   :  { %v5512_v15 = vpop.f32.mrb[30].mxu1 }
0x3718   :  { %v4266_v36 = vadd.f32 %v5512_v15, %v7804_v42  ;;  %v4260_v23 = vpop.f32.mrb[31].mxu1 }
0x3719   :  { %v4261_v39 = vadd.f32 %v4260_v23, %v7806_v37 }
0x371a   :  { %v4272_v2 = vsel %vm258_vm3, %v4266_v36, -inf }
0x371b   :  { %4273 = vmax.xlane.f32.xlu0 %v4272_v2  ;;  %v4269_v11 = vsel %vm258_vm3, %v4261_v39, -inf }
0x371c   :  { %4270 = vmax.xlane.f32.xlu1 %v4269_v11 }
0x37a8   :  { %v4274_v17 = vpop.xlane.xlu0 %4273 }
0x37a9   :  { %v4276_v56 = vsub.f32 %v4266_v36, %v4274_v17  ;;  %v4271_v38 = vpop.xlane.xlu1 %4270 }
0x37aa   :  { %v4275_v60 = vsub.f32 %v4261_v39, %v4271_v38 }
0x37ab   :  { %v4279_v8 = vmul.f32 1.442695, %v4276_v56 }
0x37ac   :  { %v4277_v10 = vmul.f32 1.442695, %v4275_v60 }
0x37ad   :  { %6446 = vpow2.f32 %v4279_v8 }
0x37ae   :  { %6448 = vpow2.f32 %v4277_v10 }
0x37b7   :  { %v6447_v27 = vpop.eup %6446 }
0x37b8   :  { %v6449_v30 = vpop.eup %6448  ;;  %v4284_v29 = vsel %vm258_vm3, %v6447_v27, 0.0 }
0x37b9   :  { %4285 = vadd.xlane.f32.xlu1 %v4284_v29  ;;  %v4281_v9 = vsel %vm258_vm3, %v6449_v30, 0.0 }
0x37ba   :  { %4282 = vadd.xlane.f32.xlu0 %v4281_v9 }
0x37ca   :  { %6096 = vrot.lane.b32.xlu1 %v7767_v13, %s6704_s27 }
0x37ce   :  { %4378 = vrot.lane.b32.xlu1 %v7758_v21, %s6719_s5 }
0x37d0   :  { %6091 = vrot.lane.b32.xlu0 %v7769_v55, %s6729_s23 }
0x37d4   :  { %4380 = vrot.lane.b32.xlu0 %v7763_v43, %s6719_s5 }
0x3846   :  { %v4286_v20 = vpop.xlane.xlu1 %4285 }
0x3847   :  { %6450 = vrcp.f32 %v4286_v20  ;;  %v4283_v4 = vpop.xlane.xlu0 %4282 }
0x3848   :  { %6452 = vrcp.f32 %v4283_v4 }
0x384a   :  { %v6097_v16 = vpop.permute.xlu1 %6096 }
0x384b   :  { %v6092_v26 = vpop.permute.xlu0 %6091  ;;  %v6099_v28 = vunpack.i.h.bf16 %v6097_v16  ;;  %v6098_v41 = vunpack.i.l.bf16 %v6097_v16 }
0x384c   :  { %v6094_v34 = vunpack.i.h.bf16 %v6092_v26  ;;  %v6093_v46 = vunpack.i.l.bf16 %v6092_v26 }
0x384d   :  { %v5956_v40 = vpack.c.bf16 %v6099_v28, %v6098_v41 }
0x384e   :  { %v5952_v7 = vpack.c.bf16 %v6094_v34, %v6093_v46  ;;  %v4379_v52 = vpop.permute.xlu1 %4378 }
0x384f   :  { %v4381_v18 = vpop.permute.xlu0 %4380 }
0x3850   :  { %5953 = vmatprep.subr.bf16.mxu0 %v5952_v7 }
0x3851   :  { %v6451_v24 = vpop.eup %6450  ;;  %5955 = vmatpush3.bf16.msra.mxu0 %v5952_v7 }
0x3852   :  { %v6453_v44 = vpop.eup %6452  ;;  %5958 = vmatprep.subr.msk.bf16.mxu0 %vm7781_vm7, %v5956_v40  ;;  %v4290_v63 = vmul.f32 %v6451_v24, %v6447_v27 }
0x3853   :  { %v4289_v45 = vmul.f32 %v6453_v44, %v6449_v30 }
0x3855   :  { %5517 = vmatprep.mubr.msk.f32.mxu0 %vm258_vm3, %v4289_v45 }
0x3856   :  { %5518 = vmatmul.mubr.msk.f32.vlgmr.msra.gmra.mrb[34].mxu0 %vm258_vm3, %v4290_v63 }
0x3857   :  { %5524 = vmatprep.mubr.msk.f32.mxu0 %vm3189_vm6, %v4379_v52 }
0x385a   :  { %5961 = vmatpush3.bf16.xpose.msk.msra.mxu0 %vm7781_vm7, %v5956_v40 }
0x3861   :  { %5525 = vmatmul.mubr.msk.f32.vlgmr.msra.gmra.mrb[36].mxu0 %vm3189_vm6, %v4381_v18 }
0x3929   :  { %v7954_v19 = vpop.f32.mrb[34].mxu0 }
0x392a   :  { %v7956_v61 = vpop.f32.mrb[35].mxu0 }
0x392b   :  { %v6135_v33 = vpack.i.bf16 %v7954_v19, %v7956_v61  ;;  %v4929_v19 = vld [vmem:[#allocation11 + $0x10] sm:$0xff] }
0x3934   :  { %v5526_v62 = vpop.f32.mrb[36].mxu0 }
0x3935   :  { %v4466_v3 = vadd.f32 %v5526_v62, %v7804_v42  ;;  %v4460_v12 = vpop.f32.mrb[37].mxu0 }
0x3936   :  { %v4461_v5 = vadd.f32 %v4460_v12, %v7806_v37 }
0x3937   :  { %v4472_v35 = vsel %vm258_vm3, %v4466_v3, -inf }
0x3938   :  { %4473 = vmax.xlane.f32.xlu0 %v4472_v35  ;;  %v4469_v15 = vsel %vm258_vm3, %v4461_v5, -inf }
0x3939   :  { %4470 = vmax.xlane.f32.xlu1 %v4469_v15 }
0x39c5   :  { %v4474_v36 = vpop.xlane.xlu0 %4473 }
0x39c6   :  { %v4476_v23 = vsub.f32 %v4466_v3, %v4474_v36  ;;  %v4471_v39 = vpop.xlane.xlu1 %4470 }
0x39c7   :  { %v4475_v2 = vsub.f32 %v4461_v5, %v4471_v39  ;;  %v4930_v39 = vld [vmem:[#allocation11 + $0x18] sm:$0xff] }
0x39c8   :  { %v4479_v11 = vmul.f32 1.442695, %v4476_v23 }
0x39c9   :  { %v4477_v17 = vmul.f32 1.442695, %v4475_v2 }
0x39ca   :  { %6454 = vpow2.f32 %v4479_v11 }
0x39cb   :  { %6456 = vpow2.f32 %v4477_v17  ;;  %v5983_v17 = vpack.c.bf16 %v4930_v39, %v4929_v19  ;;  %v5022_v19 = vld [vmem:[%s8091_s13 + $0x38] sm:$0xff]  ;;  %v5105_v39 = vld [vmem:[#allocation14 + $0x8] sm:$0xff] }
0x39d4   :  { %v6455_v56 = vpop.eup %6454 }
0x39d5   :  { %v6457_v38 = vpop.eup %6456  ;;  %v4484_v60 = vsel %vm258_vm3, %v6455_v56, 0.0 }
0x39d6   :  { %4485 = vadd.xlane.f32.xlu1 %v4484_v60  ;;  %v4481_v8 = vsel %vm258_vm3, %v6457_v38, 0.0 }
0x39d7   :  { %4482 = vadd.xlane.f32.xlu0 %v4481_v8  ;;  %v4933_v8 = vld [vmem:[#allocation11 + $0x30] sm:$0xff] }
0x39e7   :  { %6106 = vrot.lane.b32.xlu1 %v7767_v13, %s6708_s30 }
0x39eb   :  { %4578 = vrot.lane.b32.xlu1 %v7758_v21, %s6730_s10 }
0x39ed   :  { %6101 = vrot.lane.b32.xlu0 %v7769_v55, %s6719_s5 }
0x39f1   :  { %4580 = vrot.lane.b32.xlu0 %v7763_v43, %s6730_s10 }
0x3a63   :  { %v4486_v10 = vpop.xlane.xlu1 %4485 }
0x3a64   :  { %6458 = vrcp.f32 %v4486_v10  ;;  %v4483_v27 = vpop.xlane.xlu0 %4482  ;;  %v4934_v10 = vld [vmem:[#allocation11 + $0x38] sm:$0xff] }
0x3a65   :  { %6460 = vrcp.f32 %v4483_v27  ;;  %v5989_v27 = vpack.c.bf16 %v4934_v10, %v4933_v8  ;;  %v5340_v10 = vld [vmem:[#allocation13] ss:$0 sm:$0xff] }
0x3a67   :  { %v6107_v30 = vpop.permute.xlu1 %6106 }
0x3a68   :  { %v6102_v29 = vpop.permute.xlu0 %6101  ;;  %v6109_v9 = vunpack.i.h.bf16 %v6107_v30  ;;  %v6108_v20 = vunpack.i.l.bf16 %v6107_v30 }
0x3a69   :  { %v6104_v4 = vunpack.i.h.bf16 %v6102_v29  ;;  %v6103_v13 = vunpack.i.l.bf16 %v6102_v29 }
0x3a6a   :  { %v5966_v26 = vpack.c.bf16 %v6109_v9, %v6108_v20 }
0x3a6b   :  { %v5962_v16 = vpack.c.bf16 %v6104_v4, %v6103_v13  ;;  %v4579_v34 = vpop.permute.xlu1 %4578 }
0x3a6c   :  { %v4581_v46 = vpop.permute.xlu0 %4580 }
0x3a6d   :  { %5963 = vmatprep.subr.bf16.mxu1 %v5962_v16 }
0x3a6e   :  { %v6459_v21 = vpop.eup %6458  ;;  %5965 = vmatpush3.bf16.msra.mxu1 %v5962_v16 }
0x3a6f   :  { %v6461_v28 = vpop.eup %6460  ;;  %5968 = vmatprep.subr.msk.bf16.mxu1 %vm7781_vm7, %v5966_v26  ;;  %v4490_v41 = vmul.f32 %v6459_v21, %v6455_v56  ;;  %v4931_v56 = vld [vmem:[#allocation11 + $0x20] sm:$0xff] }
0x3a70   :  { %v4489_v43 = vmul.f32 %v6461_v28, %v6457_v38  ;;  %v4932_v38 = vld [vmem:[#allocation11 + $0x28] sm:$0xff] }
0x3a71   :  { %v5986_v60 = vpack.c.bf16 %v4932_v38, %v4931_v56  ;;  %v5106_v38 = vld [vmem:[#allocation14 + $0x10] sm:$0xff] }
0x3a72   :  { %5531 = vmatprep.mubr.msk.f32.mxu1 %vm258_vm3, %v4489_v43 }
0x3a73   :  { %5532 = vmatmul.mubr.msk.f32.vlgmr.msra.gmra.mrb[32].mxu1 %vm258_vm3, %v4490_v41 }
0x3a74   :  { %5538 = vmatprep.mubr.msk.f32.mxu1 %vm3189_vm6, %v4579_v34 }
0x3a77   :  { %5971 = vmatpush3.bf16.xpose.msk.msra.mxu1 %vm7781_vm7, %v5966_v26 }
0x3a78   :  { %5979 = vmatprep.subr.bf16.mxu1 %v6731_v59 }
0x3a7e   :  { %5539 = vmatmul.mubr.msk.f32.vlgmr.msra.gmra.mrb[34].mxu1 %vm3189_vm6, %v4581_v46 }
0x3a7f   :  { %5571 = vmatprep.mubr.msk.f32.mxu1 %vm6732_vm10, %v6716_v1 }
0x3b46   :  { %v5533_v7 = vpop.f32.mrb[32].mxu1 }
0x3b47   :  { %v4569_v40 = vpop.f32.mrb[33].mxu1 }
0x3b48   :  { %v6140_v24 = vpack.i.bf16 %v5533_v7, %v4569_v40 }
0x3b51   :  { %v5540_v44 = vpop.f32.mrb[34].mxu1 }
0x3b52   :  { %v4666_v45 = vadd.f32 %v5540_v44, %v7804_v42  ;;  %v4660_v63 = vpop.f32.mrb[35].mxu1 }
0x3b53   :  { %v4661_v52 = vadd.f32 %v4660_v63, %v7806_v37 }
0x3b54   :  { %v4672_v18 = vsel %vm258_vm3, %v4666_v45, -inf }
0x3b55   :  { %4673 = vmax.xlane.f32.xlu0 %v4672_v18  ;;  %v4669_v62 = vsel %vm258_vm3, %v4661_v52, -inf }
0x3b56   :  { %4670 = vmax.xlane.f32.xlu1 %v4669_v62 }
0x3be2   :  { %v4674_v48 = vpop.xlane.xlu0 %4673 }
0x3be3   :  { %v4676_v3 = vsub.f32 %v4666_v45, %v4674_v48  ;;  %v4671_v12 = vpop.xlane.xlu1 %4670 }
0x3be4   :  { %v4675_v5 = vsub.f32 %v4661_v52, %v4671_v12 }
0x3be5   :  { %v4679_v35 = vmul.f32 1.442695, %v4676_v3 }
0x3be6   :  { %v4677_v15 = vmul.f32 1.442695, %v4675_v5 }
0x3be7   :  { %6462 = vpow2.f32 %v4679_v35 }
0x3be8   :  { %6464 = vpow2.f32 %v4677_v15 }
0x3bf1   :  { %v6463_v36 = vpop.eup %6462 }
0x3bf2   :  { %v6465_v23 = vpop.eup %6464  ;;  %v4684_v42 = vsel %vm258_vm3, %v6463_v36, 0.0 }
0x3bf3   :  { %4685 = vadd.xlane.f32.xlu1 %v4684_v42  ;;  %v4681_v37 = vsel %vm258_vm3, %v6465_v23, 0.0 }
0x3bf4   :  { %4682 = vadd.xlane.f32.xlu0 %v4681_v37 }
0x3c04   :  { %6116 = vrot.lane.b32.xlu1 %v6115_v57, %s6708_s30 }
0x3c08   :  { %6121 = vrot.lane.b32.xlu1 %v6120_v53, %s6704_s27 }
0x3c0a   :  { %6111 = vrot.lane.b32.xlu0 %v7769_v55, %s6730_s10 }
0x3c0c   :  { %6131 = vrot.lane.b32.xlu1 %v6130_v58, %s6721_s25  ;;  %v4928_v58 = vld [vmem:[#allocation11 + $0x8] sm:$0xff] }
0x3c0e   :  { %6126 = vrot.lane.b32.xlu0 %v6125_v54, %s6728_s16 }
0x3c10   :  { %6141 = vrot.lane.b32.xlu1 %v6140_v24, %s6722_s24 }
0x3c12   :  { %6136 = vrot.lane.b32.xlu0 %v6135_v33, %s6726_s0  ;;  %v5980_v33 = vpack.c.bf16 %v4928_v58, %v4927_v14  ;;  %v5021_v58 = vld [vmem:[%s8091_s13 + $0x30] sm:$0xff] }
0x3c14   :  { %5981 = vmatpush3.bf16.msra.mxu1 %v5980_v33  ;;  %v5104_v33 = vld [vmem:[#allocation14] sm:$0xff] }
0x3c15   :  { %5982 = vmatprep.subr.bf16.mxu1 %v6731_v59 }
0x3c18   :  { %5984 = vmatpush3.bf16.msra.mxu1 %v5983_v17 }
0x3c19   :  { %5985 = vmatprep.subr.bf16.mxu1 %v6731_v59 }
0x3c1c   :  { %5987 = vmatpush3.bf16.msra.mxu1 %v5986_v60  ;;  %v5107_v60 = vld [vmem:[#allocation14 + $0x18] sm:$0xff] }
0x3c1d   :  { %5988 = vmatprep.subr.bf16.mxu1 %v6731_v59  ;;  %v6007_v8 = vpack.c.bf16 %v5107_v60, %v5106_v38 }
0x3c20   :  { %5990 = vmatpush3.bf16.msra.mxu1 %v5989_v27 }
0x3c21   :  { %6003 = vmatprep.subr.bf16.mxu1 %v6731_v59 }
0x3c80   :  { %v4686_v31 = vpop.xlane.xlu1 %4685 }
0x3c81   :  { %6466 = vrcp.f32 %v4686_v31  ;;  %v4683_v55 = vpop.xlane.xlu0 %4682 }
0x3c82   :  { %6468 = vrcp.f32 %v4683_v55  ;;  %v4853_v55 = vsel %vm4852_vm15, 0.125, %v6716_v1 }
0x3c84   :  { %v6117_v30 = vpop.permute.xlu1 %6116 }
0x3c85   :  { %v6112_v49 = vpop.permute.xlu0 %6111  ;;  %v6119_v20 = vunpack.i.h.bf16 %v6117_v30  ;;  %v6118_v4 = vunpack.i.l.bf16 %v6117_v30 }
0x3c86   :  { %v6114_v57 = vunpack.i.h.bf16 %v6112_v49  ;;  %v6113_v32 = vunpack.i.l.bf16 %v6112_v49  ;;  %v5015_v49 = vld [vmem:[%s8091_s13] sm:$0xff] }
0x3c87   :  { %v4835_v21 = vsel %vm3189_vm6, %v7838_v22, %v6119_v20  ;;  %v4834_v28 = vsel %vm3189_vm6, %v7840_v0, %v6118_v4 }
0x3c88   :  { %v5972_v51 = vpack.c.bf16 %v6114_v57, %v6113_v32  ;;  %v6122_v29 = vpop.permute.xlu1 %6121  ;;  %v5016_v57 = vld [vmem:[%s8091_s13 + $0x8] sm:$0xff]  ;;  %v5018_v32 = vld [vmem:[%s8091_s13 + $0x18] sm:$0xff] }
0x3c89   :  { %v6127_v9 = vpop.permute.xlu0 %6126  ;;  %v6124_v16 = vunpack.i.h.bf16 %v6122_v29  ;;  %v6123_v26 = vunpack.i.l.bf16 %v6122_v29  ;;  %v5992_v47 = vpack.c.bf16 %v5016_v57, %v5015_v49 }
0x3c8a   :  { %5973 = vmatprep.subr.bf16.mxu0 %v5972_v51  ;;  %v6129_v43 = vunpack.i.h.bf16 %v6127_v9  ;;  %v6128_v41 = vunpack.i.l.bf16 %v6127_v9 }
0x3c8b   :  { %v6467_v53 = vpop.eup %6466  ;;  %5975 = vmatpush3.bf16.msra.mxu0 %v5972_v51  ;;  %v4836_v34 = vsel %vm258_vm3, %v4834_v28, %v6123_v26  ;;  %v4837_v46 = vsel %vm258_vm3, %v4835_v21, %v6124_v16  ;;  %v5995_v51 = vpack.c.bf16 %v5018_v32, %v5017_v50  ;;  %v5344_v16 = vld [vmem:[#allocation17] ss:$0 sm:$0xff] }
0x3c8c   :  { %v6469_v6 = vpop.eup %6468  ;;  %v4690_v54 = vmul.f32 %v6467_v53, %v6463_v36  ;;  %5976 = vmatprep.subr.bf16.mxu0 %v6731_v59  ;;  %v6132_v13 = vpop.permute.xlu1 %6131  ;;  %v4839_v45 = vsel %vm4838_vm11, %v4836_v34, %v6128_v41  ;;  %v4840_v63 = vsel %vm4838_vm11, %v4837_v46, %v6129_v43  ;;  %v5019_v53 = vld [vmem:[%s8091_s13 + $0x20] sm:$0xff] }
0x3c8d   :  { %v4689_v25 = vmul.f32 %v6469_v6, %v6465_v23  ;;  %v6134_v7 = vunpack.i.h.bf16 %v6132_v13  ;;  %v6133_v40 = vunpack.i.l.bf16 %v6132_v13  ;;  %v6137_v24 = vpop.permute.xlu0 %6136  ;;  %v5020_v6 = vld [vmem:[%s8091_s13 + $0x28] sm:$0xff]  ;;  %v5345_v43 = vld [vmem:[#allocation2] ss:$0 sm:$0xff] }
0x3c8e   :  { %v6139_v52 = vunpack.i.h.bf16 %v6137_v24  ;;  %v6138_v18 = vunpack.i.l.bf16 %v6137_v24 }
0x3c8f   :  { %5545 = vmatprep.mubr.msk.f32.mxu0 %vm258_vm3, %v4689_v25  ;;  %v4841_v22 = vsel %vm500_vm4, %v4839_v45, %v6133_v40  ;;  %v4842_v62 = vsel %vm500_vm4, %v4840_v63, %v6134_v7  ;;  %v5998_v25 = vpack.c.bf16 %v5020_v6, %v5019_v53 }
0x3c90   :  { %5546 = vmatmul.mubr.msk.f32.vlgmr.msra.gmra.mrb[38].mxu0 %vm258_vm3, %v4690_v54  ;;  %v6142_v44 = vpop.permute.xlu1 %6141  ;;  %v4844_v12 = vsel %vm4843_vm12, %v4841_v22, %v6138_v18  ;;  %v4845_v5 = vsel %vm4843_vm12, %v4842_v62, %v6139_v52 }
0x3c91   :  { %5552 = vmatprep.mubr.msk.f32.mxu0 %vm6732_vm10, %v6716_v1  ;;  %v6144_v0 = vunpack.i.h.bf16 %v6142_v44  ;;  %v6143_v48 = vunpack.i.l.bf16 %v6142_v44 }
0x3c93   :  { %v4847_v36 = vsel %vm4846_vm13, %v4844_v12, %v6143_v48  ;;  %v4848_v23 = vsel %vm4846_vm13, %v4845_v5, %v6144_v0 }
0x3d63   :  { %v5547_v61 = vpop.f32.mrb[38].mxu0 }
0x3d64   :  { %v4769_v2 = vpop.f32.mrb[39].mxu0 }
0x3d65   :  { %v6145_v11 = vpack.i.bf16 %v5547_v61, %v4769_v2  ;;  %v6001_v61 = vpack.c.bf16 %v5022_v19, %v5021_v58  ;;  %v6004_v2 = vpack.c.bf16 %v5105_v39, %v5104_v33 }
0x3d67   :  { %6146 = vrot.lane.b32.xlu0 %v6145_v11, %s6723_s7 }
0x3dd9   :  { %v6147_v3 = vpop.permute.xlu0 %6146 }
0x3dda   :  { %v6149_v35 = vunpack.i.h.bf16 %v6147_v3  ;;  %v6148_v15 = vunpack.i.l.bf16 %v6147_v3 }
0x3ddc   :  { %v4850_v42 = vsel %vm4849_vm14, %v4847_v36, %v6148_v15  ;;  %v4851_v37 = vsel %vm4849_vm14, %v4848_v23, %v6149_v35 }
0x3ddd   :  { %v5977_v31 = vpack.c.bf16 %v4851_v37, %v4850_v42 }
0x3ddf   :  { %5978 = vmatpush3.bf16.msra.mxu0 %v5977_v31 }
0x3de0   :  { %5991 = vmatprep.subr.bf16.mxu0 %v6731_v59 }
0x3de2   :  { %5553 = vmatmul.mubr.msk.f32.vlgmr.msra.gmra.mrb[40].mxu0 %vm258_vm3, %v4853_v55 }
0x3de3   :  { %5590 = vmatprep.mubr.msk.f32.mxu0 %vm6732_vm10, %v6716_v1  ;;  %5993 = vmatpush3.bf16.msra.mxu0 %v5992_v47 }
0x3de4   :  { %5994 = vmatprep.subr.bf16.mxu0 %v6731_v59 }
0x3de7   :  { %5996 = vmatpush3.bf16.msra.mxu0 %v5995_v51 }
0x3de8   :  { %5997 = vmatprep.subr.bf16.mxu0 %v6731_v59 }
0x3deb   :  { %5999 = vmatpush3.bf16.msra.mxu0 %v5998_v25 }
0x3dec   :  { %6000 = vmatprep.subr.bf16.mxu0 %v6731_v59 }
0x3def   :  { %6002 = vmatpush3.bf16.msra.mxu0 %v6001_v61 }
0x3eb5   :  { %v4923_v54 = vpop.f32.mrb[40].mxu0 }
0x3eb6   :  { %v5554_v14 = vpop.f32.mrb[41].mxu0  ;;  %5572 = vmatmul.mubr.msk.f32.vlgmr.msra.gmra.mrb[36].mxu1 %vm353_vm5, %v4923_v54 }
0x3eb7   :  { %5601 = vmatprep.mubr.msk.f32.mxu1 %vm6732_vm10, %v6716_v1  ;;  %6005 = vmatpush3.bf16.msra.mxu1 %v6004_v2  ;;  %v5338_v1 = vld [vmem:[%s8090_s12] ss:$0 sm:$0xff] }
0x3eb8   :  { %6006 = vmatprep.subr.bf16.mxu1 %v6731_v59  ;;  %v5342_v59 = vld [vmem:[#allocation16] ss:$0 sm:$0xff] }
0x3ebb   :  { %6008 = vmatpush3.bf16.msra.mxu1 %v6007_v8 }
0x3f89   :  { %v5011_v11 = vpop.f32.mrb[36].mxu1 }
0x3f8a   :  { %v5012_v17 = vadd.f32 %v5338_v1, %v5011_v11  ;;  %v5573_v56 = vpop.f32.mrb[37].mxu1 }
0x3f8c   :  { %5591 = vmatmul.mubr.msk.f32.vlgmr.msra.gmra.mrb[42].mxu0 %vm353_vm5, %v5012_v17 }
0x405f   :  { %v5099_v27 = vpop.f32.mrb[42].mxu0 }
0x4060   :  { %v5100_v30 = vadd.f32 %v5340_v10, %v5099_v27  ;;  %v5592_v29 = vpop.f32.mrb[43].mxu0 }
0x4062   :  { %v5103_v9 = vmax.f32 %v5100_v30, 0.0 }
0x4064   :  { %5602 = vmatmul.mubr.msk.f32.vlgmr.msra.gmra.mrb[38].mxu1 %vm500_vm4, %v5103_v9 }
0x4137   :  { %v5184_v20 = vpop.f32.mrb[38].mxu1 }
0x4138   :  { %v5185_v4 = vadd.f32 %v5342_v59, %v5184_v20  ;;  %v5603_v13 = vpop.f32.mrb[39].mxu1 }
0x413a   :  { %v5188_v26 = vmax.f32 %v5185_v4, 0.0 }
0x413c   :  { %v5196_v21 = vmul.f32 %v5344_v16, %v5188_v26 }
0x413e   :  { %v5198_v28 = vsel %vm5197_vm0, %v5196_v21, 0.0 }
0x413f   :  { %5199 = vadd.xlane.f32.xlu1 %v5198_v28 }
0x41cc   :  { %v5200_v41 = vpop.xlane.xlu1 %5199 }
0x41cd   :  { %v5208_v34 = vadd.f32 %v5345_v43, %v5200_v41 }
0x41cf   :  { %5210 = vst.msk [vmem:[%s8097_s19] sm:$0x3] %vm5209_vm1, %v5208_v34 }
0x41d0   :  { %5215 = vsyncpa [#allocation4], 1 }
0x41d1   :  { %5216 = vsyncpa [#allocation6], 1 }
0x41d2   :  { %5217 = vsyncpa [#allocation9], 1 }
0x41d3   :  { %5218 = vsyncpa [#allocation12], 1 }
0x41d4   :  { %5219 = vsyncpa [#allocation15], 1 }
0x41d5   :  { %5220 = vsyncpa [#allocation18], 1 }

</bundles_post_ra>
